<compile_context>
chip_gen: v7x
topology: tpu7x:2x2x1
jax: 0.10.0
libtpu: 0.0.40
codegen_flags: <defaults>
</compile_context>

<pallas_src>
import jax
import jax.numpy as jnp
from jax.experimental import pallas as pl
from jax.experimental.pallas import tpu as pltpu

BATCH_NORM_EPSILON = 0.001
LANE = 128  # channel dims padded to multiples of the TPU lane width


def _round_up(x, m):
    return (x + m - 1) // m * m


def _pick_tn(cout):
    # Whole-cout tiles keep the weight fully resident and avoid recomputing the
    # BN prologue per cout tile; cap for very wide layers.
    if cout <= 512:
        return cout
    if cout % 256 == 0:
        return 256
    return 128


# --------------------------------------------------------------------------
# Kernel 1: per-image BN statistics partials (only needed for the group input;
# every other BN gets its stats from the producing conv's fused epilogue).
# --------------------------------------------------------------------------
def _stats_partial_kernel(x_ref, s1_ref, s2_ref):
    _, h, w, c = x_ref.shape
    x = x_ref[0].astype(jnp.float32).reshape(h * w, c)
    s1_ref[0] = jnp.sum(x, axis=0, keepdims=True)
    s2_ref[0] = jnp.sum(x * x, axis=0, keepdims=True)


def batch_stats(x):
    n, h, w, c = x.shape
    s1p, s2p = pl.pallas_call(
        _stats_partial_kernel,
        out_shape=(jax.ShapeDtypeStruct((n, 1, c), jnp.float32),
                   jax.ShapeDtypeStruct((n, 1, c), jnp.float32)),
        grid=(n,),
        in_specs=[pl.BlockSpec((1, h, w, c), lambda b: (b, 0, 0, 0))],
        out_specs=(pl.BlockSpec((1, 1, c), lambda b: (b, 0, 0)),
                   pl.BlockSpec((1, 1, c), lambda b: (b, 0, 0))),
        compiler_params=pltpu.CompilerParams(
            dimension_semantics=("parallel",)),
    )(x)
    return jnp.sum(s1p, axis=0), jnp.sum(s2p, axis=0)   # each (1, c) f32


def _fold_bn(sums, sqs, count, gamma, beta):
    # Training-mode batch stats (biased var), folded so that
    # relu(BN(x)) == relu(x * scale + shift).
    mean = sums / count
    var = jnp.maximum(sqs / count - mean * mean, 0.0)
    scale = gamma * jax.lax.rsqrt(var + BATCH_NORM_EPSILON)
    shift = beta - mean * scale
    return scale, shift                                  # each (1, c) f32


# --------------------------------------------------------------------------
# Kernel 2: standalone BN apply + ReLU (only used for the conv-shortcut block,
# where h1 feeds both the strided 3x3 conv and the fused 1x1 shortcut).
# --------------------------------------------------------------------------
def _bn_apply_relu_kernel(x_ref, scale_ref, shift_ref, o_ref):
    _, _, _, c = x_ref.shape
    x = x_ref[...].astype(jnp.float32)
    s = scale_ref[...].reshape(1, 1, 1, c)
    t = shift_ref[...].reshape(1, 1, 1, c)
    o_ref[...] = jnp.maximum(x * s + t, 0.0).astype(o_ref.dtype)


def bn_apply_relu(x, scale, shift):
    n, h, w, c = x.shape
    return pl.pallas_call(
        _bn_apply_relu_kernel,
        out_shape=jax.ShapeDtypeStruct((n, h, w, c), jnp.bfloat16),
        grid=(n,),
        in_specs=[pl.BlockSpec((1, h, w, c), lambda b: (b, 0, 0, 0)),
                  pl.BlockSpec((1, c), lambda b: (0, 0)),
                  pl.BlockSpec((1, c), lambda b: (0, 0))],
        out_specs=pl.BlockSpec((1, h, w, c), lambda b: (b, 0, 0, 0)),
        compiler_params=pltpu.CompilerParams(
            dimension_semantics=("parallel",)),
    )(x, scale, shift)


# --------------------------------------------------------------------------
# Kernel 3: fused BN+ReLU -> 3x3 conv (stride 1, pad 1) [+ residual] -> bf16,
# with BN-stats epilogue.  Implicit im2col via a zero-padded VMEM scratch.
# --------------------------------------------------------------------------
def _conv3x3_body(x_ref, scale_ref, shift_ref, w_ref, r_ref,
                  o_ref, s1_ref, s2_ref, xpad_ref):
    _, h, w, c = x_ref.shape
    tn = o_ref.shape[-1]

    # BN + ReLU prologue on the raw activation tile (f32).
    x = x_ref[0].astype(jnp.float32)                         # (h, w, c)
    scale = scale_ref[...].reshape(1, 1, c)
    shift = shift_ref[...].reshape(1, 1, c)
    a = jnp.maximum(x * scale + shift, 0.0)

    # Zero-padded activation lives only in VMEM (no HBM pad copy). The border
    # stays exactly 0 (padding is applied *after* BN+ReLU, matching PyTorch).
    xpad_ref[...] = jnp.zeros_like(xpad_ref)
    xpad_ref[pl.ds(1, h), pl.ds(1, w), :] = a

    # Implicit im2col: 9 shifted-window (h*w, c) x (c, tn) matmuls, f32 acc.
    acc = jnp.zeros((h * w, tn), jnp.float32)
    for t in range(9):
        kh, kw = t // 3, t % 3
        atap = xpad_ref[pl.ds(kh, h), pl.ds(kw, w), :]       # (h, w, c) f32
        a2 = atap.reshape(h * w, c).astype(jnp.bfloat16)
        acc = acc + jnp.dot(a2, w_ref[t],
                            preferred_element_type=jnp.float32)

    if r_ref is not None:
        acc = acc + r_ref[0].astype(jnp.float32).reshape(h * w, tn)

    o_ref[0] = acc.reshape(h, w, tn).astype(o_ref.dtype)

    # BN-stats epilogue: per-image partial sum / sum-of-squares of the output
    # (consumed by the next BatchNorm; removes its separate HBM stats pass).
    s1_ref[0] = jnp.sum(acc, axis=0, keepdims=True)
    s2_ref[0] = jnp.sum(acc * acc, axis=0, keepdims=True)


def _conv3x3_kernel(x_ref, scale_ref, shift_ref, w_ref,
                    o_ref, s1_ref, s2_ref, xpad_ref):
    _conv3x3_body(x_ref, scale_ref, shift_ref, w_ref, None,
                  o_ref, s1_ref, s2_ref, xpad_ref)


def _conv3x3_res_kernel(x_ref, scale_ref, shift_ref, w_ref, r_ref,
                        o_ref, s1_ref, s2_ref, xpad_ref):
    _conv3x3_body(x_ref, scale_ref, shift_ref, w_ref, r_ref,
                  o_ref, s1_ref, s2_ref, xpad_ref)


def conv3x3_bn_fused(x, scale, shift, wmat, residual=None):
    """relu(BN(x)) -> 3x3 conv (stride 1) [-> +residual]; bf16 out + BN stats."""
    n, h, w, c = x.shape
    cout = wmat.shape[-1]
    tn = _pick_tn(cout)
    grid = (cout // tn, n)        # batch innermost -> weight stays resident

    in_specs = [
        pl.BlockSpec((1, h, w, c), lambda j, b: (b, 0, 0, 0)),
        pl.BlockSpec((1, c), lambda j, b: (0, 0)),
        pl.BlockSpec((1, c), lambda j, b: (0, 0)),
        pl.BlockSpec((9, c, tn), lambda j, b: (0, 0, j)),
    ]
    args = [x, scale, shift, wmat]
    kernel = _conv3x3_kernel
    if residual is not None:
        in_specs.append(pl.BlockSpec((1, h, w, tn), lambda j, b: (b, 0, 0, j)))
        args.append(residual)
        kernel = _conv3x3_res_kernel

    out, s1p, s2p = pl.pallas_call(
        kernel,
        out_shape=(jax.ShapeDtypeStruct((n, h, w, cout), jnp.bfloat16),
                   jax.ShapeDtypeStruct((n, 1, cout), jnp.float32),
                   jax.ShapeDtypeStruct((n, 1, cout), jnp.float32)),
        grid=grid,
        in_specs=in_specs,
        out_specs=(pl.BlockSpec((1, h, w, tn), lambda j, b: (b, 0, 0, j)),
                   pl.BlockSpec((1, 1, tn), lambda j, b: (b, 0, j)),
                   pl.BlockSpec((1, 1, tn), lambda j, b: (b, 0, j))),
        scratch_shapes=[pltpu.VMEM((h + 2, w + 2, c), jnp.float32)],
        compiler_params=pltpu.CompilerParams(
            dimension_semantics=("parallel", "parallel")),
    )(*args)
    return out, (jnp.sum(s1p, axis=0), jnp.sum(s2p, axis=0))


# --------------------------------------------------------------------------
# Kernel 4: strided (or stride-1) 3x3 conv of a conv-shortcut block via
# explicit im2col, with the 1x1 shortcut conv and BN-stats epilogue fused in.
# --------------------------------------------------------------------------
def _im2col_conv_kernel(a_ref, w_ref, wsc_ref, o_ref, s1_ref, s2_ref, sc_ref):
    c = wsc_ref.shape[0]
    a = a_ref[0]                                              # (m, 9c) bf16
    acc = jnp.dot(a, w_ref[...], preferred_element_type=jnp.float32)
    o_ref[0] = acc.astype(o_ref.dtype)
    s1_ref[0] = jnp.sum(acc, axis=0, keepdims=True)
    s2_ref[0] = jnp.sum(acc * acc, axis=0, keepdims=True)
    # 1x1 shortcut fused: its input is exactly the center (kh=kw=1) tap.
    a_center = a[:, 4 * c:5 * c]
    sc_ref[0] = jnp.dot(a_center, wsc_ref[...],
                        preferred_element_type=jnp.float32).astype(sc_ref.dtype)


def conv3x3_shortcut_block(h1, wmat, wsc, stride):
    # TODO(synk): fuse the strided im2col in-kernel (polyphase decomposition)
    # to remove this path's 9x patch materialization as well.
    n, h, w, c = h1.shape
    cout = wmat.shape[-1]
    ho = (h + 2 - 3) // stride + 1
    wo = (w + 2 - 3) // stride + 1
    m = ho * wo

    xp = jnp.pad(h1, ((0, 0), (1, 1), (1, 1), (0, 0)))
    taps = []
    for kh in range(3):
        for kw in range(3):
            taps.append(jax.lax.slice(
                xp, (0, kh, kw, 0),
                (n, kh + stride * (ho - 1) + 1,
                 kw + stride * (wo - 1) + 1, c),
                (1, stride, stride, 1)))
    patches = jnp.concatenate(taps, axis=-1).reshape(n, m, 9 * c)

    tn = _pick_tn(cout)
    grid = (cout // tn, n)
    c1, s1p, s2p, sc = pl.pallas_call(
        _im2col_conv_kernel,
        out_shape=(jax.ShapeDtypeStruct((n, m, cout), jnp.bfloat16),
                   jax.ShapeDtypeStruct((n, 1, cout), jnp.float32),
                   jax.ShapeDtypeStruct((n, 1, cout), jnp.float32),
                   jax.ShapeDtypeStruct((n, m, cout), jnp.bfloat16)),
        grid=grid,
        in_specs=[pl.BlockSpec((1, m, 9 * c), lambda j, b: (b, 0, 0)),
                  pl.BlockSpec((9 * c, tn), lambda j, b: (0, j)),
                  pl.BlockSpec((c, tn), lambda j, b: (0, j))],
        out_specs=(pl.BlockSpec((1, m, tn), lambda j, b: (b, 0, j)),
                   pl.BlockSpec((1, 1, tn), lambda j, b: (b, 0, j)),
                   pl.BlockSpec((1, 1, tn), lambda j, b: (b, 0, j)),
                   pl.BlockSpec((1, m, tn), lambda j, b: (b, 0, j))),
        compiler_params=pltpu.CompilerParams(
            dimension_semantics=("parallel", "parallel")),
    )(patches, wmat.reshape(9 * c, cout), wsc)
    return (c1.reshape(n, ho, wo, cout),
            (jnp.sum(s1p, axis=0), jnp.sum(s2p, axis=0)),
            sc.reshape(n, ho, wo, cout))


# --------------------------------------------------------------------------
# ResidualBlock / ResidualGroup forward (channel-padded bf16 NHWC internally)
# --------------------------------------------------------------------------
def residual_block(x, x_stats, p, stride):
    n, h, w, _ = x.shape
    count = float(n * h * w)
    scale1, shift1 = _fold_bn(x_stats[0], x_stats[1], count,
                              p["bn1_gamma"], p["bn1_beta"])

    if p["shortcut_wmat"] is not None:
        # conv-shortcut block: h1 feeds both the 3x3 conv and the 1x1 shortcut.
        h1 = bn_apply_relu(x, scale1, shift1)
        c1, c1_stats, shortcut = conv3x3_shortcut_block(
            h1, p["conv1_wmat"], p["shortcut_wmat"], stride)
    else:
        assert stride == 1
        shortcut = x                                          # identity residual
        c1, c1_stats = conv3x3_bn_fused(x, scale1, shift1, p["conv1_wmat"])

    nh, nw = c1.shape[1], c1.shape[2]
    scale2, shift2 = _fold_bn(c1_stats[0], c1_stats[1], float(n * nh * nw),
                              p["bn2_gamma"], p["bn2_beta"])
    out, out_stats = conv3x3_bn_fused(c1, scale2, shift2, p["conv2_wmat"],
                                      residual=shortcut)
    return out, out_stats


def residual_group(x_nchw, prepared_params, stride, out_channels):
    x = jnp.transpose(x_nchw, (0, 2, 3, 1))                   # NCHW -> NHWC
    cin = x.shape[-1]
    cp = _round_up(cin, LANE)
    if cp != cin:
        x = jnp.pad(x, ((0, 0), (0, 0), (0, 0), (0, cp - cin)))
    x = x.astype(jnp.bfloat16)                                 # lane-dense bf16
    stats = batch_stats(x)                                     # BN1 stats, block 1
    for i, p in enumerate(prepared_params):
        x, stats = residual_block(x, stats, p, stride if i == 0 else 1)
    out = x[..., :out_channels].astype(jnp.float32)
    return jnp.transpose(out, (0, 3, 1, 2))                    # NHWC -> NCHW


# --------------------------------------------------------------------------
# Parameter init (PyTorch layouts) + one-time prepack (pad + bf16, hoisted)
# --------------------------------------------------------------------------
def init_block_params(key, cin, cout, stride):
    ks = jax.random.split(key, 7)
    conv_shortcut = (stride != 1) or (cin != cout)
    return {
        "bn1_gamma": 1.0 + 0.1 * jax.random.normal(ks[0], (cin,), jnp.float32),
        "bn1_beta": 0.1 * jax.random.normal(ks[1], (cin,), jnp.float32),
        "conv1_w": 0.1 * jax.random.normal(ks[2], (cout, cin, 3, 3), jnp.float32),
        "bn2_gamma": 1.0 + 0.1 * jax.random.normal(ks[3], (cout,), jnp.float32),
        "bn2_beta": 0.1 * jax.random.normal(ks[4], (cout,), jnp.float32),
        "conv2_w": 0.1 * jax.random.normal(ks[5], (cout, cout, 3, 3), jnp.float32),
        "shortcut_w": (0.1 * jax.random.normal(ks[6], (cout, cin, 1, 1), jnp.float32)
                       if conv_shortcut else None),
    }


def _pad_vec(v, cp, fill):
    c = v.shape[0]
    v = v.astype(jnp.float32)
    if cp != c:
        v = jnp.concatenate([v, jnp.full((cp - c,), fill, jnp.float32)])
    return v.reshape(1, cp)


def _pack_conv3(w, cp_in, cp_out):
    cout, cin = w.shape[0], w.shape[1]
    wm = jnp.transpose(w, (2, 3, 1, 0))                        # (3,3,cin,cout)
    wm = jnp.pad(wm, ((0, 0), (0, 0), (0, cp_in - cin), (0, cp_out - cout)))
    return wm.reshape(9, cp_in, cp_out).astype(jnp.bfloat16)   # tap-major packing


def _pack_conv1(w, cp_in, cp_out):
    cout, cin = w.shape[0], w.shape[1]
    wm = jnp.transpose(w.reshape(cout, cin), (1, 0))           # (cin, cout)
    wm = jnp.pad(wm, ((0, cp_in - cin), (0, cp_out - cout)))
    return wm.astype(jnp.bfloat16)


def prepare_block_params(p):
    cout, cin = p["conv1_w"].shape[0], p["conv1_w"].shape[1]
    cp_in, cp_out = _round_up(cin, LANE), _round_up(cout, LANE)
    return {
        "bn1_gamma": _pad_vec(p["bn1_gamma"], cp_in, 1.0),
        "bn1_beta": _pad_vec(p["bn1_beta"], cp_in, 0.0),
        "conv1_wmat": _pack_conv3(p["conv1_w"], cp_in, cp_out),
        "bn2_gamma": _pad_vec(p["bn2_gamma"], cp_out, 1.0),
        "bn2_beta": _pad_vec(p["bn2_beta"], cp_out, 0.0),
        "conv2_wmat": _pack_conv3(p["conv2_w"], cp_out, cp_out),
        "shortcut_wmat": (None if p["shortcut_w"] is None
                          else _pack_conv1(p["shortcut_w"], cp_in, cp_out)),
    }


if __name__ == "__main__":
    key = jax.random.PRNGKey(0)
    k_x, k_p = jax.random.split(key)

    # ResidualGroup(input_channels=4, channels=8, num_blocks=2, stride=2)
    N, Cin, H, W = 2, 4, 16, 16
    channels, num_blocks, stride = 8, 2, 2

    x = jax.random.normal(k_x, (N, Cin, H, W), jnp.float32)    # NCHW input

    block_keys = jax.random.split(k_p, num_blocks)
    raw_params = [init_block_params(block_keys[0], Cin, channels, stride)]
    for i in range(1, num_blocks):
        raw_params.append(init_block_params(block_keys[i], channels, channels, 1))
    params = [prepare_block_params(p) for p in raw_params]     # prepacked once

    fwd = jax.jit(lambda xx, pp: residual_group(xx, pp, stride, channels))
    out = fwd(x, params)
    jax.block_until_ready(out)

    assert out.shape == (N, channels, H // stride, W // stride)
    assert bool(jnp.all(jnp.isfinite(out)))
    print("KERNEL_OK")
</pallas_src>

<mosaic_0001>
module attributes {stable_mosaic.version = 11 : i64} {
  func.func @_stats_partial_kernel(%arg0: i32, %arg1: memref<1x16x16x128xbf16, #tpu.memory_space<vmem>>, %arg2: memref<1x1x128xf32, #tpu.memory_space<vmem>>, %arg3: memref<1x1x128xf32, #tpu.memory_space<vmem>>) attributes {dimension_semantics = [#tpu.dimension_semantics<parallel>], iteration_bounds = array<i64: 2>, scalar_prefetch = 0 : i64, scratch_operands = 0 : i64, tpu.core_type = #tpu.core_type<tc>, window_params = [{transform_indices = @transform_0, window_bounds = array<i64: 1, 16, 16, 128>}, {transform_indices = @transform_1, window_bounds = array<i64: 1, 1, 128>}, {transform_indices = @transform_2, window_bounds = array<i64: 1, 1, 128>}]} {
    %c0 = arith.constant 0 : index
    %c0_0 = arith.constant 0 : index
    %c0_1 = arith.constant 0 : index
    %c0_2 = arith.constant 0 : index
    %0 = vector.load %arg1[%c0, %c0_0, %c0_1, %c0_2] : memref<1x16x16x128xbf16, #tpu.memory_space<vmem>>, vector<1x16x16x128xbf16>
    %1 = vector.shape_cast %0 : vector<1x16x16x128xbf16> to vector<16x16x128xbf16>
    %2 = arith.extf %1 : vector<16x16x128xbf16> to vector<16x16x128xf32>
    %3 = vector.shape_cast %2 : vector<16x16x128xf32> to vector<256x128xf32>
    %cst = arith.constant dense<0.000000e+00> : vector<128xf32>
    %4 = vector.multi_reduction <add>, %3, %cst [0] : vector<256x128xf32> to vector<128xf32>
    %5 = vector.shape_cast %4 : vector<128xf32> to vector<1x128xf32>
    %c0_3 = arith.constant 0 : index
    %c0_4 = arith.constant 0 : index
    %c0_5 = arith.constant 0 : index
    %6 = vector.load %arg2[%c0_3, %c0_4, %c0_5] : memref<1x1x128xf32, #tpu.memory_space<vmem>>, vector<1x1x128xf32>
    %7 = vector.shape_cast %6 : vector<1x1x128xf32> to vector<1x128xf32>
    %8 = vector.shape_cast %5 : vector<1x128xf32> to vector<1x1x128xf32>
    tpu.vector_store %arg2[%c0_3, %c0_4, %c0_5], %8 {strides = array<i32>} : memref<1x1x128xf32, #tpu.memory_space<vmem>>, vector<1x1x128xf32>,
    %9 = arith.mulf %3, %3 : vector<256x128xf32>
    %cst_6 = arith.constant dense<0.000000e+00> : vector<128xf32>
    %10 = vector.multi_reduction <add>, %9, %cst_6 [0] : vector<256x128xf32> to vector<128xf32>
    %11 = vector.shape_cast %10 : vector<128xf32> to vector<1x128xf32>
    %c0_7 = arith.constant 0 : index
    %c0_8 = arith.constant 0 : index
    %c0_9 = arith.constant 0 : index
    %12 = vector.load %arg3[%c0_7, %c0_8, %c0_9] : memref<1x1x128xf32, #tpu.memory_space<vmem>>, vector<1x1x128xf32>
    %13 = vector.shape_cast %12 : vector<1x1x128xf32> to vector<1x128xf32>
    %14 = vector.shape_cast %11 : vector<1x128xf32> to vector<1x1x128xf32>
    tpu.vector_store %arg3[%c0_7, %c0_8, %c0_9], %14 {strides = array<i32>} : memref<1x1x128xf32, #tpu.memory_space<vmem>>, vector<1x1x128xf32>,
    return
  }
  func.func @transform_0(%arg0: i32) -> (i32, i32, i32, i32) {
    %c0_i32 = arith.constant 0 : i32
    %c0_i32_0 = arith.constant 0 : i32
    %c0_i32_1 = arith.constant 0 : i32
    %c0_i32_2 = arith.constant 0 : i32
    return %arg0, %c0_i32, %c0_i32_0, %c0_i32_1 : i32, i32, i32, i32
  }
  func.func @transform_1(%arg0: i32) -> (i32, i32, i32) {
    %c0_i32 = arith.constant 0 : i32
    %c0_i32_0 = arith.constant 0 : i32
    %c0_i32_1 = arith.constant 0 : i32
    return %arg0, %c0_i32, %c0_i32_0 : i32, i32, i32
  }
  func.func @transform_2(%arg0: i32) -> (i32, i32, i32) {
    %c0_i32 = arith.constant 0 : i32
    %c0_i32_0 = arith.constant 0 : i32
    %c0_i32_1 = arith.constant 0 : i32
    return %arg0, %c0_i32, %c0_i32_0 : i32, i32, i32
  }
}

module attributes {stable_mosaic.version = 11 : i64} {
  func.func @_bn_apply_relu_kernel(%arg0: i32, %arg1: memref<1x16x16x128xbf16, #tpu.memory_space<vmem>>, %arg2: memref<1x128xf32, #tpu.memory_space<vmem>>, %arg3: memref<1x128xf32, #tpu.memory_space<vmem>>, %arg4: memref<1x16x16x128xbf16, #tpu.memory_space<vmem>>) attributes {dimension_semantics = [#tpu.dimension_semantics<parallel>], iteration_bounds = array<i64: 2>, scalar_prefetch = 0 : i64, scratch_operands = 0 : i64, tpu.core_type = #tpu.core_type<tc>, window_params = [{transform_indices = @transform_0, window_bounds = array<i64: 1, 16, 16, 128>}, {pipeline_mode = #tpu.pipeline_mode<synchronous>, transform_indices = @transform_1, window_bounds = array<i64: 1, 128>}, {pipeline_mode = #tpu.pipeline_mode<synchronous>, transform_indices = @transform_2, window_bounds = array<i64: 1, 128>}, {transform_indices = @transform_3, window_bounds = array<i64: 1, 16, 16, 128>}]} {
    %c0 = arith.constant 0 : index
    %c0_0 = arith.constant 0 : index
    %c0_1 = arith.constant 0 : index
    %c0_2 = arith.constant 0 : index
    %0 = vector.load %arg1[%c0, %c0_0, %c0_1, %c0_2] : memref<1x16x16x128xbf16, #tpu.memory_space<vmem>>, vector<1x16x16x128xbf16>
    %1 = arith.extf %0 : vector<1x16x16x128xbf16> to vector<1x16x16x128xf32>
    %c0_3 = arith.constant 0 : index
    %c0_4 = arith.constant 0 : index
    %2 = vector.load %arg2[%c0_3, %c0_4] : memref<1x128xf32, #tpu.memory_space<vmem>>, vector<1x128xf32>
    %3 = vector.shape_cast %2 : vector<1x128xf32> to vector<1x1x1x128xf32>
    %c0_5 = arith.constant 0 : index
    %c0_6 = arith.constant 0 : index
    %4 = vector.load %arg3[%c0_5, %c0_6] : memref<1x128xf32, #tpu.memory_space<vmem>>, vector<1x128xf32>
    %5 = vector.shape_cast %4 : vector<1x128xf32> to vector<1x1x1x128xf32>
    %6 = vector.broadcast %3 : vector<1x1x1x128xf32> to vector<1x16x16x128xf32>
    %7 = arith.mulf %1, %6 : vector<1x16x16x128xf32>
    %8 = vector.broadcast %5 : vector<1x1x1x128xf32> to vector<1x16x16x128xf32>
    %9 = arith.addf %7, %8 : vector<1x16x16x128xf32>
    %cst = arith.constant 0.000000e+00 : f32
    %10 = vector.broadcast %cst : f32 to vector<1x16x16x128xf32>
    %11 = arith.maximumf %9, %10 : vector<1x16x16x128xf32>
    %12 = arith.truncf %11 : vector<1x16x16x128xf32> to vector<1x16x16x128xbf16>
    %c0_7 = arith.constant 0 : index
    %c0_8 = arith.constant 0 : index
    %c0_9 = arith.constant 0 : index
    %c0_10 = arith.constant 0 : index
    %13 = vector.load %arg4[%c0_7, %c0_8, %c0_9, %c0_10] : memref<1x16x16x128xbf16, #tpu.memory_space<vmem>>, vector<1x16x16x128xbf16>
    tpu.vector_store %arg4[%c0_7, %c0_8, %c0_9, %c0_10], %12 {strides = array<i32>} : memref<1x16x16x128xbf16, #tpu.memory_space<vmem>>, vector<1x16x16x128xbf16>,
    return
  }
  func.func @transform_0(%arg0: i32) -> (i32, i32, i32, i32) {
    %c0_i32 = arith.constant 0 : i32
    %c0_i32_0 = arith.constant 0 : i32
    %c0_i32_1 = arith.constant 0 : i32
    %c0_i32_2 = arith.constant 0 : i32
    return %arg0, %c0_i32, %c0_i32_0, %c0_i32_1 : i32, i32, i32, i32
  }
  func.func @transform_1(%arg0: i32) -> (i32, i32) {
    %c0_i32 = arith.constant 0 : i32
    %c0_i32_0 = arith.constant 0 : i32
    %c0_i32_1 = arith.constant 0 : i32
    return %c0_i32, %c0_i32_0 : i32, i32
  }
  func.func @transform_2(%arg0: i32) -> (i32, i32) {
    %c0_i32 = arith.constant 0 : i32
    %c0_i32_0 = arith.constant 0 : i32
    %c0_i32_1 = arith.constant 0 : i32
    return %c0_i32, %c0_i32_0 : i32, i32
  }
  func.func @transform_3(%arg0: i32) -> (i32, i32, i32, i32) {
    %c0_i32 = arith.constant 0 : i32
    %c0_i32_0 = arith.constant 0 : i32
    %c0_i32_1 = arith.constant 0 : i32
    %c0_i32_2 = arith.constant 0 : i32
    return %arg0, %c0_i32, %c0_i32_0, %c0_i32_1 : i32, i32, i32, i32
  }
}

module attributes {stable_mosaic.version = 11 : i64} {
  func.func @_im2col_conv_kernel(%arg0: i32, %arg1: i32, %arg2: memref<1x64x1152xbf16, #tpu.memory_space<vmem>>, %arg3: memref<1152x128xbf16, #tpu.memory_space<vmem>>, %arg4: memref<128x128xbf16, #tpu.memory_space<vmem>>, %arg5: memref<1x64x128xbf16, #tpu.memory_space<vmem>>, %arg6: memref<1x1x128xf32, #tpu.memory_space<vmem>>, %arg7: memref<1x1x128xf32, #tpu.memory_space<vmem>>, %arg8: memref<1x64x128xbf16, #tpu.memory_space<vmem>>) attributes {dimension_semantics = [#tpu.dimension_semantics<parallel>, #tpu.dimension_semantics<parallel>], iteration_bounds = array<i64: 1, 2>, scalar_prefetch = 0 : i64, scratch_operands = 0 : i64, tpu.core_type = #tpu.core_type<tc>, window_params = [{transform_indices = @transform_0, window_bounds = array<i64: 1, 64, 1152>}, {transform_indices = @transform_1, window_bounds = array<i64: 1152, 128>}, {transform_indices = @transform_2, window_bounds = array<i64: 128, 128>}, {transform_indices = @transform_3, window_bounds = array<i64: 1, 64, 128>}, {transform_indices = @transform_4, window_bounds = array<i64: 1, 1, 128>}, {transform_indices = @transform_5, window_bounds = array<i64: 1, 1, 128>}, {transform_indices = @transform_6, window_bounds = array<i64: 1, 64, 128>}]} {
    %c0 = arith.constant 0 : index
    %c0_0 = arith.constant 0 : index
    %c0_1 = arith.constant 0 : index
    %0 = vector.load %arg2[%c0, %c0_0, %c0_1] : memref<1x64x1152xbf16, #tpu.memory_space<vmem>>, vector<1x64x1152xbf16>
    %1 = vector.shape_cast %0 : vector<1x64x1152xbf16> to vector<64x1152xbf16>
    %c0_2 = arith.constant 0 : index
    %c0_3 = arith.constant 0 : index
    %2 = vector.load %arg3[%c0_2, %c0_3] : memref<1152x128xbf16, #tpu.memory_space<vmem>>, vector<1152x128xbf16>
    %cst = arith.constant dense<0.000000e+00> : vector<64x128xf32>
    %3 = tpu.matmul %1, %2, %cst {dimension_numbers = #tpu.dot_dimension_numbers<[1], [0], [0], [1], [0, 0, 1, 1], [], []>} : vector<64x1152xbf16>, vector<1152x128xbf16>, vector<64x128xf32> -> vector<64x128xf32>
    %4 = arith.truncf %3 : vector<64x128xf32> to vector<64x128xbf16>
    %c0_4 = arith.constant 0 : index
    %c0_5 = arith.constant 0 : index
    %c0_6 = arith.constant 0 : index
    %5 = vector.load %arg5[%c0_4, %c0_5, %c0_6] : memref<1x64x128xbf16, #tpu.memory_space<vmem>>, vector<1x64x128xbf16>
    %6 = vector.shape_cast %5 : vector<1x64x128xbf16> to vector<64x128xbf16>
    %7 = vector.shape_cast %4 : vector<64x128xbf16> to vector<1x64x128xbf16>
    tpu.vector_store %arg5[%c0_4, %c0_5, %c0_6], %7 {strides = array<i32>} : memref<1x64x128xbf16, #tpu.memory_space<vmem>>, vector<1x64x128xbf16>,
    %cst_7 = arith.constant dense<0.000000e+00> : vector<128xf32>
    %8 = vector.multi_reduction <add>, %3, %cst_7 [0] : vector<64x128xf32> to vector<128xf32>
    %9 = vector.shape_cast %8 : vector<128xf32> to vector<1x128xf32>
    %c0_8 = arith.constant 0 : index
    %c0_9 = arith.constant 0 : index
    %c0_10 = arith.constant 0 : index
    %10 = vector.load %arg6[%c0_8, %c0_9, %c0_10] : memref<1x1x128xf32, #tpu.memory_space<vmem>>, vector<1x1x128xf32>
    %11 = vector.shape_cast %10 : vector<1x1x128xf32> to vector<1x128xf32>
    %12 = vector.shape_cast %9 : vector<1x128xf32> to vector<1x1x128xf32>
    tpu.vector_store %arg6[%c0_8, %c0_9, %c0_10], %12 {strides = array<i32>} : memref<1x1x128xf32, #tpu.memory_space<vmem>>, vector<1x1x128xf32>,
    %13 = arith.mulf %3, %3 : vector<64x128xf32>
    %cst_11 = arith.constant dense<0.000000e+00> : vector<128xf32>
    %14 = vector.multi_reduction <add>, %13, %cst_11 [0] : vector<64x128xf32> to vector<128xf32>
    %15 = vector.shape_cast %14 : vector<128xf32> to vector<1x128xf32>
    %c0_12 = arith.constant 0 : index
    %c0_13 = arith.constant 0 : index
    %c0_14 = arith.constant 0 : index
    %16 = vector.load %arg7[%c0_12, %c0_13, %c0_14] : memref<1x1x128xf32, #tpu.memory_space<vmem>>, vector<1x1x128xf32>
    %17 = vector.shape_cast %16 : vector<1x1x128xf32> to vector<1x128xf32>
    %18 = vector.shape_cast %15 : vector<1x128xf32> to vector<1x1x128xf32>
    tpu.vector_store %arg7[%c0_12, %c0_13, %c0_14], %18 {strides = array<i32>} : memref<1x1x128xf32, #tpu.memory_space<vmem>>, vector<1x1x128xf32>,
    %19 = vector.extract_strided_slice %1 {offsets = [0, 512], sizes = [64, 128], strides = [1, 1]} : vector<64x1152xbf16> to vector<64x128xbf16>
    %c0_15 = arith.constant 0 : index
    %c0_16 = arith.constant 0 : index
    %20 = vector.load %arg4[%c0_15, %c0_16] : memref<128x128xbf16, #tpu.memory_space<vmem>>, vector<128x128xbf16>
    %cst_17 = arith.constant dense<0.000000e+00> : vector<64x128xf32>
    %21 = tpu.matmul %19, %20, %cst_17 {dimension_numbers = #tpu.dot_dimension_numbers<[1], [0], [0], [1], [0, 0, 1, 1], [], []>} : vector<64x128xbf16>, vector<128x128xbf16>, vector<64x128xf32> -> vector<64x128xf32>
    %22 = arith.truncf %21 : vector<64x128xf32> to vector<64x128xbf16>
    %c0_18 = arith.constant 0 : index
    %c0_19 = arith.constant 0 : index
    %c0_20 = arith.constant 0 : index
    %23 = vector.load %arg8[%c0_18, %c0_19, %c0_20] : memref<1x64x128xbf16, #tpu.memory_space<vmem>>, vector<1x64x128xbf16>
    %24 = vector.shape_cast %23 : vector<1x64x128xbf16> to vector<64x128xbf16>
    %25 = vector.shape_cast %22 : vector<64x128xbf16> to vector<1x64x128xbf16>
    tpu.vector_store %arg8[%c0_18, %c0_19, %c0_20], %25 {strides = array<i32>} : memref<1x64x128xbf16, #tpu.memory_space<vmem>>, vector<1x64x128xbf16>,
    return
  }
  func.func @transform_0(%arg0: i32, %arg1: i32) -> (i32, i32, i32) {
    %c0_i32 = arith.constant 0 : i32
    %c0_i32_0 = arith.constant 0 : i32
    %c0_i32_1 = arith.constant 0 : i32
    return %arg1, %c0_i32, %c0_i32_0 : i32, i32, i32
  }
  func.func @transform_1(%arg0: i32, %arg1: i32) -> (i32, i32) {
    %c0_i32 = arith.constant 0 : i32
    %c0_i32_0 = arith.constant 0 : i32
    return %c0_i32, %arg0 : i32, i32
  }
  func.func @transform_2(%arg0: i32, %arg1: i32) -> (i32, i32) {
    %c0_i32 = arith.constant 0 : i32
    %c0_i32_0 = arith.constant 0 : i32
    return %c0_i32, %arg0 : i32, i32
  }
  func.func @transform_3(%arg0: i32, %arg1: i32) -> (i32, i32, i32) {
    %c0_i32 = arith.constant 0 : i32
    %c0_i32_0 = arith.constant 0 : i32
    return %arg1, %c0_i32, %arg0 : i32, i32, i32
  }
  func.func @transform_4(%arg0: i32, %arg1: i32) -> (i32, i32, i32) {
    %c0_i32 = arith.constant 0 : i32
    %c0_i32_0 = arith.constant 0 : i32
    return %arg1, %c0_i32, %arg0 : i32, i32, i32
  }
  func.func @transform_5(%arg0: i32, %arg1: i32) -> (i32, i32, i32) {
    %c0_i32 = arith.constant 0 : i32
    %c0_i32_0 = arith.constant 0 : i32
    return %arg1, %c0_i32, %arg0 : i32, i32, i32
  }
  func.func @transform_6(%arg0: i32, %arg1: i32) -> (i32, i32, i32) {
    %c0_i32 = arith.constant 0 : i32
    %c0_i32_0 = arith.constant 0 : i32
    return %arg1, %c0_i32, %arg0 : i32, i32, i32
  }
}

module attributes {stable_mosaic.version = 11 : i64} {
  func.func @_conv3x3_res_kernel(%arg0: i32, %arg1: i32, %arg2: memref<1x8x8x128xbf16, #tpu.memory_space<vmem>>, %arg3: memref<1x128xf32, #tpu.memory_space<vmem>>, %arg4: memref<1x128xf32, #tpu.memory_space<vmem>>, %arg5: memref<9x128x128xbf16, #tpu.memory_space<vmem>>, %arg6: memref<1x8x8x128xbf16, #tpu.memory_space<vmem>>, %arg7: memref<1x8x8x128xbf16, #tpu.memory_space<vmem>>, %arg8: memref<1x1x128xf32, #tpu.memory_space<vmem>>, %arg9: memref<1x1x128xf32, #tpu.memory_space<vmem>>, %arg10: memref<10x10x128xf32, #tpu.memory_space<vmem>>) attributes {dimension_semantics = [#tpu.dimension_semantics<parallel>, #tpu.dimension_semantics<parallel>], iteration_bounds = array<i64: 1, 2>, scalar_prefetch = 0 : i64, scratch_operands = 1 : i64, tpu.core_type = #tpu.core_type<tc>, window_params = [{transform_indices = @transform_0, window_bounds = array<i64: 1, 8, 8, 128>}, {pipeline_mode = #tpu.pipeline_mode<synchronous>, transform_indices = @transform_1, window_bounds = array<i64: 1, 128>}, {pipeline_mode = #tpu.pipeline_mode<synchronous>, transform_indices = @transform_2, window_bounds = array<i64: 1, 128>}, {transform_indices = @transform_3, window_bounds = array<i64: 9, 128, 128>}, {transform_indices = @transform_4, window_bounds = array<i64: 1, 8, 8, 128>}, {transform_indices = @transform_5, window_bounds = array<i64: 1, 8, 8, 128>}, {transform_indices = @transform_6, window_bounds = array<i64: 1, 1, 128>}, {transform_indices = @transform_7, window_bounds = array<i64: 1, 1, 128>}]} {
    %c0 = arith.constant 0 : index
    %c0_0 = arith.constant 0 : index
    %c0_1 = arith.constant 0 : index
    %c0_2 = arith.constant 0 : index
    %0 = vector.load %arg2[%c0, %c0_0, %c0_1, %c0_2] : memref<1x8x8x128xbf16, #tpu.memory_space<vmem>>, vector<1x8x8x128xbf16>
    %1 = vector.shape_cast %0 : vector<1x8x8x128xbf16> to vector<8x8x128xbf16>
    %2 = arith.extf %1 : vector<8x8x128xbf16> to vector<8x8x128xf32>
    %c0_3 = arith.constant 0 : index
    %c0_4 = arith.constant 0 : index
    %3 = vector.load %arg3[%c0_3, %c0_4] : memref<1x128xf32, #tpu.memory_space<vmem>>, vector<1x128xf32>
    %4 = vector.shape_cast %3 : vector<1x128xf32> to vector<1x1x128xf32>
    %c0_5 = arith.constant 0 : index
    %c0_6 = arith.constant 0 : index
    %5 = vector.load %arg4[%c0_5, %c0_6] : memref<1x128xf32, #tpu.memory_space<vmem>>, vector<1x128xf32>
    %6 = vector.shape_cast %5 : vector<1x128xf32> to vector<1x1x128xf32>
    %7 = vector.broadcast %4 : vector<1x1x128xf32> to vector<8x8x128xf32>
    %8 = arith.mulf %2, %7 : vector<8x8x128xf32>
    %9 = vector.broadcast %6 : vector<1x1x128xf32> to vector<8x8x128xf32>
    %10 = arith.addf %8, %9 : vector<8x8x128xf32>
    %cst = arith.constant 0.000000e+00 : f32
    %11 = vector.broadcast %cst : f32 to vector<8x8x128xf32>
    %12 = arith.maximumf %10, %11 : vector<8x8x128xf32>
    %cst_7 = arith.constant 0.000000e+00 : f32
    %13 = vector.broadcast %cst_7 : f32 to vector<10x10x128xf32>
    %c0_8 = arith.constant 0 : index
    %c0_9 = arith.constant 0 : index
    %c0_10 = arith.constant 0 : index
    %14 = vector.load %arg10[%c0_8, %c0_9, %c0_10] : memref<10x10x128xf32, #tpu.memory_space<vmem>>, vector<10x10x128xf32>
    tpu.vector_store %arg10[%c0_8, %c0_9, %c0_10], %13 {strides = array<i32>} : memref<10x10x128xf32, #tpu.memory_space<vmem>>, vector<10x10x128xf32>,
    %c1 = arith.constant 1 : index
    %c1_11 = arith.constant 1 : index
    %c0_12 = arith.constant 0 : index
    %15 = vector.load %arg10[%c1, %c1_11, %c0_12] : memref<10x10x128xf32, #tpu.memory_space<vmem>>, vector<8x8x128xf32>
    tpu.vector_store %arg10[%c1, %c1_11, %c0_12], %12 {strides = array<i32>} : memref<10x10x128xf32, #tpu.memory_space<vmem>>, vector<8x8x128xf32>,
    %cst_13 = arith.constant 0.000000e+00 : f32
    %16 = vector.broadcast %cst_13 : f32 to vector<64x128xf32>
    %c0_14 = arith.constant 0 : index
    %c0_15 = arith.constant 0 : index
    %c0_16 = arith.constant 0 : index
    %17 = vector.load %arg10[%c0_14, %c0_15, %c0_16] : memref<10x10x128xf32, #tpu.memory_space<vmem>>, vector<8x8x128xf32>
    %18 = vector.shape_cast %17 : vector<8x8x128xf32> to vector<64x128xf32>
    %19 = arith.truncf %18 : vector<64x128xf32> to vector<64x128xbf16>
    %c0_17 = arith.constant 0 : index
    %c0_18 = arith.constant 0 : index
    %c0_19 = arith.constant 0 : index
    %20 = vector.load %arg5[%c0_17, %c0_18, %c0_19] : memref<9x128x128xbf16, #tpu.memory_space<vmem>>, vector<1x128x128xbf16>
    %21 = vector.shape_cast %20 : vector<1x128x128xbf16> to vector<128x128xbf16>
    %cst_20 = arith.constant dense<0.000000e+00> : vector<64x128xf32>
    %22 = tpu.matmul %19, %21, %cst_20 {dimension_numbers = #tpu.dot_dimension_numbers<[1], [0], [0], [1], [0, 0, 1, 1], [], []>} : vector<64x128xbf16>, vector<128x128xbf16>, vector<64x128xf32> -> vector<64x128xf32>
    %23 = arith.addf %16, %22 : vector<64x128xf32>
    %c0_21 = arith.constant 0 : index
    %c1_22 = arith.constant 1 : index
    %c0_23 = arith.constant 0 : index
    %24 = vector.load %arg10[%c0_21, %c1_22, %c0_23] : memref<10x10x128xf32, #tpu.memory_space<vmem>>, vector<8x8x128xf32>
    %25 = vector.shape_cast %24 : vector<8x8x128xf32> to vector<64x128xf32>
    %26 = arith.truncf %25 : vector<64x128xf32> to vector<64x128xbf16>
    %c1_24 = arith.constant 1 : index
    %c0_25 = arith.constant 0 : index
    %c0_26 = arith.constant 0 : index
    %27 = vector.load %arg5[%c1_24, %c0_25, %c0_26] : memref<9x128x128xbf16, #tpu.memory_space<vmem>>, vector<1x128x128xbf16>
    %28 = vector.shape_cast %27 : vector<1x128x128xbf16> to vector<128x128xbf16>
    %cst_27 = arith.constant dense<0.000000e+00> : vector<64x128xf32>
    %29 = tpu.matmul %26, %28, %cst_27 {dimension_numbers = #tpu.dot_dimension_numbers<[1], [0], [0], [1], [0, 0, 1, 1], [], []>} : vector<64x128xbf16>, vector<128x128xbf16>, vector<64x128xf32> -> vector<64x128xf32>
    %30 = arith.addf %23, %29 : vector<64x128xf32>
    %c0_28 = arith.constant 0 : index
    %c2 = arith.constant 2 : index
    %c0_29 = arith.constant 0 : index
    %31 = vector.load %arg10[%c0_28, %c2, %c0_29] : memref<10x10x128xf32, #tpu.memory_space<vmem>>, vector<8x8x128xf32>
    %32 = vector.shape_cast %31 : vector<8x8x128xf32> to vector<64x128xf32>
    %33 = arith.truncf %32 : vector<64x128xf32> to vector<64x128xbf16>
    %c2_30 = arith.constant 2 : index
    %c0_31 = arith.constant 0 : index
    %c0_32 = arith.constant 0 : index
    %34 = vector.load %arg5[%c2_30, %c0_31, %c0_32] : memref<9x128x128xbf16, #tpu.memory_space<vmem>>, vector<1x128x128xbf16>
    %35 = vector.shape_cast %34 : vector<1x128x128xbf16> to vector<128x128xbf16>
    %cst_33 = arith.constant dense<0.000000e+00> : vector<64x128xf32>
    %36 = tpu.matmul %33, %35, %cst_33 {dimension_numbers = #tpu.dot_dimension_numbers<[1], [0], [0], [1], [0, 0, 1, 1], [], []>} : vector<64x128xbf16>, vector<128x128xbf16>, vector<64x128xf32> -> vector<64x128xf32>
    %37 = arith.addf %30, %36 : vector<64x128xf32>
    %c1_34 = arith.constant 1 : index
    %c0_35 = arith.constant 0 : index
    %c0_36 = arith.constant 0 : index
    %38 = vector.load %arg10[%c1_34, %c0_35, %c0_36] : memref<10x10x128xf32, #tpu.memory_space<vmem>>, vector<8x8x128xf32>
    %39 = vector.shape_cast %38 : vector<8x8x128xf32> to vector<64x128xf32>
    %40 = arith.truncf %39 : vector<64x128xf32> to vector<64x128xbf16>
    %c3 = arith.constant 3 : index
    %c0_37 = arith.constant 0 : index
    %c0_38 = arith.constant 0 : index
    %41 = vector.load %arg5[%c3, %c0_37, %c0_38] : memref<9x128x128xbf16, #tpu.memory_space<vmem>>, vector<1x128x128xbf16>
    %42 = vector.shape_cast %41 : vector<1x128x128xbf16> to vector<128x128xbf16>
    %cst_39 = arith.constant dense<0.000000e+00> : vector<64x128xf32>
    %43 = tpu.matmul %40, %42, %cst_39 {dimension_numbers = #tpu.dot_dimension_numbers<[1], [0], [0], [1], [0, 0, 1, 1], [], []>} : vector<64x128xbf16>, vector<128x128xbf16>, vector<64x128xf32> -> vector<64x128xf32>
    %44 = arith.addf %37, %43 : vector<64x128xf32>
    %c1_40 = arith.constant 1 : index
    %c1_41 = arith.constant 1 : index
    %c0_42 = arith.constant 0 : index
    %45 = vector.load %arg10[%c1_40, %c1_41, %c0_42] : memref<10x10x128xf32, #tpu.memory_space<vmem>>, vector<8x8x128xf32>
    %46 = vector.shape_cast %45 : vector<8x8x128xf32> to vector<64x128xf32>
    %47 = arith.truncf %46 : vector<64x128xf32> to vector<64x128xbf16>
    %c4 = arith.constant 4 : index
    %c0_43 = arith.constant 0 : index
    %c0_44 = arith.constant 0 : index
    %48 = vector.load %arg5[%c4, %c0_43, %c0_44] : memref<9x128x128xbf16, #tpu.memory_space<vmem>>, vector<1x128x128xbf16>
    %49 = vector.shape_cast %48 : vector<1x128x128xbf16> to vector<128x128xbf16>
    %cst_45 = arith.constant dense<0.000000e+00> : vector<64x128xf32>
    %50 = tpu.matmul %47, %49, %cst_45 {dimension_numbers = #tpu.dot_dimension_numbers<[1], [0], [0], [1], [0, 0, 1, 1], [], []>} : vector<64x128xbf16>, vector<128x128xbf16>, vector<64x128xf32> -> vector<64x128xf32>
    %51 = arith.addf %44, %50 : vector<64x128xf32>
    %c1_46 = arith.constant 1 : index
    %c2_47 = arith.constant 2 : index
    %c0_48 = arith.constant 0 : index
    %52 = vector.load %arg10[%c1_46, %c2_47, %c0_48] : memref<10x10x128xf32, #tpu.memory_space<vmem>>, vector<8x8x128xf32>
    %53 = vector.shape_cast %52 : vector<8x8x128xf32> to vector<64x128xf32>
    %54 = arith.truncf %53 : vector<64x128xf32> to vector<64x128xbf16>
    %c5 = arith.constant 5 : index
    %c0_49 = arith.constant 0 : index
    %c0_50 = arith.constant 0 : index
    %55 = vector.load %arg5[%c5, %c0_49, %c0_50] : memref<9x128x128xbf16, #tpu.memory_space<vmem>>, vector<1x128x128xbf16>
    %56 = vector.shape_cast %55 : vector<1x128x128xbf16> to vector<128x128xbf16>
    %cst_51 = arith.constant dense<0.000000e+00> : vector<64x128xf32>
    %57 = tpu.matmul %54, %56, %cst_51 {dimension_numbers = #tpu.dot_dimension_numbers<[1], [0], [0], [1], [0, 0, 1, 1], [], []>} : vector<64x128xbf16>, vector<128x128xbf16>, vector<64x128xf32> -> vector<64x128xf32>
    %58 = arith.addf %51, %57 : vector<64x128xf32>
    %c2_52 = arith.constant 2 : index
    %c0_53 = arith.constant 0 : index
    %c0_54 = arith.constant 0 : index
    %59 = vector.load %arg10[%c2_52, %c0_53, %c0_54] : memref<10x10x128xf32, #tpu.memory_space<vmem>>, vector<8x8x128xf32>
    %60 = vector.shape_cast %59 : vector<8x8x128xf32> to vector<64x128xf32>
    %61 = arith.truncf %60 : vector<64x128xf32> to vector<64x128xbf16>
    %c6 = arith.constant 6 : index
    %c0_55 = arith.constant 0 : index
    %c0_56 = arith.constant 0 : index
    %62 = vector.load %arg5[%c6, %c0_55, %c0_56] : memref<9x128x128xbf16, #tpu.memory_space<vmem>>, vector<1x128x128xbf16>
    %63 = vector.shape_cast %62 : vector<1x128x128xbf16> to vector<128x128xbf16>
    %cst_57 = arith.constant dense<0.000000e+00> : vector<64x128xf32>
    %64 = tpu.matmul %61, %63, %cst_57 {dimension_numbers = #tpu.dot_dimension_numbers<[1], [0], [0], [1], [0, 0, 1, 1], [], []>} : vector<64x128xbf16>, vector<128x128xbf16>, vector<64x128xf32> -> vector<64x128xf32>
    %65 = arith.addf %58, %64 : vector<64x128xf32>
    %c2_58 = arith.constant 2 : index
    %c1_59 = arith.constant 1 : index
    %c0_60 = arith.constant 0 : index
    %66 = vector.load %arg10[%c2_58, %c1_59, %c0_60] : memref<10x10x128xf32, #tpu.memory_space<vmem>>, vector<8x8x128xf32>
    %67 = vector.shape_cast %66 : vector<8x8x128xf32> to vector<64x128xf32>
    %68 = arith.truncf %67 : vector<64x128xf32> to vector<64x128xbf16>
    %c7 = arith.constant 7 : index
    %c0_61 = arith.constant 0 : index
    %c0_62 = arith.constant 0 : index
    %69 = vector.load %arg5[%c7, %c0_61, %c0_62] : memref<9x128x128xbf16, #tpu.memory_space<vmem>>, vector<1x128x128xbf16>
    %70 = vector.shape_cast %69 : vector<1x128x128xbf16> to vector<128x128xbf16>
    %cst_63 = arith.constant dense<0.000000e+00> : vector<64x128xf32>
    %71 = tpu.matmul %68, %70, %cst_63 {dimension_numbers = #tpu.dot_dimension_numbers<[1], [0], [0], [1], [0, 0, 1, 1], [], []>} : vector<64x128xbf16>, vector<128x128xbf16>, vector<64x128xf32> -> vector<64x128xf32>
    %72 = arith.addf %65, %71 : vector<64x128xf32>
    %c2_64 = arith.constant 2 : index
    %c2_65 = arith.constant 2 : index
    %c0_66 = arith.constant 0 : index
    %73 = vector.load %arg10[%c2_64, %c2_65, %c0_66] : memref<10x10x128xf32, #tpu.memory_space<vmem>>, vector<8x8x128xf32>
    %74 = vector.shape_cast %73 : vector<8x8x128xf32> to vector<64x128xf32>
    %75 = arith.truncf %74 : vector<64x128xf32> to vector<64x128xbf16>
    %c8 = arith.constant 8 : index
    %c0_67 = arith.constant 0 : index
    %c0_68 = arith.constant 0 : index
    %76 = vector.load %arg5[%c8, %c0_67, %c0_68] : memref<9x128x128xbf16, #tpu.memory_space<vmem>>, vector<1x128x128xbf16>
    %77 = vector.shape_cast %76 : vector<1x128x128xbf16> to vector<128x128xbf16>
    %cst_69 = arith.constant dense<0.000000e+00> : vector<64x128xf32>
    %78 = tpu.matmul %75, %77, %cst_69 {dimension_numbers = #tpu.dot_dimension_numbers<[1], [0], [0], [1], [0, 0, 1, 1], [], []>} : vector<64x128xbf16>, vector<128x128xbf16>, vector<64x128xf32> -> vector<64x128xf32>
    %79 = arith.addf %72, %78 : vector<64x128xf32>
    %c0_70 = arith.constant 0 : index
    %c0_71 = arith.constant 0 : index
    %c0_72 = arith.constant 0 : index
    %c0_73 = arith.constant 0 : index
    %80 = vector.load %arg6[%c0_70, %c0_71, %c0_72, %c0_73] : memref<1x8x8x128xbf16, #tpu.memory_space<vmem>>, vector<1x8x8x128xbf16>
    %81 = vector.shape_cast %80 : vector<1x8x8x128xbf16> to vector<8x8x128xbf16>
    %82 = arith.extf %81 : vector<8x8x128xbf16> to vector<8x8x128xf32>
    %83 = vector.shape_cast %82 : vector<8x8x128xf32> to vector<64x128xf32>
    %84 = arith.addf %79, %83 : vector<64x128xf32>
    %85 = vector.shape_cast %84 : vector<64x128xf32> to vector<8x8x128xf32>
    %86 = arith.truncf %85 : vector<8x8x128xf32> to vector<8x8x128xbf16>
    %c0_74 = arith.constant 0 : index
    %c0_75 = arith.constant 0 : index
    %c0_76 = arith.constant 0 : index
    %c0_77 = arith.constant 0 : index
    %87 = vector.load %arg7[%c0_74, %c0_75, %c0_76, %c0_77] : memref<1x8x8x128xbf16, #tpu.memory_space<vmem>>, vector<1x8x8x128xbf16>
    %88 = vector.shape_cast %87 : vector<1x8x8x128xbf16> to vector<8x8x128xbf16>
    %89 = vector.shape_cast %86 : vector<8x8x128xbf16> to vector<1x8x8x128xbf16>
    tpu.vector_store %arg7[%c0_74, %c0_75, %c0_76, %c0_77], %89 {strides = array<i32>} : memref<1x8x8x128xbf16, #tpu.memory_space<vmem>>, vector<1x8x8x128xbf16>,
    %cst_78 = arith.constant dense<0.000000e+00> : vector<128xf32>
    %90 = vector.multi_reduction <add>, %84, %cst_78 [0] : vector<64x128xf32> to vector<128xf32>
    %91 = vector.shape_cast %90 : vector<128xf32> to vector<1x128xf32>
    %c0_79 = arith.constant 0 : index
    %c0_80 = arith.constant 0 : index
    %c0_81 = arith.constant 0 : index
    %92 = vector.load %arg8[%c0_79, %c0_80, %c0_81] : memref<1x1x128xf32, #tpu.memory_space<vmem>>, vector<1x1x128xf32>
    %93 = vector.shape_cast %92 : vector<1x1x128xf32> to vector<1x128xf32>
    %94 = vector.shape_cast %91 : vector<1x128xf32> to vector<1x1x128xf32>
    tpu.vector_store %arg8[%c0_79, %c0_80, %c0_81], %94 {strides = array<i32>} : memref<1x1x128xf32, #tpu.memory_space<vmem>>, vector<1x1x128xf32>,
    %95 = arith.mulf %84, %84 : vector<64x128xf32>
    %cst_82 = arith.constant dense<0.000000e+00> : vector<128xf32>
    %96 = vector.multi_reduction <add>, %95, %cst_82 [0] : vector<64x128xf32> to vector<128xf32>
    %97 = vector.shape_cast %96 : vector<128xf32> to vector<1x128xf32>
    %c0_83 = arith.constant 0 : index
    %c0_84 = arith.constant 0 : index
    %c0_85 = arith.constant 0 : index
    %98 = vector.load %arg9[%c0_83, %c0_84, %c0_85] : memref<1x1x128xf32, #tpu.memory_space<vmem>>, vector<1x1x128xf32>
    %99 = vector.shape_cast %98 : vector<1x1x128xf32> to vector<1x128xf32>
    %100 = vector.shape_cast %97 : vector<1x128xf32> to vector<1x1x128xf32>
    tpu.vector_store %arg9[%c0_83, %c0_84, %c0_85], %100 {strides = array<i32>} : memref<1x1x128xf32, #tpu.memory_space<vmem>>, vector<1x1x128xf32>,
    return
  }
  func.func @transform_0(%arg0: i32, %arg1: i32) -> (i32, i32, i32, i32) {
    %c0_i32 = arith.constant 0 : i32
    %c0_i32_0 = arith.constant 0 : i32
    %c0_i32_1 = arith.constant 0 : i32
    %c0_i32_2 = arith.constant 0 : i32
    return %arg1, %c0_i32, %c0_i32_0, %c0_i32_1 : i32, i32, i32, i32
  }
  func.func @transform_1(%arg0: i32, %arg1: i32) -> (i32, i32) {
    %c0_i32 = arith.constant 0 : i32
    %c0_i32_0 = arith.constant 0 : i32
    %c0_i32_1 = arith.constant 0 : i32
    return %c0_i32, %c0_i32_0 : i32, i32
  }
  func.func @transform_2(%arg0: i32, %arg1: i32) -> (i32, i32) {
    %c0_i32 = arith.constant 0 : i32
    %c0_i32_0 = arith.constant 0 : i32
    %c0_i32_1 = arith.constant 0 : i32
    return %c0_i32, %c0_i32_0 : i32, i32
  }
  func.func @transform_3(%arg0: i32, %arg1: i32) -> (i32, i32, i32) {
    %c0_i32 = arith.constant 0 : i32
    %c0_i32_0 = arith.constant 0 : i32
    %c0_i32_1 = arith.constant 0 : i32
    return %c0_i32, %c0_i32_0, %arg0 : i32, i32, i32
  }
  func.func @transform_4(%arg0: i32, %arg1: i32) -> (i32, i32, i32, i32) {
    %c0_i32 = arith.constant 0 : i32
    %c0_i32_0 = arith.constant 0 : i32
    %c0_i32_1 = arith.constant 0 : i32
    return %arg1, %c0_i32, %c0_i32_0, %arg0 : i32, i32, i32, i32
  }
  func.func @transform_5(%arg0: i32, %arg1: i32) -> (i32, i32, i32, i32) {
    %c0_i32 = arith.constant 0 : i32
    %c0_i32_0 = arith.constant 0 : i32
    %c0_i32_1 = arith.constant 0 : i32
    return %arg1, %c0_i32, %c0_i32_0, %arg0 : i32, i32, i32, i32
  }
  func.func @transform_6(%arg0: i32, %arg1: i32) -> (i32, i32, i32) {
    %c0_i32 = arith.constant 0 : i32
    %c0_i32_0 = arith.constant 0 : i32
    return %arg1, %c0_i32, %arg0 : i32, i32, i32
  }
  func.func @transform_7(%arg0: i32, %arg1: i32) -> (i32, i32, i32) {
    %c0_i32 = arith.constant 0 : i32
    %c0_i32_0 = arith.constant 0 : i32
    return %arg1, %c0_i32, %arg0 : i32, i32, i32
  }
}

module attributes {stable_mosaic.version = 11 : i64} {
  func.func @_conv3x3_res_kernel(%arg0: i32, %arg1: i32, %arg2: memref<1x8x8x128xbf16, #tpu.memory_space<vmem>>, %arg3: memref<1x128xf32, #tpu.memory_space<vmem>>, %arg4: memref<1x128xf32, #tpu.memory_space<vmem>>, %arg5: memref<9x128x128xbf16, #tpu.memory_space<vmem>>, %arg6: memref<1x8x8x128xbf16, #tpu.memory_space<vmem>>, %arg7: memref<1x8x8x128xbf16, #tpu.memory_space<vmem>>, %arg8: memref<1x1x128xf32, #tpu.memory_space<vmem>>, %arg9: memref<1x1x128xf32, #tpu.memory_space<vmem>>, %arg10: memref<10x10x128xf32, #tpu.memory_space<vmem>>) attributes {dimension_semantics = [#tpu.dimension_semantics<parallel>, #tpu.dimension_semantics<parallel>], iteration_bounds = array<i64: 1, 2>, scalar_prefetch = 0 : i64, scratch_operands = 1 : i64, tpu.core_type = #tpu.core_type<tc>, window_params = [{transform_indices = @transform_0, window_bounds = array<i64: 1, 8, 8, 128>}, {pipeline_mode = #tpu.pipeline_mode<synchronous>, transform_indices = @transform_1, window_bounds = array<i64: 1, 128>}, {pipeline_mode = #tpu.pipeline_mode<synchronous>, transform_indices = @transform_2, window_bounds = array<i64: 1, 128>}, {transform_indices = @transform_3, window_bounds = array<i64: 9, 128, 128>}, {transform_indices = @transform_4, window_bounds = array<i64: 1, 8, 8, 128>}, {transform_indices = @transform_5, window_bounds = array<i64: 1, 8, 8, 128>}, {transform_indices = @transform_6, window_bounds = array<i64: 1, 1, 128>}, {transform_indices = @transform_7, window_bounds = array<i64: 1, 1, 128>}]} {
    %c0 = arith.constant 0 : index
    %c0_0 = arith.constant 0 : index
    %c0_1 = arith.constant 0 : index
    %c0_2 = arith.constant 0 : index
    %0 = vector.load %arg2[%c0, %c0_0, %c0_1, %c0_2] : memref<1x8x8x128xbf16, #tpu.memory_space<vmem>>, vector<1x8x8x128xbf16>
    %1 = vector.shape_cast %0 : vector<1x8x8x128xbf16> to vector<8x8x128xbf16>
    %2 = arith.extf %1 : vector<8x8x128xbf16> to vector<8x8x128xf32>
    %c0_3 = arith.constant 0 : index
    %c0_4 = arith.constant 0 : index
    %3 = vector.load %arg3[%c0_3, %c0_4] : memref<1x128xf32, #tpu.memory_space<vmem>>, vector<1x128xf32>
    %4 = vector.shape_cast %3 : vector<1x128xf32> to vector<1x1x128xf32>
    %c0_5 = arith.constant 0 : index
    %c0_6 = arith.constant 0 : index
    %5 = vector.load %arg4[%c0_5, %c0_6] : memref<1x128xf32, #tpu.memory_space<vmem>>, vector<1x128xf32>
    %6 = vector.shape_cast %5 : vector<1x128xf32> to vector<1x1x128xf32>
    %7 = vector.broadcast %4 : vector<1x1x128xf32> to vector<8x8x128xf32>
    %8 = arith.mulf %2, %7 : vector<8x8x128xf32>
    %9 = vector.broadcast %6 : vector<1x1x128xf32> to vector<8x8x128xf32>
    %10 = arith.addf %8, %9 : vector<8x8x128xf32>
    %cst = arith.constant 0.000000e+00 : f32
    %11 = vector.broadcast %cst : f32 to vector<8x8x128xf32>
    %12 = arith.maximumf %10, %11 : vector<8x8x128xf32>
    %cst_7 = arith.constant 0.000000e+00 : f32
    %13 = vector.broadcast %cst_7 : f32 to vector<10x10x128xf32>
    %c0_8 = arith.constant 0 : index
    %c0_9 = arith.constant 0 : index
    %c0_10 = arith.constant 0 : index
    %14 = vector.load %arg10[%c0_8, %c0_9, %c0_10] : memref<10x10x128xf32, #tpu.memory_space<vmem>>, vector<10x10x128xf32>
    tpu.vector_store %arg10[%c0_8, %c0_9, %c0_10], %13 {strides = array<i32>} : memref<10x10x128xf32, #tpu.memory_space<vmem>>, vector<10x10x128xf32>,
    %c1 = arith.constant 1 : index
    %c1_11 = arith.constant 1 : index
    %c0_12 = arith.constant 0 : index
    %15 = vector.load %arg10[%c1, %c1_11, %c0_12] : memref<10x10x128xf32, #tpu.memory_space<vmem>>, vector<8x8x128xf32>
    tpu.vector_store %arg10[%c1, %c1_11, %c0_12], %12 {strides = array<i32>} : memref<10x10x128xf32, #tpu.memory_space<vmem>>, vector<8x8x128xf32>,
    %cst_13 = arith.constant 0.000000e+00 : f32
    %16 = vector.broadcast %cst_13 : f32 to vector<64x128xf32>
    %c0_14 = arith.constant 0 : index
    %c0_15 = arith.constant 0 : index
    %c0_16 = arith.constant 0 : index
    %17 = vector.load %arg10[%c0_14, %c0_15, %c0_16] : memref<10x10x128xf32, #tpu.memory_space<vmem>>, vector<8x8x128xf32>
    %18 = vector.shape_cast %17 : vector<8x8x128xf32> to vector<64x128xf32>
    %19 = arith.truncf %18 : vector<64x128xf32> to vector<64x128xbf16>
    %c0_17 = arith.constant 0 : index
    %c0_18 = arith.constant 0 : index
    %c0_19 = arith.constant 0 : index
    %20 = vector.load %arg5[%c0_17, %c0_18, %c0_19] : memref<9x128x128xbf16, #tpu.memory_space<vmem>>, vector<1x128x128xbf16>
    %21 = vector.shape_cast %20 : vector<1x128x128xbf16> to vector<128x128xbf16>
    %cst_20 = arith.constant dense<0.000000e+00> : vector<64x128xf32>
    %22 = tpu.matmul %19, %21, %cst_20 {dimension_numbers = #tpu.dot_dimension_numbers<[1], [0], [0], [1], [0, 0, 1, 1], [], []>} : vector<64x128xbf16>, vector<128x128xbf16>, vector<64x128xf32> -> vector<64x128xf32>
    %23 = arith.addf %16, %22 : vector<64x128xf32>
    %c0_21 = arith.constant 0 : index
    %c1_22 = arith.constant 1 : index
    %c0_23 = arith.constant 0 : index
    %24 = vector.load %arg10[%c0_21, %c1_22, %c0_23] : memref<10x10x128xf32, #tpu.memory_space<vmem>>, vector<8x8x128xf32>
    %25 = vector.shape_cast %24 : vector<8x8x128xf32> to vector<64x128xf32>
    %26 = arith.truncf %25 : vector<64x128xf32> to vector<64x128xbf16>
    %c1_24 = arith.constant 1 : index
    %c0_25 = arith.constant 0 : index
    %c0_26 = arith.constant 0 : index
    %27 = vector.load %arg5[%c1_24, %c0_25, %c0_26] : memref<9x128x128xbf16, #tpu.memory_space<vmem>>, vector<1x128x128xbf16>
    %28 = vector.shape_cast %27 : vector<1x128x128xbf16> to vector<128x128xbf16>
    %cst_27 = arith.constant dense<0.000000e+00> : vector<64x128xf32>
    %29 = tpu.matmul %26, %28, %cst_27 {dimension_numbers = #tpu.dot_dimension_numbers<[1], [0], [0], [1], [0, 0, 1, 1], [], []>} : vector<64x128xbf16>, vector<128x128xbf16>, vector<64x128xf32> -> vector<64x128xf32>
    %30 = arith.addf %23, %29 : vector<64x128xf32>
    %c0_28 = arith.constant 0 : index
    %c2 = arith.constant 2 : index
    %c0_29 = arith.constant 0 : index
    %31 = vector.load %arg10[%c0_28, %c2, %c0_29] : memref<10x10x128xf32, #tpu.memory_space<vmem>>, vector<8x8x128xf32>
    %32 = vector.shape_cast %31 : vector<8x8x128xf32> to vector<64x128xf32>
    %33 = arith.truncf %32 : vector<64x128xf32> to vector<64x128xbf16>
    %c2_30 = arith.constant 2 : index
    %c0_31 = arith.constant 0 : index
    %c0_32 = arith.constant 0 : index
    %34 = vector.load %arg5[%c2_30, %c0_31, %c0_32] : memref<9x128x128xbf16, #tpu.memory_space<vmem>>, vector<1x128x128xbf16>
    %35 = vector.shape_cast %34 : vector<1x128x128xbf16> to vector<128x128xbf16>
    %cst_33 = arith.constant dense<0.000000e+00> : vector<64x128xf32>
    %36 = tpu.matmul %33, %35, %cst_33 {dimension_numbers = #tpu.dot_dimension_numbers<[1], [0], [0], [1], [0, 0, 1, 1], [], []>} : vector<64x128xbf16>, vector<128x128xbf16>, vector<64x128xf32> -> vector<64x128xf32>
    %37 = arith.addf %30, %36 : vector<64x128xf32>
    %c1_34 = arith.constant 1 : index
    %c0_35 = arith.constant 0 : index
    %c0_36 = arith.constant 0 : index
    %38 = vector.load %arg10[%c1_34, %c0_35, %c0_36] : memref<10x10x128xf32, #tpu.memory_space<vmem>>, vector<8x8x128xf32>
    %39 = vector.shape_cast %38 : vector<8x8x128xf32> to vector<64x128xf32>
    %40 = arith.truncf %39 : vector<64x128xf32> to vector<64x128xbf16>
    %c3 = arith.constant 3 : index
    %c0_37 = arith.constant 0 : index
    %c0_38 = arith.constant 0 : index
    %41 = vector.load %arg5[%c3, %c0_37, %c0_38] : memref<9x128x128xbf16, #tpu.memory_space<vmem>>, vector<1x128x128xbf16>
    %42 = vector.shape_cast %41 : vector<1x128x128xbf16> to vector<128x128xbf16>
    %cst_39 = arith.constant dense<0.000000e+00> : vector<64x128xf32>
    %43 = tpu.matmul %40, %42, %cst_39 {dimension_numbers = #tpu.dot_dimension_numbers<[1], [0], [0], [1], [0, 0, 1, 1], [], []>} : vector<64x128xbf16>, vector<128x128xbf16>, vector<64x128xf32> -> vector<64x128xf32>
    %44 = arith.addf %37, %43 : vector<64x128xf32>
    %c1_40 = arith.constant 1 : index
    %c1_41 = arith.constant 1 : index
    %c0_42 = arith.constant 0 : index
    %45 = vector.load %arg10[%c1_40, %c1_41, %c0_42] : memref<10x10x128xf32, #tpu.memory_space<vmem>>, vector<8x8x128xf32>
    %46 = vector.shape_cast %45 : vector<8x8x128xf32> to vector<64x128xf32>
    %47 = arith.truncf %46 : vector<64x128xf32> to vector<64x128xbf16>
    %c4 = arith.constant 4 : index
    %c0_43 = arith.constant 0 : index
    %c0_44 = arith.constant 0 : index
    %48 = vector.load %arg5[%c4, %c0_43, %c0_44] : memref<9x128x128xbf16, #tpu.memory_space<vmem>>, vector<1x128x128xbf16>
    %49 = vector.shape_cast %48 : vector<1x128x128xbf16> to vector<128x128xbf16>
    %cst_45 = arith.constant dense<0.000000e+00> : vector<64x128xf32>
    %50 = tpu.matmul %47, %49, %cst_45 {dimension_numbers = #tpu.dot_dimension_numbers<[1], [0], [0], [1], [0, 0, 1, 1], [], []>} : vector<64x128xbf16>, vector<128x128xbf16>, vector<64x128xf32> -> vector<64x128xf32>
    %51 = arith.addf %44, %50 : vector<64x128xf32>
    %c1_46 = arith.constant 1 : index
    %c2_47 = arith.constant 2 : index
    %c0_48 = arith.constant 0 : index
    %52 = vector.load %arg10[%c1_46, %c2_47, %c0_48] : memref<10x10x128xf32, #tpu.memory_space<vmem>>, vector<8x8x128xf32>
    %53 = vector.shape_cast %52 : vector<8x8x128xf32> to vector<64x128xf32>
    %54 = arith.truncf %53 : vector<64x128xf32> to vector<64x128xbf16>
    %c5 = arith.constant 5 : index
    %c0_49 = arith.constant 0 : index
    %c0_50 = arith.constant 0 : index
    %55 = vector.load %arg5[%c5, %c0_49, %c0_50] : memref<9x128x128xbf16, #tpu.memory_space<vmem>>, vector<1x128x128xbf16>
    %56 = vector.shape_cast %55 : vector<1x128x128xbf16> to vector<128x128xbf16>
    %cst_51 = arith.constant dense<0.000000e+00> : vector<64x128xf32>
    %57 = tpu.matmul %54, %56, %cst_51 {dimension_numbers = #tpu.dot_dimension_numbers<[1], [0], [0], [1], [0, 0, 1, 1], [], []>} : vector<64x128xbf16>, vector<128x128xbf16>, vector<64x128xf32> -> vector<64x128xf32>
    %58 = arith.addf %51, %57 : vector<64x128xf32>
    %c2_52 = arith.constant 2 : index
    %c0_53 = arith.constant 0 : index
    %c0_54 = arith.constant 0 : index
    %59 = vector.load %arg10[%c2_52, %c0_53, %c0_54] : memref<10x10x128xf32, #tpu.memory_space<vmem>>, vector<8x8x128xf32>
    %60 = vector.shape_cast %59 : vector<8x8x128xf32> to vector<64x128xf32>
    %61 = arith.truncf %60 : vector<64x128xf32> to vector<64x128xbf16>
    %c6 = arith.constant 6 : index
    %c0_55 = arith.constant 0 : index
    %c0_56 = arith.constant 0 : index
    %62 = vector.load %arg5[%c6, %c0_55, %c0_56] : memref<9x128x128xbf16, #tpu.memory_space<vmem>>, vector<1x128x128xbf16>
    %63 = vector.shape_cast %62 : vector<1x128x128xbf16> to vector<128x128xbf16>
    %cst_57 = arith.constant dense<0.000000e+00> : vector<64x128xf32>
    %64 = tpu.matmul %61, %63, %cst_57 {dimension_numbers = #tpu.dot_dimension_numbers<[1], [0], [0], [1], [0, 0, 1, 1], [], []>} : vector<64x128xbf16>, vector<128x128xbf16>, vector<64x128xf32> -> vector<64x128xf32>
    %65 = arith.addf %58, %64 : vector<64x128xf32>
    %c2_58 = arith.constant 2 : index
    %c1_59 = arith.constant 1 : index
    %c0_60 = arith.constant 0 : index
    %66 = vector.load %arg10[%c2_58, %c1_59, %c0_60] : memref<10x10x128xf32, #tpu.memory_space<vmem>>, vector<8x8x128xf32>
    %67 = vector.shape_cast %66 : vector<8x8x128xf32> to vector<64x128xf32>
    %68 = arith.truncf %67 : vector<64x128xf32> to vector<64x128xbf16>
    %c7 = arith.constant 7 : index
    %c0_61 = arith.constant 0 : index
    %c0_62 = arith.constant 0 : index
    %69 = vector.load %arg5[%c7, %c0_61, %c0_62] : memref<9x128x128xbf16, #tpu.memory_space<vmem>>, vector<1x128x128xbf16>
    %70 = vector.shape_cast %69 : vector<1x128x128xbf16> to vector<128x128xbf16>
    %cst_63 = arith.constant dense<0.000000e+00> : vector<64x128xf32>
    %71 = tpu.matmul %68, %70, %cst_63 {dimension_numbers = #tpu.dot_dimension_numbers<[1], [0], [0], [1], [0, 0, 1, 1], [], []>} : vector<64x128xbf16>, vector<128x128xbf16>, vector<64x128xf32> -> vector<64x128xf32>
    %72 = arith.addf %65, %71 : vector<64x128xf32>
    %c2_64 = arith.constant 2 : index
    %c2_65 = arith.constant 2 : index
    %c0_66 = arith.constant 0 : index
    %73 = vector.load %arg10[%c2_64, %c2_65, %c0_66] : memref<10x10x128xf32, #tpu.memory_space<vmem>>, vector<8x8x128xf32>
    %74 = vector.shape_cast %73 : vector<8x8x128xf32> to vector<64x128xf32>
    %75 = arith.truncf %74 : vector<64x128xf32> to vector<64x128xbf16>
    %c8 = arith.constant 8 : index
    %c0_67 = arith.constant 0 : index
    %c0_68 = arith.constant 0 : index
    %76 = vector.load %arg5[%c8, %c0_67, %c0_68] : memref<9x128x128xbf16, #tpu.memory_space<vmem>>, vector<1x128x128xbf16>
    %77 = vector.shape_cast %76 : vector<1x128x128xbf16> to vector<128x128xbf16>
    %cst_69 = arith.constant dense<0.000000e+00> : vector<64x128xf32>
    %78 = tpu.matmul %75, %77, %cst_69 {dimension_numbers = #tpu.dot_dimension_numbers<[1], [0], [0], [1], [0, 0, 1, 1], [], []>} : vector<64x128xbf16>, vector<128x128xbf16>, vector<64x128xf32> -> vector<64x128xf32>
    %79 = arith.addf %72, %78 : vector<64x128xf32>
    %c0_70 = arith.constant 0 : index
    %c0_71 = arith.constant 0 : index
    %c0_72 = arith.constant 0 : index
    %c0_73 = arith.constant 0 : index
    %80 = vector.load %arg6[%c0_70, %c0_71, %c0_72, %c0_73] : memref<1x8x8x128xbf16, #tpu.memory_space<vmem>>, vector<1x8x8x128xbf16>
    %81 = vector.shape_cast %80 : vector<1x8x8x128xbf16> to vector<8x8x128xbf16>
    %82 = arith.extf %81 : vector<8x8x128xbf16> to vector<8x8x128xf32>
    %83 = vector.shape_cast %82 : vector<8x8x128xf32> to vector<64x128xf32>
    %84 = arith.addf %79, %83 : vector<64x128xf32>
    %85 = vector.shape_cast %84 : vector<64x128xf32> to vector<8x8x128xf32>
    %86 = arith.truncf %85 : vector<8x8x128xf32> to vector<8x8x128xbf16>
    %c0_74 = arith.constant 0 : index
    %c0_75 = arith.constant 0 : index
    %c0_76 = arith.constant 0 : index
    %c0_77 = arith.constant 0 : index
    %87 = vector.load %arg7[%c0_74, %c0_75, %c0_76, %c0_77] : memref<1x8x8x128xbf16, #tpu.memory_space<vmem>>, vector<1x8x8x128xbf16>
    %88 = vector.shape_cast %87 : vector<1x8x8x128xbf16> to vector<8x8x128xbf16>
    %89 = vector.shape_cast %86 : vector<8x8x128xbf16> to vector<1x8x8x128xbf16>
    tpu.vector_store %arg7[%c0_74, %c0_75, %c0_76, %c0_77], %89 {strides = array<i32>} : memref<1x8x8x128xbf16, #tpu.memory_space<vmem>>, vector<1x8x8x128xbf16>,
    %cst_78 = arith.constant dense<0.000000e+00> : vector<128xf32>
    %90 = vector.multi_reduction <add>, %84, %cst_78 [0] : vector<64x128xf32> to vector<128xf32>
    %91 = vector.shape_cast %90 : vector<128xf32> to vector<1x128xf32>
    %c0_79 = arith.constant 0 : index
    %c0_80 = arith.constant 0 : index
    %c0_81 = arith.constant 0 : index
    %92 = vector.load %arg8[%c0_79, %c0_80, %c0_81] : memref<1x1x128xf32, #tpu.memory_space<vmem>>, vector<1x1x128xf32>
    %93 = vector.shape_cast %92 : vector<1x1x128xf32> to vector<1x128xf32>
    %94 = vector.shape_cast %91 : vector<1x128xf32> to vector<1x1x128xf32>
    tpu.vector_store %arg8[%c0_79, %c0_80, %c0_81], %94 {strides = array<i32>} : memref<1x1x128xf32, #tpu.memory_space<vmem>>, vector<1x1x128xf32>,
    %95 = arith.mulf %84, %84 : vector<64x128xf32>
    %cst_82 = arith.constant dense<0.000000e+00> : vector<128xf32>
    %96 = vector.multi_reduction <add>, %95, %cst_82 [0] : vector<64x128xf32> to vector<128xf32>
    %97 = vector.shape_cast %96 : vector<128xf32> to vector<1x128xf32>
    %c0_83 = arith.constant 0 : index
    %c0_84 = arith.constant 0 : index
    %c0_85 = arith.constant 0 : index
    %98 = vector.load %arg9[%c0_83, %c0_84, %c0_85] : memref<1x1x128xf32, #tpu.memory_space<vmem>>, vector<1x1x128xf32>
    %99 = vector.shape_cast %98 : vector<1x1x128xf32> to vector<1x128xf32>
    %100 = vector.shape_cast %97 : vector<1x128xf32> to vector<1x1x128xf32>
    tpu.vector_store %arg9[%c0_83, %c0_84, %c0_85], %100 {strides = array<i32>} : memref<1x1x128xf32, #tpu.memory_space<vmem>>, vector<1x1x128xf32>,
    return
  }
  func.func @transform_0(%arg0: i32, %arg1: i32) -> (i32, i32, i32, i32) {
    %c0_i32 = arith.constant 0 : i32
    %c0_i32_0 = arith.constant 0 : i32
    %c0_i32_1 = arith.constant 0 : i32
    %c0_i32_2 = arith.constant 0 : i32
    return %arg1, %c0_i32, %c0_i32_0, %c0_i32_1 : i32, i32, i32, i32
  }
  func.func @transform_1(%arg0: i32, %arg1: i32) -> (i32, i32) {
    %c0_i32 = arith.constant 0 : i32
    %c0_i32_0 = arith.constant 0 : i32
    %c0_i32_1 = arith.constant 0 : i32
    return %c0_i32, %c0_i32_0 : i32, i32
  }
  func.func @transform_2(%arg0: i32, %arg1: i32) -> (i32, i32) {
    %c0_i32 = arith.constant 0 : i32
    %c0_i32_0 = arith.constant 0 : i32
    %c0_i32_1 = arith.constant 0 : i32
    return %c0_i32, %c0_i32_0 : i32, i32
  }
  func.func @transform_3(%arg0: i32, %arg1: i32) -> (i32, i32, i32) {
    %c0_i32 = arith.constant 0 : i32
    %c0_i32_0 = arith.constant 0 : i32
    %c0_i32_1 = arith.constant 0 : i32
    return %c0_i32, %c0_i32_0, %arg0 : i32, i32, i32
  }
  func.func @transform_4(%arg0: i32, %arg1: i32) -> (i32, i32, i32, i32) {
    %c0_i32 = arith.constant 0 : i32
    %c0_i32_0 = arith.constant 0 : i32
    %c0_i32_1 = arith.constant 0 : i32
    return %arg1, %c0_i32, %c0_i32_0, %arg0 : i32, i32, i32, i32
  }
  func.func @transform_5(%arg0: i32, %arg1: i32) -> (i32, i32, i32, i32) {
    %c0_i32 = arith.constant 0 : i32
    %c0_i32_0 = arith.constant 0 : i32
    %c0_i32_1 = arith.constant 0 : i32
    return %arg1, %c0_i32, %c0_i32_0, %arg0 : i32, i32, i32, i32
  }
  func.func @transform_6(%arg0: i32, %arg1: i32) -> (i32, i32, i32) {
    %c0_i32 = arith.constant 0 : i32
    %c0_i32_0 = arith.constant 0 : i32
    return %arg1, %c0_i32, %arg0 : i32, i32, i32
  }
  func.func @transform_7(%arg0: i32, %arg1: i32) -> (i32, i32, i32) {
    %c0_i32 = arith.constant 0 : i32
    %c0_i32_0 = arith.constant 0 : i32
    return %arg1, %c0_i32, %arg0 : i32, i32, i32
  }
}

module attributes {stable_mosaic.version = 11 : i64} {
  func.func @_conv3x3_kernel(%arg0: i32, %arg1: i32, %arg2: memref<1x8x8x128xbf16, #tpu.memory_space<vmem>>, %arg3: memref<1x128xf32, #tpu.memory_space<vmem>>, %arg4: memref<1x128xf32, #tpu.memory_space<vmem>>, %arg5: memref<9x128x128xbf16, #tpu.memory_space<vmem>>, %arg6: memref<1x8x8x128xbf16, #tpu.memory_space<vmem>>, %arg7: memref<1x1x128xf32, #tpu.memory_space<vmem>>, %arg8: memref<1x1x128xf32, #tpu.memory_space<vmem>>, %arg9: memref<10x10x128xf32, #tpu.memory_space<vmem>>) attributes {dimension_semantics = [#tpu.dimension_semantics<parallel>, #tpu.dimension_semantics<parallel>], iteration_bounds = array<i64: 1, 2>, scalar_prefetch = 0 : i64, scratch_operands = 1 : i64, tpu.core_type = #tpu.core_type<tc>, window_params = [{transform_indices = @transform_0, window_bounds = array<i64: 1, 8, 8, 128>}, {pipeline_mode = #tpu.pipeline_mode<synchronous>, transform_indices = @transform_1, window_bounds = array<i64: 1, 128>}, {pipeline_mode = #tpu.pipeline_mode<synchronous>, transform_indices = @transform_2, window_bounds = array<i64: 1, 128>}, {transform_indices = @transform_3, window_bounds = array<i64: 9, 128, 128>}, {transform_indices = @transform_4, window_bounds = array<i64: 1, 8, 8, 128>}, {transform_indices = @transform_5, window_bounds = array<i64: 1, 1, 128>}, {transform_indices = @transform_6, window_bounds = array<i64: 1, 1, 128>}]} {
    %c0 = arith.constant 0 : index
    %c0_0 = arith.constant 0 : index
    %c0_1 = arith.constant 0 : index
    %c0_2 = arith.constant 0 : index
    %0 = vector.load %arg2[%c0, %c0_0, %c0_1, %c0_2] : memref<1x8x8x128xbf16, #tpu.memory_space<vmem>>, vector<1x8x8x128xbf16>
    %1 = vector.shape_cast %0 : vector<1x8x8x128xbf16> to vector<8x8x128xbf16>
    %2 = arith.extf %1 : vector<8x8x128xbf16> to vector<8x8x128xf32>
    %c0_3 = arith.constant 0 : index
    %c0_4 = arith.constant 0 : index
    %3 = vector.load %arg3[%c0_3, %c0_4] : memref<1x128xf32, #tpu.memory_space<vmem>>, vector<1x128xf32>
    %4 = vector.shape_cast %3 : vector<1x128xf32> to vector<1x1x128xf32>
    %c0_5 = arith.constant 0 : index
    %c0_6 = arith.constant 0 : index
    %5 = vector.load %arg4[%c0_5, %c0_6] : memref<1x128xf32, #tpu.memory_space<vmem>>, vector<1x128xf32>
    %6 = vector.shape_cast %5 : vector<1x128xf32> to vector<1x1x128xf32>
    %7 = vector.broadcast %4 : vector<1x1x128xf32> to vector<8x8x128xf32>
    %8 = arith.mulf %2, %7 : vector<8x8x128xf32>
    %9 = vector.broadcast %6 : vector<1x1x128xf32> to vector<8x8x128xf32>
    %10 = arith.addf %8, %9 : vector<8x8x128xf32>
    %cst = arith.constant 0.000000e+00 : f32
    %11 = vector.broadcast %cst : f32 to vector<8x8x128xf32>
    %12 = arith.maximumf %10, %11 : vector<8x8x128xf32>
    %cst_7 = arith.constant 0.000000e+00 : f32
    %13 = vector.broadcast %cst_7 : f32 to vector<10x10x128xf32>
    %c0_8 = arith.constant 0 : index
    %c0_9 = arith.constant 0 : index
    %c0_10 = arith.constant 0 : index
    %14 = vector.load %arg9[%c0_8, %c0_9, %c0_10] : memref<10x10x128xf32, #tpu.memory_space<vmem>>, vector<10x10x128xf32>
    tpu.vector_store %arg9[%c0_8, %c0_9, %c0_10], %13 {strides = array<i32>} : memref<10x10x128xf32, #tpu.memory_space<vmem>>, vector<10x10x128xf32>,
    %c1 = arith.constant 1 : index
    %c1_11 = arith.constant 1 : index
    %c0_12 = arith.constant 0 : index
    %15 = vector.load %arg9[%c1, %c1_11, %c0_12] : memref<10x10x128xf32, #tpu.memory_space<vmem>>, vector<8x8x128xf32>
    tpu.vector_store %arg9[%c1, %c1_11, %c0_12], %12 {strides = array<i32>} : memref<10x10x128xf32, #tpu.memory_space<vmem>>, vector<8x8x128xf32>,
    %cst_13 = arith.constant 0.000000e+00 : f32
    %16 = vector.broadcast %cst_13 : f32 to vector<64x128xf32>
    %c0_14 = arith.constant 0 : index
    %c0_15 = arith.constant 0 : index
    %c0_16 = arith.constant 0 : index
    %17 = vector.load %arg9[%c0_14, %c0_15, %c0_16] : memref<10x10x128xf32, #tpu.memory_space<vmem>>, vector<8x8x128xf32>
    %18 = vector.shape_cast %17 : vector<8x8x128xf32> to vector<64x128xf32>
    %19 = arith.truncf %18 : vector<64x128xf32> to vector<64x128xbf16>
    %c0_17 = arith.constant 0 : index
    %c0_18 = arith.constant 0 : index
    %c0_19 = arith.constant 0 : index
    %20 = vector.load %arg5[%c0_17, %c0_18, %c0_19] : memref<9x128x128xbf16, #tpu.memory_space<vmem>>, vector<1x128x128xbf16>
    %21 = vector.shape_cast %20 : vector<1x128x128xbf16> to vector<128x128xbf16>
    %cst_20 = arith.constant dense<0.000000e+00> : vector<64x128xf32>
    %22 = tpu.matmul %19, %21, %cst_20 {dimension_numbers = #tpu.dot_dimension_numbers<[1], [0], [0], [1], [0, 0, 1, 1], [], []>} : vector<64x128xbf16>, vector<128x128xbf16>, vector<64x128xf32> -> vector<64x128xf32>
    %23 = arith.addf %16, %22 : vector<64x128xf32>
    %c0_21 = arith.constant 0 : index
    %c1_22 = arith.constant 1 : index
    %c0_23 = arith.constant 0 : index
    %24 = vector.load %arg9[%c0_21, %c1_22, %c0_23] : memref<10x10x128xf32, #tpu.memory_space<vmem>>, vector<8x8x128xf32>
    %25 = vector.shape_cast %24 : vector<8x8x128xf32> to vector<64x128xf32>
    %26 = arith.truncf %25 : vector<64x128xf32> to vector<64x128xbf16>
    %c1_24 = arith.constant 1 : index
    %c0_25 = arith.constant 0 : index
    %c0_26 = arith.constant 0 : index
    %27 = vector.load %arg5[%c1_24, %c0_25, %c0_26] : memref<9x128x128xbf16, #tpu.memory_space<vmem>>, vector<1x128x128xbf16>
    %28 = vector.shape_cast %27 : vector<1x128x128xbf16> to vector<128x128xbf16>
    %cst_27 = arith.constant dense<0.000000e+00> : vector<64x128xf32>
    %29 = tpu.matmul %26, %28, %cst_27 {dimension_numbers = #tpu.dot_dimension_numbers<[1], [0], [0], [1], [0, 0, 1, 1], [], []>} : vector<64x128xbf16>, vector<128x128xbf16>, vector<64x128xf32> -> vector<64x128xf32>
    %30 = arith.addf %23, %29 : vector<64x128xf32>
    %c0_28 = arith.constant 0 : index
    %c2 = arith.constant 2 : index
    %c0_29 = arith.constant 0 : index
    %31 = vector.load %arg9[%c0_28, %c2, %c0_29] : memref<10x10x128xf32, #tpu.memory_space<vmem>>, vector<8x8x128xf32>
    %32 = vector.shape_cast %31 : vector<8x8x128xf32> to vector<64x128xf32>
    %33 = arith.truncf %32 : vector<64x128xf32> to vector<64x128xbf16>
    %c2_30 = arith.constant 2 : index
    %c0_31 = arith.constant 0 : index
    %c0_32 = arith.constant 0 : index
    %34 = vector.load %arg5[%c2_30, %c0_31, %c0_32] : memref<9x128x128xbf16, #tpu.memory_space<vmem>>, vector<1x128x128xbf16>
    %35 = vector.shape_cast %34 : vector<1x128x128xbf16> to vector<128x128xbf16>
    %cst_33 = arith.constant dense<0.000000e+00> : vector<64x128xf32>
    %36 = tpu.matmul %33, %35, %cst_33 {dimension_numbers = #tpu.dot_dimension_numbers<[1], [0], [0], [1], [0, 0, 1, 1], [], []>} : vector<64x128xbf16>, vector<128x128xbf16>, vector<64x128xf32> -> vector<64x128xf32>
    %37 = arith.addf %30, %36 : vector<64x128xf32>
    %c1_34 = arith.constant 1 : index
    %c0_35 = arith.constant 0 : index
    %c0_36 = arith.constant 0 : index
    %38 = vector.load %arg9[%c1_34, %c0_35, %c0_36] : memref<10x10x128xf32, #tpu.memory_space<vmem>>, vector<8x8x128xf32>
    %39 = vector.shape_cast %38 : vector<8x8x128xf32> to vector<64x128xf32>
    %40 = arith.truncf %39 : vector<64x128xf32> to vector<64x128xbf16>
    %c3 = arith.constant 3 : index
    %c0_37 = arith.constant 0 : index
    %c0_38 = arith.constant 0 : index
    %41 = vector.load %arg5[%c3, %c0_37, %c0_38] : memref<9x128x128xbf16, #tpu.memory_space<vmem>>, vector<1x128x128xbf16>
    %42 = vector.shape_cast %41 : vector<1x128x128xbf16> to vector<128x128xbf16>
    %cst_39 = arith.constant dense<0.000000e+00> : vector<64x128xf32>
    %43 = tpu.matmul %40, %42, %cst_39 {dimension_numbers = #tpu.dot_dimension_numbers<[1], [0], [0], [1], [0, 0, 1, 1], [], []>} : vector<64x128xbf16>, vector<128x128xbf16>, vector<64x128xf32> -> vector<64x128xf32>
    %44 = arith.addf %37, %43 : vector<64x128xf32>
    %c1_40 = arith.constant 1 : index
    %c1_41 = arith.constant 1 : index
    %c0_42 = arith.constant 0 : index
    %45 = vector.load %arg9[%c1_40, %c1_41, %c0_42] : memref<10x10x128xf32, #tpu.memory_space<vmem>>, vector<8x8x128xf32>
    %46 = vector.shape_cast %45 : vector<8x8x128xf32> to vector<64x128xf32>
    %47 = arith.truncf %46 : vector<64x128xf32> to vector<64x128xbf16>
    %c4 = arith.constant 4 : index
    %c0_43 = arith.constant 0 : index
    %c0_44 = arith.constant 0 : index
    %48 = vector.load %arg5[%c4, %c0_43, %c0_44] : memref<9x128x128xbf16, #tpu.memory_space<vmem>>, vector<1x128x128xbf16>
    %49 = vector.shape_cast %48 : vector<1x128x128xbf16> to vector<128x128xbf16>
    %cst_45 = arith.constant dense<0.000000e+00> : vector<64x128xf32>
    %50 = tpu.matmul %47, %49, %cst_45 {dimension_numbers = #tpu.dot_dimension_numbers<[1], [0], [0], [1], [0, 0, 1, 1], [], []>} : vector<64x128xbf16>, vector<128x128xbf16>, vector<64x128xf32> -> vector<64x128xf32>
    %51 = arith.addf %44, %50 : vector<64x128xf32>
    %c1_46 = arith.constant 1 : index
    %c2_47 = arith.constant 2 : index
    %c0_48 = arith.constant 0 : index
    %52 = vector.load %arg9[%c1_46, %c2_47, %c0_48] : memref<10x10x128xf32, #tpu.memory_space<vmem>>, vector<8x8x128xf32>
    %53 = vector.shape_cast %52 : vector<8x8x128xf32> to vector<64x128xf32>
    %54 = arith.truncf %53 : vector<64x128xf32> to vector<64x128xbf16>
    %c5 = arith.constant 5 : index
    %c0_49 = arith.constant 0 : index
    %c0_50 = arith.constant 0 : index
    %55 = vector.load %arg5[%c5, %c0_49, %c0_50] : memref<9x128x128xbf16, #tpu.memory_space<vmem>>, vector<1x128x128xbf16>
    %56 = vector.shape_cast %55 : vector<1x128x128xbf16> to vector<128x128xbf16>
    %cst_51 = arith.constant dense<0.000000e+00> : vector<64x128xf32>
    %57 = tpu.matmul %54, %56, %cst_51 {dimension_numbers = #tpu.dot_dimension_numbers<[1], [0], [0], [1], [0, 0, 1, 1], [], []>} : vector<64x128xbf16>, vector<128x128xbf16>, vector<64x128xf32> -> vector<64x128xf32>
    %58 = arith.addf %51, %57 : vector<64x128xf32>
    %c2_52 = arith.constant 2 : index
    %c0_53 = arith.constant 0 : index
    %c0_54 = arith.constant 0 : index
    %59 = vector.load %arg9[%c2_52, %c0_53, %c0_54] : memref<10x10x128xf32, #tpu.memory_space<vmem>>, vector<8x8x128xf32>
    %60 = vector.shape_cast %59 : vector<8x8x128xf32> to vector<64x128xf32>
    %61 = arith.truncf %60 : vector<64x128xf32> to vector<64x128xbf16>
    %c6 = arith.constant 6 : index
    %c0_55 = arith.constant 0 : index
    %c0_56 = arith.constant 0 : index
    %62 = vector.load %arg5[%c6, %c0_55, %c0_56] : memref<9x128x128xbf16, #tpu.memory_space<vmem>>, vector<1x128x128xbf16>
    %63 = vector.shape_cast %62 : vector<1x128x128xbf16> to vector<128x128xbf16>
    %cst_57 = arith.constant dense<0.000000e+00> : vector<64x128xf32>
    %64 = tpu.matmul %61, %63, %cst_57 {dimension_numbers = #tpu.dot_dimension_numbers<[1], [0], [0], [1], [0, 0, 1, 1], [], []>} : vector<64x128xbf16>, vector<128x128xbf16>, vector<64x128xf32> -> vector<64x128xf32>
    %65 = arith.addf %58, %64 : vector<64x128xf32>
    %c2_58 = arith.constant 2 : index
    %c1_59 = arith.constant 1 : index
    %c0_60 = arith.constant 0 : index
    %66 = vector.load %arg9[%c2_58, %c1_59, %c0_60] : memref<10x10x128xf32, #tpu.memory_space<vmem>>, vector<8x8x128xf32>
    %67 = vector.shape_cast %66 : vector<8x8x128xf32> to vector<64x128xf32>
    %68 = arith.truncf %67 : vector<64x128xf32> to vector<64x128xbf16>
    %c7 = arith.constant 7 : index
    %c0_61 = arith.constant 0 : index
    %c0_62 = arith.constant 0 : index
    %69 = vector.load %arg5[%c7, %c0_61, %c0_62] : memref<9x128x128xbf16, #tpu.memory_space<vmem>>, vector<1x128x128xbf16>
    %70 = vector.shape_cast %69 : vector<1x128x128xbf16> to vector<128x128xbf16>
    %cst_63 = arith.constant dense<0.000000e+00> : vector<64x128xf32>
    %71 = tpu.matmul %68, %70, %cst_63 {dimension_numbers = #tpu.dot_dimension_numbers<[1], [0], [0], [1], [0, 0, 1, 1], [], []>} : vector<64x128xbf16>, vector<128x128xbf16>, vector<64x128xf32> -> vector<64x128xf32>
    %72 = arith.addf %65, %71 : vector<64x128xf32>
    %c2_64 = arith.constant 2 : index
    %c2_65 = arith.constant 2 : index
    %c0_66 = arith.constant 0 : index
    %73 = vector.load %arg9[%c2_64, %c2_65, %c0_66] : memref<10x10x128xf32, #tpu.memory_space<vmem>>, vector<8x8x128xf32>
    %74 = vector.shape_cast %73 : vector<8x8x128xf32> to vector<64x128xf32>
    %75 = arith.truncf %74 : vector<64x128xf32> to vector<64x128xbf16>
    %c8 = arith.constant 8 : index
    %c0_67 = arith.constant 0 : index
    %c0_68 = arith.constant 0 : index
    %76 = vector.load %arg5[%c8, %c0_67, %c0_68] : memref<9x128x128xbf16, #tpu.memory_space<vmem>>, vector<1x128x128xbf16>
    %77 = vector.shape_cast %76 : vector<1x128x128xbf16> to vector<128x128xbf16>
    %cst_69 = arith.constant dense<0.000000e+00> : vector<64x128xf32>
    %78 = tpu.matmul %75, %77, %cst_69 {dimension_numbers = #tpu.dot_dimension_numbers<[1], [0], [0], [1], [0, 0, 1, 1], [], []>} : vector<64x128xbf16>, vector<128x128xbf16>, vector<64x128xf32> -> vector<64x128xf32>
    %79 = arith.addf %72, %78 : vector<64x128xf32>
    %80 = vector.shape_cast %79 : vector<64x128xf32> to vector<8x8x128xf32>
    %81 = arith.truncf %80 : vector<8x8x128xf32> to vector<8x8x128xbf16>
    %c0_70 = arith.constant 0 : index
    %c0_71 = arith.constant 0 : index
    %c0_72 = arith.constant 0 : index
    %c0_73 = arith.constant 0 : index
    %82 = vector.load %arg6[%c0_70, %c0_71, %c0_72, %c0_73] : memref<1x8x8x128xbf16, #tpu.memory_space<vmem>>, vector<1x8x8x128xbf16>
    %83 = vector.shape_cast %82 : vector<1x8x8x128xbf16> to vector<8x8x128xbf16>
    %84 = vector.shape_cast %81 : vector<8x8x128xbf16> to vector<1x8x8x128xbf16>
    tpu.vector_store %arg6[%c0_70, %c0_71, %c0_72, %c0_73], %84 {strides = array<i32>} : memref<1x8x8x128xbf16, #tpu.memory_space<vmem>>, vector<1x8x8x128xbf16>,
    %cst_74 = arith.constant dense<0.000000e+00> : vector<128xf32>
    %85 = vector.multi_reduction <add>, %79, %cst_74 [0] : vector<64x128xf32> to vector<128xf32>
    %86 = vector.shape_cast %85 : vector<128xf32> to vector<1x128xf32>
    %c0_75 = arith.constant 0 : index
    %c0_76 = arith.constant 0 : index
    %c0_77 = arith.constant 0 : index
    %87 = vector.load %arg7[%c0_75, %c0_76, %c0_77] : memref<1x1x128xf32, #tpu.memory_space<vmem>>, vector<1x1x128xf32>
    %88 = vector.shape_cast %87 : vector<1x1x128xf32> to vector<1x128xf32>
    %89 = vector.shape_cast %86 : vector<1x128xf32> to vector<1x1x128xf32>
    tpu.vector_store %arg7[%c0_75, %c0_76, %c0_77], %89 {strides = array<i32>} : memref<1x1x128xf32, #tpu.memory_space<vmem>>, vector<1x1x128xf32>,
    %90 = arith.mulf %79, %79 : vector<64x128xf32>
    %cst_78 = arith.constant dense<0.000000e+00> : vector<128xf32>
    %91 = vector.multi_reduction <add>, %90, %cst_78 [0] : vector<64x128xf32> to vector<128xf32>
    %92 = vector.shape_cast %91 : vector<128xf32> to vector<1x128xf32>
    %c0_79 = arith.constant 0 : index
    %c0_80 = arith.constant 0 : index
    %c0_81 = arith.constant 0 : index
    %93 = vector.load %arg8[%c0_79, %c0_80, %c0_81] : memref<1x1x128xf32, #tpu.memory_space<vmem>>, vector<1x1x128xf32>
    %94 = vector.shape_cast %93 : vector<1x1x128xf32> to vector<1x128xf32>
    %95 = vector.shape_cast %92 : vector<1x128xf32> to vector<1x1x128xf32>
    tpu.vector_store %arg8[%c0_79, %c0_80, %c0_81], %95 {strides = array<i32>} : memref<1x1x128xf32, #tpu.memory_space<vmem>>, vector<1x1x128xf32>,
    return
  }
  func.func @transform_0(%arg0: i32, %arg1: i32) -> (i32, i32, i32, i32) {
    %c0_i32 = arith.constant 0 : i32
    %c0_i32_0 = arith.constant 0 : i32
    %c0_i32_1 = arith.constant 0 : i32
    %c0_i32_2 = arith.constant 0 : i32
    return %arg1, %c0_i32, %c0_i32_0, %c0_i32_1 : i32, i32, i32, i32
  }
  func.func @transform_1(%arg0: i32, %arg1: i32) -> (i32, i32) {
    %c0_i32 = arith.constant 0 : i32
    %c0_i32_0 = arith.constant 0 : i32
    %c0_i32_1 = arith.constant 0 : i32
    return %c0_i32, %c0_i32_0 : i32, i32
  }
  func.func @transform_2(%arg0: i32, %arg1: i32) -> (i32, i32) {
    %c0_i32 = arith.constant 0 : i32
    %c0_i32_0 = arith.constant 0 : i32
    %c0_i32_1 = arith.constant 0 : i32
    return %c0_i32, %c0_i32_0 : i32, i32
  }
  func.func @transform_3(%arg0: i32, %arg1: i32) -> (i32, i32, i32) {
    %c0_i32 = arith.constant 0 : i32
    %c0_i32_0 = arith.constant 0 : i32
    %c0_i32_1 = arith.constant 0 : i32
    return %c0_i32, %c0_i32_0, %arg0 : i32, i32, i32
  }
  func.func @transform_4(%arg0: i32, %arg1: i32) -> (i32, i32, i32, i32) {
    %c0_i32 = arith.constant 0 : i32
    %c0_i32_0 = arith.constant 0 : i32
    %c0_i32_1 = arith.constant 0 : i32
    return %arg1, %c0_i32, %c0_i32_0, %arg0 : i32, i32, i32, i32
  }
  func.func @transform_5(%arg0: i32, %arg1: i32) -> (i32, i32, i32) {
    %c0_i32 = arith.constant 0 : i32
    %c0_i32_0 = arith.constant 0 : i32
    return %arg1, %c0_i32, %arg0 : i32, i32, i32
  }
  func.func @transform_6(%arg0: i32, %arg1: i32) -> (i32, i32, i32) {
    %c0_i32 = arith.constant 0 : i32
    %c0_i32_0 = arith.constant 0 : i32
    return %arg1, %c0_i32, %arg0 : i32, i32, i32
  }
}

</mosaic_0001>

<bundles_post_ra>
// kernel: _lambda_.6
= control target key start
LH: loop header
LB: loop body
LE: loop exit
PB: predicated region body
PF: predicated region fallthrough
CT: control target
= control target key end

     0   :  { %s513_s9 = smov 0   ;;  %s556_s0 = inlined_call_operand.vmem [shape: bf16[2,16,16,128], index: 0, kind: input, shape index: {}]   ;;  %s557_s1 = inlined_call_operand.vmem [shape: f32[2,1,128], index: 1, kind: output, shape index: {0}]   ;;  %s558_s2 = inlined_call_operand.vmem [shape: f32[2,1,128], index: 2, kind: output, shape index: {1}]  }
   0x1 LB: > { %s393_s10 = sadd.s32 4294967295, %s496_s9   ;;  %p397_p0 = scmp.ge.s32.totalorder %s496_s9, 1  ;;  %s496_s9 = sphi %s513_s9, %s13_s9  }
   0x2   : > { %p115_p1 = scmp.lt.s32.totalorder %s496_s9, 3 }
   0x4   : > { %p116_p2 = pnand %p397_p0, %p115_p1 }
   0x5   : > { %p138_p3 = scmp.lt.s32.totalorder (!%p116_p2), %s393_s10, 1 }
   0x6   : > { %119 = sbr.rel (%p116_p2) target bundleno = 96 (0x60), region = 24 }
   0xd   : > { %s560_s10 = smov (!%p138_p3, %s393_s10), 1 }
   0xe   : > { %s402_s11 = sshll.u32 %s560_s10, 7  ;;  %s145_s17 = scalar_lea.vmem %s557_s1, %s560_s10 }
   0xf   : > { %s527_s14 = scalar_lea.vmem %s556_s0, %s402_s11  ;;  %s148_s20 = scalar_lea.vmem %s558_s2, %s560_s10 }
  0x10   : > { %v404_v0 = vld [vmem:[%s527_s14] sm:$0xff]   ;;  %v467_v1 = vld [vmem:[%s527_s14 + $0x8] sm:$0xff]   ;;  %v468_v6 = vld [vmem:[%s527_s14 + $0x10] sm:$0xff]  }
  0x11   : > { %v405_v2 = vunpack.c.l.bf16 %v404_v0  ;;  %v406_v3 = vunpack.c.h.bf16 %v404_v0  ;;  %v409_v4 = vunpack.c.l.bf16 %v467_v1  ;;  %v410_v7 = vunpack.c.h.bf16 %v467_v1  ;;  %v469_v11 = vld [vmem:[%s527_s14 + $0x18] sm:$0xff]   ;;  %v470_v19 = vld [vmem:[%s527_s14 + $0x20] sm:$0xff]   ;;  %v471_v28 = vld [vmem:[%s527_s14 + $0x28] sm:$0xff]  }
  0x12   : > { %v413_v9 = vunpack.c.l.bf16 %v468_v6  ;;  %v414_v14 = vunpack.c.h.bf16 %v468_v6  ;;  %v417_v17 = vunpack.c.l.bf16 %v469_v11  ;;  %v418_v22 = vunpack.c.h.bf16 %v469_v11  ;;  %v472_v37 = vld [vmem:[%s527_s14 + $0x30] sm:$0xff]   ;;  %v473_v46 = vld [vmem:[%s527_s14 + $0x38] sm:$0xff]   ;;  %v474_v55 = vld [vmem:[%s527_s14 + $0x40] sm:$0xff]  }
  0x13   : > { %v213_v5 = vadd.f32 %v406_v3, %v405_v2  ;;  %v251_v12 = vmul.f32 %v405_v2, %v405_v2  ;;  %v252_v13 = vmul.f32 %v406_v3, %v406_v3  ;;  %v253_v16 = vmul.f32 %v409_v4, %v409_v4  ;;  %v475_v0 = vld [vmem:[%s527_s14 + $0x48] sm:$0xff]  }
  0x14   : > { %v254_v20 = vmul.f32 %v410_v7, %v410_v7  ;;  %v255_v24 = vmul.f32 %v413_v9, %v413_v9  ;;  %v421_v26 = vunpack.c.l.bf16 %v470_v19  ;;  %v256_v29 = vmul.f32 %v414_v14, %v414_v14 }
  0x15   : > { %v214_v8 = vadd.f32 %v409_v4, %v213_v5  ;;  %v283_v21 = vadd.f32 %v252_v13, %v251_v12  ;;  %v422_v31 = vunpack.c.h.bf16 %v470_v19  ;;  %v257_v33 = vmul.f32 %v417_v17, %v417_v17 }
  0x16   : > { %v425_v35 = vunpack.c.l.bf16 %v471_v28  ;;  %v258_v38 = vmul.f32 %v418_v22, %v418_v22  ;;  %v426_v40 = vunpack.c.h.bf16 %v471_v28  ;;  %v259_v42 = vmul.f32 %v421_v26, %v421_v26 }
  0x17   : > { %v215_v10 = vadd.f32 %v410_v7, %v214_v8  ;;  %v284_v25 = vadd.f32 %v283_v21, %v253_v16  ;;  %v429_v44 = vunpack.c.l.bf16 %v472_v37  ;;  %v260_v47 = vmul.f32 %v422_v31, %v422_v31 }
  0x18   : > { %v430_v49 = vunpack.c.h.bf16 %v472_v37  ;;  %v261_v51 = vmul.f32 %v425_v35, %v425_v35  ;;  %v433_v53 = vunpack.c.l.bf16 %v473_v46  ;;  %v262_v56 = vmul.f32 %v426_v40, %v426_v40 }
  0x19   : > { %v216_v15 = vadd.f32 %v413_v9, %v215_v10  ;;  %v285_v30 = vadd.f32 %v284_v25, %v254_v20  ;;  %v434_v58 = vunpack.c.h.bf16 %v473_v46  ;;  %v263_v60 = vmul.f32 %v429_v44, %v429_v44  ;;  %v476_v9 = vld [vmem:[%s527_s14 + $0x50] sm:$0xff]  }
  0x1a   : > { %v437_v62 = vunpack.c.l.bf16 %v474_v55  ;;  %v264_v1 = vmul.f32 %v430_v49, %v430_v49  ;;  %v438_v3 = vunpack.c.h.bf16 %v474_v55  ;;  %v265_v5 = vmul.f32 %v433_v53, %v433_v53 }
  0x1b   : > { %v217_v18 = vadd.f32 %v414_v14, %v216_v15  ;;  %v286_v34 = vadd.f32 %v285_v30, %v255_v24  ;;  %v441_v7 = vunpack.c.l.bf16 %v475_v0  ;;  %v266_v10 = vmul.f32 %v434_v58, %v434_v58 }
  0x1c   : > { %v442_v12 = vunpack.c.h.bf16 %v475_v0  ;;  %v267_v14 = vmul.f32 %v437_v62, %v437_v62  ;;  %v445_v16 = vunpack.c.l.bf16 %v476_v9  ;;  %v268_v19 = vmul.f32 %v438_v3, %v438_v3 }
  0x1d   : > { %v218_v23 = vadd.f32 %v417_v17, %v217_v18  ;;  %v287_v39 = vadd.f32 %v286_v34, %v256_v29  ;;  %v477_v18 = vld [vmem:[%s527_s14 + $0x58] sm:$0xff]   ;;  %v446_v21 = vunpack.c.h.bf16 %v476_v9 }
  0x1e   : > { %v449_v25 = vunpack.c.l.bf16 %v477_v18  ;;  %v270_v28 = vmul.f32 %v442_v12, %v442_v12  ;;  %v450_v30 = vunpack.c.h.bf16 %v477_v18 }
  0x1f   : > { %v219_v27 = vadd.f32 %v418_v22, %v218_v23  ;;  %v288_v43 = vadd.f32 %v287_v39, %v257_v33  ;;  %v269_v23 = vmul.f32 %v441_v7, %v441_v7  ;;  %v272_v37 = vmul.f32 %v446_v21, %v446_v21 }
  0x20   : > { %v274_v46 = vmul.f32 %v450_v30, %v450_v30 }
  0x21   : > { %v220_v32 = vadd.f32 %v421_v26, %v219_v27  ;;  %v289_v48 = vadd.f32 %v288_v43, %v258_v38  ;;  %v478_v27 = vld [vmem:[%s527_s14 + $0x60] sm:$0xff]  }
  0x22   : > { %v453_v34 = vunpack.c.l.bf16 %v478_v27  ;;  %v454_v39 = vunpack.c.h.bf16 %v478_v27 }
  0x23   : > { %v221_v36 = vadd.f32 %v422_v31, %v220_v32  ;;  %v290_v52 = vadd.f32 %v289_v48, %v259_v42  ;;  %v271_v32 = vmul.f32 %v445_v16, %v445_v16 }
  0x24   : > { %v276_v55 = vmul.f32 %v454_v39, %v454_v39 }
  0x25   : > { %v222_v41 = vadd.f32 %v425_v35, %v221_v36  ;;  %v291_v57 = vadd.f32 %v290_v52, %v260_v47  ;;  %v479_v36 = vld [vmem:[%s527_s14 + $0x68] sm:$0xff]  }
  0x26   : > { %v457_v43 = vunpack.c.l.bf16 %v479_v36  ;;  %v458_v48 = vunpack.c.h.bf16 %v479_v36 }
  0x27   : > { %v223_v45 = vadd.f32 %v426_v40, %v222_v41  ;;  %v292_v61 = vadd.f32 %v291_v57, %v261_v51  ;;  %v273_v41 = vmul.f32 %v449_v25, %v449_v25 }
  0x29   : > { %v224_v50 = vadd.f32 %v429_v44, %v223_v45  ;;  %v293_v2 = vadd.f32 %v292_v61, %v262_v56  ;;  %v480_v45 = vld [vmem:[%s527_s14 + $0x70] sm:$0xff]  }
  0x2a   : > { %v461_v52 = vunpack.c.l.bf16 %v480_v45  ;;  %v462_v57 = vunpack.c.h.bf16 %v480_v45 }
  0x2b   : > { %v225_v54 = vadd.f32 %v430_v49, %v224_v50  ;;  %v294_v6 = vadd.f32 %v293_v2, %v263_v60  ;;  %v275_v50 = vmul.f32 %v453_v34, %v453_v34 }
  0x2d   : > { %v226_v59 = vadd.f32 %v433_v53, %v225_v54  ;;  %v295_v11 = vadd.f32 %v294_v6, %v264_v1  ;;  %v481_v54 = vld [vmem:[%s527_s14 + $0x78] sm:$0xff]   ;;  %v280_v6 = vmul.f32 %v462_v57, %v462_v57 }
  0x2e   : > { %v465_v61 = vunpack.c.l.bf16 %v481_v54  ;;  %v466_v1 = vunpack.c.h.bf16 %v481_v54 }
  0x2f   : > { %v227_v63 = vadd.f32 %v434_v58, %v226_v59  ;;  %v296_v15 = vadd.f32 %v295_v11, %v265_v5  ;;  %v277_v59 = vmul.f32 %v457_v43, %v457_v43 }
  0x30   : > { %v281_v9 = vmul.f32 %v465_v61, %v465_v61 }
  0x31   : > { %v228_v4 = vadd.f32 %v437_v62, %v227_v63  ;;  %v297_v20 = vadd.f32 %v296_v15, %v266_v10  ;;  %v278_v63 = vmul.f32 %v458_v48, %v458_v48 }
  0x33   : > { %v229_v8 = vadd.f32 %v438_v3, %v228_v4  ;;  %v298_v24 = vadd.f32 %v297_v20, %v267_v14  ;;  %v279_v3 = vmul.f32 %v461_v52, %v461_v52 }
  0x35   : > { %v230_v13 = vadd.f32 %v441_v7, %v229_v8  ;;  %v299_v29 = vadd.f32 %v298_v24, %v268_v19 }
  0x37   : > { %v231_v17 = vadd.f32 %v442_v12, %v230_v13  ;;  %v300_v33 = vadd.f32 %v299_v29, %v269_v23  ;;  %v282_v12 = vmul.f32 %v466_v1, %v466_v1 }
  0x39   : > { %v232_v22 = vadd.f32 %v445_v16, %v231_v17  ;;  %v301_v38 = vadd.f32 %v300_v33, %v270_v28 }
  0x3b   : > { %v233_v26 = vadd.f32 %v446_v21, %v232_v22  ;;  %v302_v42 = vadd.f32 %v301_v38, %v271_v32 }
  0x3d   : > { %v234_v31 = vadd.f32 %v449_v25, %v233_v26  ;;  %v303_v47 = vadd.f32 %v302_v42, %v272_v37 }
  0x3f   : > { %v235_v35 = vadd.f32 %v450_v30, %v234_v31  ;;  %v304_v51 = vadd.f32 %v303_v47, %v273_v41 }
  0x41   : > { %v236_v40 = vadd.f32 %v453_v34, %v235_v35  ;;  %v305_v56 = vadd.f32 %v304_v51, %v274_v46 }
  0x43   : > { %v237_v44 = vadd.f32 %v454_v39, %v236_v40  ;;  %v306_v60 = vadd.f32 %v305_v56, %v275_v50 }
  0x45   : > { %v238_v49 = vadd.f32 %v457_v43, %v237_v44  ;;  %v307_v0 = vadd.f32 %v306_v60, %v276_v55 }
  0x47   : > { %v239_v53 = vadd.f32 %v458_v48, %v238_v49  ;;  %v308_v4 = vadd.f32 %v307_v0, %v277_v59 }
  0x49   : > { %v240_v58 = vadd.f32 %v461_v52, %v239_v53  ;;  %v309_v7 = vadd.f32 %v308_v4, %v278_v63 }
  0x4b   : > { %v241_v62 = vadd.f32 %v462_v57, %v240_v58  ;;  %v310_v10 = vadd.f32 %v309_v7, %v279_v3 }
  0x4d   : > { %v242_v2 = vadd.f32 %v465_v61, %v241_v62  ;;  %v311_v13 = vadd.f32 %v310_v10, %v280_v6 }
  0x4f   : > { %v243_v5 = vadd.f32 %v466_v1, %v242_v2  ;;  %v312_v15 = vadd.f32 %v311_v13, %v281_v9 }
  0x51   : > { %v244_v8 = vrot.slane %v243_v5, 4  ;;  %v313_v17 = vadd.f32 %v312_v15, %v282_v12 }
  0x53   : > { %v245_v11 = vadd.f32 %v244_v8, %v243_v5  ;;  %v314_v19 = vrot.slane %v313_v17, 4 }
  0x55   : > { %v246_v14 = vrot.slane %v245_v11, 2  ;;  %v315_v21 = vadd.f32 %v314_v19, %v313_v17 }
  0x57   : > { %v247_v16 = vadd.f32 %v246_v14, %v245_v11  ;;  %v316_v22 = vrot.slane %v315_v21, 2 }
  0x59   : > { %v248_v18 = vrot.slane %v247_v16, 1  ;;  %v317_v23 = vadd.f32 %v316_v22, %v315_v21 }
  0x5b   : > { %v249_v20 = vadd.f32 %v248_v18, %v247_v16  ;;  %v318_v24 = vrot.slane %v317_v23, 1 }
  0x5d   : > { %250 = vst [vmem:[%s145_s17] sm:$0x1] %v249_v20  ;;  %v319_v25 = vadd.f32 %v318_v24, %v317_v23 }
  0x5f   : > { %320 = vst [vmem:[%s148_s20] sm:$0x1] %v319_v25 }
  0x60 PF: > { %s13_s9 = sadd.s32 1, %s496_s9  }
  0x61   : > { %p10_p4 = scmp.ge.s32.totalorder %s13_s9, 4  }
  0x63   :  { %12 = sbr.rel (!%p10_p4) target bundleno = 1 (0x1), region = 66 }

// kernel: _lambda_.7
= control target key start
LH: loop header
LB: loop body
LE: loop exit
PB: predicated region body
PF: predicated region fallthrough
CT: control target
= control target key end

     0   :  { %s849_s12 = smov 0   ;;  %s983_s0 = inlined_call_operand.vmem [shape: bf16[2,16,16,128], index: 0, kind: input, shape index: {}]   ;;  %s984_s1 = inlined_call_operand.vmem [shape: f32[1,128], index: 1, kind: input, shape index: {}]   ;;  %s985_s2 = inlined_call_operand.vmem [shape: f32[1,128], index: 2, kind: input, shape index: {}]   ;;  %s986_s3 = inlined_call_operand.vmem [shape: bf16[2,16,16,128], index: 3, kind: output, shape index: {}]  }
   0x1 LB: > { %s560_s13 = sadd.s32 4294967295, %s827_s12   ;;  %p564_p0 = scmp.ge.s32.totalorder %s827_s12, 1  ;;  %s827_s12 = sphi %s849_s12, %s13_s12  }
   0x2   : > { %p137_p1 = scmp.lt.s32.totalorder %s827_s12, 3 }
   0x4   : > { %p138_p2 = pnand %p564_p0, %p137_p1 }
   0x5   : > { %p161_p3 = scmp.lt.s32.totalorder (!%p138_p2), %s560_s13, 1  ;;  %v870_v0 = vld [vmem:[%s984_s1] ss:$0 sm:$0xff] (!%p138_p2) }
   0x6   : > { %141 = sbr.rel (%p138_p2) target bundleno = 59 (0x3b), region = 32  ;;  %v879_v9 = vld [vmem:[%s985_s2] ss:$0 sm:$0xff] (!%p138_p2) }
   0xd   : > { %s988_s13 = smov (!%p161_p3, %s560_s13), 1 }
   0xe   : > { %s605_s14 = sshll.u32 %s988_s13, 7 }
   0xf   : > { %s865_s17 = scalar_lea.vmem %s983_s0, %s605_s14  ;;  %s904_s24 = scalar_lea.vmem %s986_s3, %s605_s14 }
  0x10   : > { %v640_v1 = vld [vmem:[%s865_s17] sm:$0xff]   ;;  %v783_v2 = vld [vmem:[%s865_s17 + $0x8] sm:$0xff]   ;;  %v784_v3 = vld [vmem:[%s865_s17 + $0x10] sm:$0xff]  }
  0x11   : > { %v641_v4 = vunpack.c.l.bf16 %v640_v1  ;;  %v642_v5 = vunpack.c.h.bf16 %v640_v1  ;;  %v645_v6 = vunpack.c.l.bf16 %v783_v2  ;;  %v646_v7 = vunpack.c.h.bf16 %v783_v2  ;;  %v785_v8 = vld [vmem:[%s865_s17 + $0x18] sm:$0xff]   ;;  %v786_v30 = vld [vmem:[%s865_s17 + $0x20] sm:$0xff]   ;;  %v787_v35 = vld [vmem:[%s865_s17 + $0x28] sm:$0xff]  }
  0x12   : > { %v649_v10 = vunpack.c.l.bf16 %v784_v3  ;;  %v650_v11 = vunpack.c.h.bf16 %v784_v3  ;;  %v653_v12 = vunpack.c.l.bf16 %v785_v8  ;;  %v654_v13 = vunpack.c.h.bf16 %v785_v8  ;;  %v788_v40 = vld [vmem:[%s865_s17 + $0x30] sm:$0xff]   ;;  %v789_v45 = vld [vmem:[%s865_s17 + $0x38] sm:$0xff]   ;;  %v790_v3 = vld [vmem:[%s865_s17 + $0x40] sm:$0xff]  }
  0x13   : > { %v243_v14 = vmul.f32 %v641_v4, %v870_v0  ;;  %v244_v15 = vmul.f32 %v642_v5, %v870_v0  ;;  %v245_v16 = vmul.f32 %v645_v6, %v870_v0  ;;  %v246_v17 = vmul.f32 %v646_v7, %v870_v0 }
  0x14   : > { %v247_v18 = vmul.f32 %v649_v10, %v870_v0  ;;  %v248_v19 = vmul.f32 %v650_v11, %v870_v0  ;;  %v249_v20 = vmul.f32 %v653_v12, %v870_v0  ;;  %v250_v21 = vmul.f32 %v654_v13, %v870_v0  ;;  %v791_v13 = vld [vmem:[%s865_s17 + $0x48] sm:$0xff]  }
  0x15   : > { %v281_v22 = vadd.f32 %v879_v9, %v243_v14  ;;  %v282_v23 = vadd.f32 %v879_v9, %v244_v15  ;;  %v283_v24 = vadd.f32 %v879_v9, %v245_v16  ;;  %v284_v25 = vadd.f32 %v879_v9, %v246_v17 }
  0x16   : > { %v285_v26 = vadd.f32 %v879_v9, %v247_v18  ;;  %v286_v27 = vadd.f32 %v879_v9, %v248_v19  ;;  %v287_v28 = vadd.f32 %v879_v9, %v249_v20  ;;  %v288_v29 = vadd.f32 %v879_v9, %v250_v21  ;;  %v792_v18 = vld [vmem:[%s865_s17 + $0x50] sm:$0xff]  }
  0x17   : > { %v313_v31 = vmax.f32 %v281_v22, 0.0  ;;  %v314_v32 = vmax.f32 %v282_v23, 0.0  ;;  %v315_v33 = vmax.f32 %v283_v24, 0.0  ;;  %v316_v34 = vmax.f32 %v284_v25, 0.0  ;;  %v793_v23 = vld [vmem:[%s865_s17 + $0x58] sm:$0xff]  }
  0x18   : > { %v317_v36 = vmax.f32 %v285_v26, 0.0  ;;  %v318_v37 = vmax.f32 %v286_v27, 0.0  ;;  %v319_v38 = vmax.f32 %v287_v28, 0.0  ;;  %v320_v39 = vmax.f32 %v288_v29, 0.0 }
  0x19   : > { %v706_v41 = vpack.c.bf16 %v314_v32, %v313_v31  ;;  %v711_v42 = vpack.c.bf16 %v316_v34, %v315_v33  ;;  %v657_v43 = vunpack.c.l.bf16 %v786_v30  ;;  %v658_v44 = vunpack.c.h.bf16 %v786_v30 }
  0x1a   : > { %v716_v46 = vpack.c.bf16 %v318_v37, %v317_v36  ;;  %v721_v47 = vpack.c.bf16 %v320_v39, %v319_v38  ;;  %v661_v48 = vunpack.c.l.bf16 %v787_v35  ;;  %v662_v49 = vunpack.c.h.bf16 %v787_v35 }
  0x1b   : > { %707 = vst [vmem:[%s904_s24] sm:$0xff] %v706_v41   ;;  %798 = vst [vmem:[%s904_s24 + $0x8] sm:$0xff] %v711_v42   ;;  %v251_v50 = vmul.f32 %v657_v43, %v870_v0  ;;  %v252_v51 = vmul.f32 %v658_v44, %v870_v0  ;;  %v665_v52 = vunpack.c.l.bf16 %v788_v40  ;;  %v666_v53 = vunpack.c.h.bf16 %v788_v40  ;;  %v794_v40 = vld [vmem:[%s865_s17 + $0x60] sm:$0xff]  }
  0x1c   : > { %799 = vst [vmem:[%s904_s24 + $0x10] sm:$0xff] %v716_v46   ;;  %800 = vst [vmem:[%s904_s24 + $0x18] sm:$0xff] %v721_v47   ;;  %v253_v54 = vmul.f32 %v661_v48, %v870_v0  ;;  %v254_v55 = vmul.f32 %v662_v49, %v870_v0  ;;  %v669_v56 = vunpack.c.l.bf16 %v789_v45  ;;  %v670_v57 = vunpack.c.h.bf16 %v789_v45 }
  0x1d   : > { %v289_v58 = vadd.f32 %v879_v9, %v251_v50  ;;  %v290_v59 = vadd.f32 %v879_v9, %v252_v51  ;;  %v255_v60 = vmul.f32 %v665_v52, %v870_v0  ;;  %v256_v61 = vmul.f32 %v666_v53, %v870_v0  ;;  %v795_v53 = vld [vmem:[%s865_s17 + $0x68] sm:$0xff]  }
  0x1e   : > { %v291_v62 = vadd.f32 %v879_v9, %v253_v54  ;;  %v292_v63 = vadd.f32 %v879_v9, %v254_v55  ;;  %v257_v1 = vmul.f32 %v669_v56, %v870_v0  ;;  %v258_v2 = vmul.f32 %v670_v57, %v870_v0 }
  0x1f   : > { %v321_v4 = vmax.f32 %v289_v58, 0.0  ;;  %v322_v5 = vmax.f32 %v290_v59, 0.0  ;;  %v293_v6 = vadd.f32 %v879_v9, %v255_v60  ;;  %v294_v7 = vadd.f32 %v879_v9, %v256_v61  ;;  %v796_v58 = vld [vmem:[%s865_s17 + $0x70] sm:$0xff]  }
  0x20   : > { %v323_v8 = vmax.f32 %v291_v62, 0.0  ;;  %v324_v10 = vmax.f32 %v292_v63, 0.0  ;;  %v295_v11 = vadd.f32 %v879_v9, %v257_v1  ;;  %v296_v12 = vadd.f32 %v879_v9, %v258_v2  ;;  %v797_v63 = vld [vmem:[%s865_s17 + $0x78] sm:$0xff]  }
  0x21   : > { %v726_v14 = vpack.c.bf16 %v322_v5, %v321_v4  ;;  %v325_v15 = vmax.f32 %v293_v6, 0.0  ;;  %v326_v16 = vmax.f32 %v294_v7, 0.0  ;;  %v673_v17 = vunpack.c.l.bf16 %v790_v3 }
  0x22   : > { %v731_v19 = vpack.c.bf16 %v324_v10, %v323_v8  ;;  %v327_v20 = vmax.f32 %v295_v11, 0.0  ;;  %v328_v21 = vmax.f32 %v296_v12, 0.0  ;;  %v674_v22 = vunpack.c.h.bf16 %v790_v3 }
  0x23   : > { %801 = vst [vmem:[%s904_s24 + $0x20] sm:$0xff] %v726_v14   ;;  %v736_v24 = vpack.c.bf16 %v326_v16, %v325_v15  ;;  %v259_v25 = vmul.f32 %v673_v17, %v870_v0  ;;  %v677_v26 = vunpack.c.l.bf16 %v791_v13  ;;  %v678_v27 = vunpack.c.h.bf16 %v791_v13 }
  0x24   : > { %802 = vst [vmem:[%s904_s24 + $0x28] sm:$0xff] %v731_v19   ;;  %v741_v28 = vpack.c.bf16 %v328_v21, %v327_v20  ;;  %v260_v29 = vmul.f32 %v674_v22, %v870_v0  ;;  %v681_v30 = vunpack.c.l.bf16 %v792_v18  ;;  %v682_v31 = vunpack.c.h.bf16 %v792_v18 }
  0x25   : > { %803 = vst [vmem:[%s904_s24 + $0x30] sm:$0xff] %v736_v24   ;;  %v297_v32 = vadd.f32 %v879_v9, %v259_v25  ;;  %v261_v33 = vmul.f32 %v677_v26, %v870_v0  ;;  %v262_v34 = vmul.f32 %v678_v27, %v870_v0  ;;  %v685_v35 = vunpack.c.l.bf16 %v793_v23 }
  0x26   : > { %804 = vst [vmem:[%s904_s24 + $0x38] sm:$0xff] %v741_v28   ;;  %v298_v36 = vadd.f32 %v879_v9, %v260_v29  ;;  %v263_v37 = vmul.f32 %v681_v30, %v870_v0  ;;  %v264_v38 = vmul.f32 %v682_v31, %v870_v0  ;;  %v686_v39 = vunpack.c.h.bf16 %v793_v23 }
  0x27   : > { %v329_v41 = vmax.f32 %v297_v32, 0.0  ;;  %v299_v42 = vadd.f32 %v879_v9, %v261_v33  ;;  %v300_v43 = vadd.f32 %v879_v9, %v262_v34  ;;  %v265_v44 = vmul.f32 %v685_v35, %v870_v0 }
  0x28   : > { %v330_v45 = vmax.f32 %v298_v36, 0.0  ;;  %v301_v46 = vadd.f32 %v879_v9, %v263_v37  ;;  %v302_v47 = vadd.f32 %v879_v9, %v264_v38  ;;  %v266_v48 = vmul.f32 %v686_v39, %v870_v0 }
  0x29   : > { %v331_v49 = vmax.f32 %v299_v42, 0.0  ;;  %v332_v50 = vmax.f32 %v300_v43, 0.0  ;;  %v303_v51 = vadd.f32 %v879_v9, %v265_v44  ;;  %v689_v52 = vunpack.c.l.bf16 %v794_v40 }
  0x2a   : > { %v746_v54 = vpack.c.bf16 %v330_v45, %v329_v41  ;;  %v333_v55 = vmax.f32 %v301_v46, 0.0  ;;  %v334_v56 = vmax.f32 %v302_v47, 0.0  ;;  %v304_v57 = vadd.f32 %v879_v9, %v266_v48 }
  0x2b   : > { %v751_v59 = vpack.c.bf16 %v332_v50, %v331_v49  ;;  %v335_v60 = vmax.f32 %v303_v51, 0.0  ;;  %v690_v61 = vunpack.c.h.bf16 %v794_v40  ;;  %v267_v62 = vmul.f32 %v689_v52, %v870_v0 }
  0x2c   : > { %805 = vst [vmem:[%s904_s24 + $0x40] sm:$0xff] %v746_v54   ;;  %v756_v1 = vpack.c.bf16 %v334_v56, %v333_v55  ;;  %v336_v2 = vmax.f32 %v304_v57, 0.0  ;;  %v693_v3 = vunpack.c.l.bf16 %v795_v53  ;;  %v694_v4 = vunpack.c.h.bf16 %v795_v53 }
  0x2d   : > { %806 = vst [vmem:[%s904_s24 + $0x48] sm:$0xff] %v751_v59   ;;  %v268_v5 = vmul.f32 %v690_v61, %v870_v0  ;;  %v305_v6 = vadd.f32 %v879_v9, %v267_v62  ;;  %v697_v7 = vunpack.c.l.bf16 %v796_v58  ;;  %v698_v8 = vunpack.c.h.bf16 %v796_v58 }
  0x2e   : > { %807 = vst [vmem:[%s904_s24 + $0x50] sm:$0xff] %v756_v1   ;;  %v761_v10 = vpack.c.bf16 %v336_v2, %v335_v60  ;;  %v269_v11 = vmul.f32 %v693_v3, %v870_v0  ;;  %v270_v12 = vmul.f32 %v694_v4, %v870_v0  ;;  %v701_v13 = vunpack.c.l.bf16 %v797_v63 }
  0x2f   : > { %v306_v14 = vadd.f32 %v879_v9, %v268_v5  ;;  %v337_v15 = vmax.f32 %v305_v6, 0.0  ;;  %v271_v16 = vmul.f32 %v697_v7, %v870_v0  ;;  %v272_v17 = vmul.f32 %v698_v8, %v870_v0 }
  0x30   : > { %808 = vst [vmem:[%s904_s24 + $0x58] sm:$0xff] %v761_v10   ;;  %v307_v18 = vadd.f32 %v879_v9, %v269_v11  ;;  %v308_v19 = vadd.f32 %v879_v9, %v270_v12  ;;  %v702_v20 = vunpack.c.h.bf16 %v797_v63  ;;  %v273_v21 = vmul.f32 %v701_v13, %v870_v0 }
  0x31   : > { %v338_v22 = vmax.f32 %v306_v14, 0.0  ;;  %v309_v23 = vadd.f32 %v879_v9, %v271_v16  ;;  %v310_v24 = vadd.f32 %v879_v9, %v272_v17 }
  0x32   : > { %v339_v25 = vmax.f32 %v307_v18, 0.0  ;;  %v340_v26 = vmax.f32 %v308_v19, 0.0  ;;  %v274_v27 = vmul.f32 %v702_v20, %v870_v0  ;;  %v311_v28 = vadd.f32 %v879_v9, %v273_v21 }
  0x33   : > { %v766_v29 = vpack.c.bf16 %v338_v22, %v337_v15  ;;  %v341_v30 = vmax.f32 %v309_v23, 0.0  ;;  %v342_v31 = vmax.f32 %v310_v24, 0.0 }
  0x34   : > { %v771_v32 = vpack.c.bf16 %v340_v26, %v339_v25  ;;  %v312_v33 = vadd.f32 %v879_v9, %v274_v27  ;;  %v343_v34 = vmax.f32 %v311_v28, 0.0 }
  0x35   : > { %809 = vst [vmem:[%s904_s24 + $0x60] sm:$0xff] %v766_v29   ;;  %v776_v35 = vpack.c.bf16 %v342_v31, %v341_v30 }
  0x36   : > { %810 = vst [vmem:[%s904_s24 + $0x68] sm:$0xff] %v771_v32   ;;  %v344_v36 = vmax.f32 %v312_v33, 0.0 }
  0x37   : > { %811 = vst [vmem:[%s904_s24 + $0x70] sm:$0xff] %v776_v35  }
  0x38   : > { %v781_v37 = vpack.c.bf16 %v344_v36, %v343_v34 }
  0x3a   : > { %812 = vst [vmem:[%s904_s24 + $0x78] sm:$0xff] %v781_v37  }
  0x3b PF: > { %s13_s12 = sadd.s32 1, %s827_s12  }
  0x3c   : > { %p10_p4 = scmp.ge.s32.totalorder %s13_s12, 4  }
  0x3e   :  { %12 = sbr.rel (!%p10_p4) target bundleno = 1 (0x1), region = 62 }

// kernel: _lambda_.8
= control target key start
LH: loop header
LB: loop body
LE: loop exit
PB: predicated region body
PF: predicated region fallthrough
CT: control target
= control target key end

     0   :  { %s2613_s21 = smov 0   ;;  %s2615_s22 = smov 0   ;;  %s2961_s0 = inlined_call_operand.vmem [shape: bf16[2,64,1152], index: 0, kind: input, shape index: {}]   ;;  %s2962_s1 = inlined_call_operand.vmem [shape: bf16[1152,128], index: 1, kind: input, shape index: {}]   ;;  %s2963_s2 = inlined_call_operand.vmem [shape: bf16[128,128], index: 2, kind: input, shape index: {}]   ;;  %s2964_s3 = inlined_call_operand.vmem [shape: bf16[2,64,128], index: 3, kind: output, shape index: {0}]   ;;  %s2965_s4 = inlined_call_operand.vmem [shape: f32[2,1,128], index: 4, kind: output, shape index: {1}]   ;;  %s2966_s5 = inlined_call_operand.vmem [shape: f32[2,1,128], index: 5, kind: output, shape index: {2}]   ;;  %s2967_s6 = inlined_call_operand.vmem [shape: bf16[2,64,128], index: 6, kind: output, shape index: {3}]  }
   0x1   :  { %s2617_s23 = smov 0  }
   0x2 LB: > { %s26_s24 = sadd.s32 1, %s2572_s22  ;;  %p1961_p0 = scmp.ge.s32.totalorder %s2576_s23, 1  ;;  %s2576_s23 = sphi %s2617_s23, %s17_s23   ;;  %s2572_s22 = sphi %s2615_s22, %s2969_s22   ;;  %s2568_s21 = sphi %s2613_s21, %s2968_s21  }
   0x3   : > { %p27_p1 = scmp.ge.s32.totalorder %s26_s24, 2  ;;  %p257_p2 = scmp.lt.s32.totalorder %s2576_s23, 3 }
   0x5   : > { %s2971_s24 = smov (%p27_p1, %s26_s24), 0  ;;  %p258_p3 = pnand %p1961_p0, %p257_p2 }
   0x6   : > { %v2422_v0 = vld [vmem:[%s2962_s1 + $0x40] sm:$0xff] (!%p258_p3)   ;;  %v2426_v4 = vld [vmem:[%s2962_s1 + $0x48] sm:$0xff] (!%p258_p3)   ;;  %v2430_v8 = vld [vmem:[%s2962_s1 + $0x50] sm:$0xff] (!%p258_p3)   ;;  %p318_p4 = scmp.lt.s32.totalorder (!%p258_p3), %s2568_s21, 1 }
   0x7   : > { %261 = sbr.rel (%p258_p3) target bundleno = 350 (0x15e), region = 32  ;;  %v2423_v1 = vld [vmem:[%s2962_s1 + $0xc0] sm:$0xff] (!%p258_p3)   ;;  %2165 = vmatprep.subr.bf16.mxu0 (!%p258_p3), %v2422_v0  ;;  %v2427_v5 = vld [vmem:[%s2962_s1 + $0xc8] sm:$0xff] (!%p258_p3)   ;;  %v2431_v9 = vld [vmem:[%s2962_s1 + $0xd0] sm:$0xff] (!%p258_p3)  }
   0x8   : > { %v2424_v2 = vld [vmem:[%s2962_s1] sm:$0xff] (!%p258_p3)   ;;  %2205 = vmatprep.subr.bf16.mxu1 (!%p258_p3), %v2423_v1  ;;  %v2428_v6 = vld [vmem:[%s2962_s1 + $0x8] sm:$0xff] (!%p258_p3)   ;;  %v2432_v10 = vld [vmem:[%s2962_s1 + $0x10] sm:$0xff] (!%p258_p3)  }
   0x9   : > { %v2425_v3 = vld [vmem:[%s2962_s1 + $0x80] sm:$0xff] (!%p258_p3)   ;;  %2166 = vmatpush3.bf16.msra.mxu0 (!%p258_p3), %v2424_v2  ;;  %v2429_v7 = vld [vmem:[%s2962_s1 + $0x88] sm:$0xff] (!%p258_p3)   ;;  %v2433_v11 = vld [vmem:[%s2962_s1 + $0x90] sm:$0xff] (!%p258_p3)  }
   0xa   : > { %2206 = vmatpush3.bf16.msra.mxu1 (!%p258_p3), %v2425_v3  ;;  %2167 = vmatprep.subr.bf16.mxu0 (!%p258_p3), %v2426_v4  ;;  %v2434_v12 = vld [vmem:[%s2962_s1 + $0x58] sm:$0xff] (!%p258_p3)   ;;  %v2438_v16 = vld [vmem:[%s2962_s1 + $0x60] sm:$0xff] (!%p258_p3)   ;;  %v2442_v20 = vld [vmem:[%s2962_s1 + $0x68] sm:$0xff] (!%p258_p3)  }
   0xb   : > { %2207 = vmatprep.subr.bf16.mxu1 (!%p258_p3), %v2427_v5  ;;  %v2435_v13 = vld [vmem:[%s2962_s1 + $0xd8] sm:$0xff] (!%p258_p3)   ;;  %v2439_v17 = vld [vmem:[%s2962_s1 + $0xe0] sm:$0xff] (!%p258_p3)   ;;  %v2443_v21 = vld [vmem:[%s2962_s1 + $0xe8] sm:$0xff] (!%p258_p3)  }
   0xc   : > { %v2436_v14 = vld [vmem:[%s2962_s1 + $0x18] sm:$0xff] (!%p258_p3)   ;;  %v2440_v18 = vld [vmem:[%s2962_s1 + $0x20] sm:$0xff] (!%p258_p3)   ;;  %v2444_v22 = vld [vmem:[%s2962_s1 + $0x28] sm:$0xff] (!%p258_p3)  }
   0xd   : > { %2168 = vmatpush3.bf16.msra.mxu0 (!%p258_p3), %v2428_v6  ;;  %v2437_v15 = vld [vmem:[%s2962_s1 + $0x98] sm:$0xff] (!%p258_p3)   ;;  %v2441_v19 = vld [vmem:[%s2962_s1 + $0xa0] sm:$0xff] (!%p258_p3)   ;;  %v2445_v23 = vld [vmem:[%s2962_s1 + $0xa8] sm:$0xff] (!%p258_p3)  }
   0xe   : > { %2208 = vmatpush3.bf16.msra.mxu1 %v2429_v7  ;;  %2169 = vmatprep.subr.bf16.mxu0 %v2430_v8  ;;  %s2973_s21 = smov (!%p318_p4, %s2568_s21), 1  ;;  %v2446_v24 = vld [vmem:[%s2962_s1 + $0x70] sm:$0xff]   ;;  %v2450_v28 = vld [vmem:[%s2962_s1 + $0x78] sm:$0xff]   ;;  %v2460_v36 = vld [vmem:[%s2962_s1 + $0x140] sm:$0xff]  }
   0xf   : > { %2209 = vmatprep.subr.bf16.mxu1 %v2431_v9  ;;  %v2447_v25 = vld [vmem:[%s2962_s1 + $0xf0] sm:$0xff]   ;;  %s2397_s13 = smul.u32 288, %s2973_s21  ;;  %v2451_v29 = vld [vmem:[%s2962_s1 + $0xf8] sm:$0xff]   ;;  %v2461_v37 = vld [vmem:[%s2962_s1 + $0x100] sm:$0xff]   ;;  %s344_s18 = scalar_lea.vmem %s2965_s4, %s2973_s21 }
  0x10   : > { %v2448_v26 = vld [vmem:[%s2962_s1 + $0x30] sm:$0xff]   ;;  %v2452_v30 = vld [vmem:[%s2962_s1 + $0x38] sm:$0xff]   ;;  %v2462_v38 = vld [vmem:[%s2962_s1 + $0x1c0] sm:$0xff]   ;;  %s350_s25 = scalar_lea.vmem %s2966_s5, %s2973_s21 }
  0x11   : > { %2170 = vmatpush3.bf16.msra.mxu0 %v2432_v10  ;;  %v2449_v27 = vld [vmem:[%s2962_s1 + $0xb0] sm:$0xff]   ;;  %s2731_s28 = scalar_lea.vmem %s2961_s0, %s2397_s13  ;;  %v2453_v31 = vld [vmem:[%s2962_s1 + $0xb8] sm:$0xff]   ;;  %v2463_v39 = vld [vmem:[%s2962_s1 + $0x180] sm:$0xff]  }
  0x12   : > { %2210 = vmatpush3.bf16.msra.mxu1 %v2433_v11  ;;  %2171 = vmatprep.subr.bf16.mxu0 %v2434_v12  ;;  %v2454_v32 = vld [vmem:[%s2731_s28] ss:$36 sps:$4 sm:$0xff]   ;;  %v2457_v34 = vld [vmem:[%s2731_s28 + $0x8] ss:$36 sps:$4 sm:$0xff]   ;;  %v2469_v44 = vld [vmem:[%s2731_s28 + $0x54] ss:$36 sps:$4 sm:$0xff]  }
  0x13   : > { %2211 = vmatprep.subr.bf16.mxu1 %v2435_v13  ;;  %v2456_v33 = vld [vmem:[%s2731_s28 + $0x4] ss:$36 sps:$4 sm:$0xff]   ;;  %v2459_v35 = vld [vmem:[%s2731_s28 + $0xc] ss:$36 sps:$4 sm:$0xff]   ;;  %v2478_v52 = vld [vmem:[%s2962_s1 + $0x158] sm:$0xff]  }
  0x14   : > { %1192 = vmatprep.mubr.bf16.mxu0 %v2456_v33  ;;  %1257 = vmatprep.mubr.bf16.mxu1 %v2459_v35  ;;  %v2464_v40 = vld [vmem:[%s2962_s1 + $0x148] sm:$0xff]   ;;  %v2473_v47 = vld [vmem:[%s2731_s28 + $0x50] ss:$36 sps:$4 sm:$0xff]   ;;  %v2479_v53 = vld [vmem:[%s2962_s1 + $0x118] sm:$0xff]  }
  0x15   : > { %2172 = vmatpush3.bf16.msra.mxu0 %v2436_v14  ;;  %v2465_v41 = vld [vmem:[%s2962_s1 + $0x108] sm:$0xff]   ;;  %v2474_v48 = vld [vmem:[%s2962_s1 + $0x150] sm:$0xff]   ;;  %v2480_v54 = vld [vmem:[%s2962_s1 + $0x1d8] sm:$0xff]  }
  0x16   : > { %2212 = vmatpush3.bf16.msra.mxu1 %v2437_v15  ;;  %2173 = vmatprep.subr.bf16.mxu0 %v2438_v16  ;;  %v2466_v42 = vld [vmem:[%s2962_s1 + $0x1c8] sm:$0xff]   ;;  %v2475_v49 = vld [vmem:[%s2962_s1 + $0x110] sm:$0xff]   ;;  %v2483_v56 = vld [vmem:[%s2731_s28 + $0x9c] ss:$36 sps:$4 sm:$0xff]  }
  0x17   : > { %2213 = vmatprep.subr.bf16.mxu1 %v2439_v17  ;;  %v2467_v43 = vld [vmem:[%s2731_s28 + $0x4c] ss:$36 sps:$4 sm:$0xff]   ;;  %v2481_v55 = vld [vmem:[%s2731_s28 + $0x94] ss:$36 sps:$4 sm:$0xff]   ;;  %v2488_v60 = vld [vmem:[%s2962_s1 + $0x160] sm:$0xff]  }
  0x18   : > { %v2471_v45 = vld [vmem:[%s2962_s1 + $0x188] sm:$0xff]   ;;  %v2476_v50 = vld [vmem:[%s2962_s1 + $0x1d0] sm:$0xff]   ;;  %v2485_v57 = vld [vmem:[%s2962_s1 + $0x198] sm:$0xff]  }
  0x19   : > { %2174 = vmatpush3.bf16.msra.mxu0 %v2440_v18  ;;  %v2472_v46 = vld [vmem:[%s2731_s28 + $0x48] ss:$36 sps:$4 sm:$0xff]   ;;  %v2477_v51 = vld [vmem:[%s2962_s1 + $0x190] sm:$0xff]   ;;  %v2487_v59 = vld [vmem:[%s2731_s28 + $0x98] ss:$36 sps:$4 sm:$0xff]  }
  0x1a   : > { %2214 = vmatpush3.bf16.msra.mxu1 %v2441_v19  ;;  %2175 = vmatprep.subr.bf16.mxu0 %v2442_v20  ;;  %v2486_v58 = vld [vmem:[%s2731_s28 + $0x90] ss:$36 sps:$4 sm:$0xff]   ;;  %v2489_v61 = vld [vmem:[%s2962_s1 + $0x120] sm:$0xff]   ;;  %v2492_v0 = vld [vmem:[%s2962_s1 + $0x168] sm:$0xff]  }
  0x1b   : > { %2215 = vmatprep.subr.bf16.mxu1 %v2443_v21  ;;  %v2490_v62 = vld [vmem:[%s2962_s1 + $0x1e0] sm:$0xff]   ;;  %v2493_v1 = vld [vmem:[%s2962_s1 + $0x128] sm:$0xff]   ;;  %v2500_v6 = vld [vmem:[%s2731_s28 + $0xd8] ss:$36 sps:$4 sm:$0xff]  }
  0x1c   : > { %v2491_v63 = vld [vmem:[%s2962_s1 + $0x1a0] sm:$0xff]   ;;  %v2494_v2 = vld [vmem:[%s2962_s1 + $0x1e8] sm:$0xff]   ;;  %v2502_v8 = vld [vmem:[%s2962_s1 + $0x170] sm:$0xff]  }
  0x1d   : > { %2176 = vmatpush3.bf16.msra.mxu0 %v2444_v22  ;;  %v2495_v3 = vld [vmem:[%s2731_s28 + $0xdc] ss:$36 sps:$4 sm:$0xff]   ;;  %v2497_v4 = vld [vmem:[%s2731_s28 + $0xe4] ss:$36 sps:$4 sm:$0xff]   ;;  %v2503_v9 = vld [vmem:[%s2962_s1 + $0x130] sm:$0xff]  }
  0x1e   : > { %2216 = vmatpush3.bf16.msra.mxu1 %v2445_v23  ;;  %2177 = vmatprep.subr.bf16.mxu0 %v2446_v24  ;;  %v2499_v5 = vld [vmem:[%s2962_s1 + $0x1a8] sm:$0xff]   ;;  %v2501_v7 = vld [vmem:[%s2731_s28 + $0xe0] ss:$36 sps:$4 sm:$0xff]   ;;  %v2504_v10 = vld [vmem:[%s2962_s1 + $0x1f0] sm:$0xff]  }
  0x1f   : > { %2217 = vmatprep.subr.bf16.mxu1 %v2447_v25  ;;  %v2505_v11 = vld [vmem:[%s2962_s1 + $0x1b0] sm:$0xff]   ;;  %v2506_v12 = vld [vmem:[%s2962_s1 + $0x178] sm:$0xff]   ;;  %v2513_v18 = vld [vmem:[%s2962_s1 + $0x200] sm:$0xff]  }
  0x20   : > { %v2507_v13 = vld [vmem:[%s2962_s1 + $0x138] sm:$0xff]   ;;  %v2849_v15 = vld [vmem:[%s2731_s28 + $0x10] ss:$36 sps:$4 sm:$0xff]   ;;  %v2517_v21 = vld [vmem:[%s2962_s1 + $0x208] sm:$0xff]  }
  0x21   : > { %2178 = vmatpush3.bf16.msra.mxu0 %v2448_v26  ;;  %v2508_v14 = vld [vmem:[%s2962_s1 + $0x1f8] sm:$0xff]   ;;  %v2521_v24 = vld [vmem:[%s2962_s1 + $0x210] sm:$0xff]   ;;  %v2522_v25 = vld [vmem:[%s2731_s28 + $0x64] ss:$36 sps:$4 sm:$0xff]  }
  0x22   : > { %2218 = vmatpush3.bf16.msra.mxu1 %v2449_v27  ;;  %2179 = vmatprep.subr.bf16.mxu0 %v2450_v28  ;;  %v2511_v16 = vld [vmem:[%s2731_s28 + $0x14] ss:$36 sps:$4 sm:$0xff]   ;;  %v2516_v20 = vld [vmem:[%s2731_s28 + $0x1c] ss:$36 sps:$4 sm:$0xff]   ;;  %v2526_v27 = vld [vmem:[%s2731_s28 + $0xa4] ss:$36 sps:$4 sm:$0xff]  }
  0x23   : > { %2219 = vmatprep.subr.bf16.mxu1 %v2451_v29  ;;  %v2512_v17 = vld [vmem:[%s2962_s1 + $0x1b8] sm:$0xff]   ;;  %v2524_v28 = vld [vmem:[%s2731_s28 + $0x60] ss:$36 sps:$4 sm:$0xff]   ;;  %v2535_v33 = vld [vmem:[%s2963_s2 + $0x8] sm:$0xff]  }
  0x24   : > { %v2514_v19 = vld [vmem:[%s2731_s28 + $0x18] ss:$36 sps:$4 sm:$0xff]   ;;  %v2529_v29 = vld [vmem:[%s2962_s1 + $0x220] sm:$0xff]   ;;  %v2534_v35 = vld [vmem:[%s2962_s1 + $0x228] sm:$0xff]  }
  0x25   : > { %2180 = vmatpush3.bf16.msra.mxu0 %v2452_v30  ;;  %v2518_v22 = vld [vmem:[%s2731_s28 + $0x5c] ss:$36 sps:$4 sm:$0xff]   ;;  %v2530_v30 = vld [vmem:[%s2731_s28 + $0xac] ss:$36 sps:$4 sm:$0xff]  }
  0x26   : > { %2220 = vmatpush3.bf16.msra.mxu1 %v2453_v31  ;;  %2245 = vmatprep.subr.bf16.mxu0 %v2460_v36  ;;  %v2866_v23 = vld [vmem:[%s2731_s28 + $0x58] ss:$36 sps:$4 sm:$0xff]   ;;  %v2533_v31 = vld [vmem:[%s2963_s2] sm:$0xff]   ;;  %v2532_v36 = vld [vmem:[%s2731_s28 + $0xa8] ss:$36 sps:$4 sm:$0xff]  }
  0x27   : > { %2285 = vmatprep.subr.bf16.mxu1 %v2462_v38  ;;  %v2525_v26 = vld [vmem:[%s2962_s1 + $0x218] sm:$0xff]   ;;  %v2538_v38 = vld [vmem:[%s2731_s28 + $0xe8] ss:$36 sps:$4 sm:$0xff]  }
  0x28   : > { %1193 = vmatmul.mubr.bf16.vlgmr.msra.gmra.mrb[0].mxu0 %v2454_v32  ;;  %v2528_v32 = vld [vmem:[%s2731_s28 + $0xa0] ss:$36 sps:$4 sm:$0xff]  }
  0x29   : > { %1258 = vmatmul.mubr.bf16.vlgmr.msra.gmra.mrb[0].mxu1 %v2457_v34  ;;  %2246 = vmatpush3.bf16.msra.mxu0 %v2461_v37  ;;  %v2536_v34 = vld [vmem:[%s2731_s28 + $0xec] ss:$36 sps:$4 sm:$0xff]   ;;  %v2540_v37 = vld [vmem:[%s2731_s28 + $0xf4] ss:$36 sps:$4 sm:$0xff]  }
  0x2a   : > { %2286 = vmatpush3.bf16.msra.mxu1 %v2463_v39  ;;  %2247 = vmatprep.subr.bf16.mxu0 %v2464_v40  ;;  %v2543_v39 = vld [vmem:[%s2963_s2 + $0x10] sm:$0xff]  }
  0x2b   : > { %2287 = vmatprep.subr.bf16.mxu1 %v2466_v42  ;;  %1200 = vmatprep.mubr.bf16.mxu0 %v2467_v43  ;;  %v2539_v40 = vld [vmem:[%s2962_s1 + $0x230] sm:$0xff]   ;;  %v2546_v42 = vld [vmem:[%s2731_s28 + $0x20] ss:$36 sps:$4 sm:$0xff]   ;;  %v2544_v43 = vld [vmem:[%s2962_s1 + $0x238] sm:$0xff]  }
  0x2c   : > { %1265 = vmatprep.mubr.bf16.mxu1 %v2469_v44  ;;  %v2548_v44 = vld [vmem:[%s2963_s2 + $0x20] sm:$0xff]  }
  0x2d   : > { %2248 = vmatpush3.bf16.msra.mxu0 %v2465_v41  ;;  %v2545_v41 = vld [vmem:[%s2963_s2 + $0x18] sm:$0xff]  }
  0x2e   : > { %2288 = vmatpush3.bf16.msra.mxu1 %v2471_v45  ;;  %2249 = vmatprep.subr.bf16.mxu0 %v2474_v48  ;;  %v2542_v45 = vld [vmem:[%s2731_s28 + $0xf0] ss:$36 sps:$4 sm:$0xff]  }
  0x2f   : > { %2289 = vmatprep.subr.bf16.mxu1 %v2476_v50  ;;  %v2550_v48 = vld [vmem:[%s2731_s28 + $0xb0] ss:$36 sps:$4 sm:$0xff]   ;;  %v2553_v50 = vld [vmem:[%s2963_s2 + $0x38] sm:$0xff]  }
  0x30   : > { %1201 = vmatmul.mubr.bf16.gmra.mrb[4].mxu0 %v2472_v46  ;;  %v2549_v46 = vld [vmem:[%s2963_s2 + $0x28] sm:$0xff]  }
  0x31   : > { %1266 = vmatmul.mubr.bf16.gmra.mrb[4].mxu1 %v2473_v47  ;;  %2250 = vmatpush3.bf16.msra.mxu0 %v2475_v49  ;;  %v2547_v47 = vld [vmem:[%s2731_s28 + $0x68] ss:$36 sps:$4 sm:$0xff]   ;;  %v2552_v49 = vld [vmem:[%s2963_s2 + $0x30] sm:$0xff]  }
  0x32   : > { %2290 = vmatpush3.bf16.msra.mxu1 %v2477_v51  ;;  %2251 = vmatprep.subr.bf16.mxu0 %v2478_v52  ;;  %v2551_v51 = vld [vmem:[%s2731_s28 + $0xf8] ss:$36 sps:$4 sm:$0xff]   ;;  %s2101_s28 = sshll.u32 %s2973_s21, 5 }
  0x33   : > { %2291 = vmatprep.subr.bf16.mxu1 %v2480_v54  ;;  %1208 = vmatprep.mubr.bf16.mxu0 %v2481_v55  ;;  %s2933_s12 = scalar_lea.vmem %s2964_s3, %s2101_s28  ;;  %s358_s15 = scalar_lea.vmem %s2967_s6, %s2101_s28 }
  0x34   : > { %1273 = vmatprep.mubr.bf16.mxu1 %v2483_v56 }
  0x35   : > { %2252 = vmatpush3.bf16.msra.mxu0 %v2479_v53 }
  0x36   : > { %2292 = vmatpush3.bf16.msra.mxu1 %v2485_v57  ;;  %2253 = vmatprep.subr.bf16.mxu0 %v2488_v60 }
  0x37   : > { %2293 = vmatprep.subr.bf16.mxu1 %v2490_v62 }
  0x38   : > { %1209 = vmatmul.mubr.bf16.gmra.mrb[8].mxu0 %v2486_v58 }
  0x39   : > { %1274 = vmatmul.mubr.bf16.gmra.mrb[8].mxu1 %v2487_v59  ;;  %2254 = vmatpush3.bf16.msra.mxu0 %v2489_v61 }
  0x3a   : > { %2294 = vmatpush3.bf16.msra.mxu1 %v2491_v63  ;;  %2255 = vmatprep.subr.bf16.mxu0 %v2492_v0 }
  0x3b   : > { %2295 = vmatprep.subr.bf16.mxu1 %v2494_v2  ;;  %1216 = vmatprep.mubr.bf16.mxu0 %v2495_v3 }
  0x3c   : > { %1281 = vmatprep.mubr.bf16.mxu1 %v2497_v4 }
  0x3d   : > { %2256 = vmatpush3.bf16.msra.mxu0 %v2493_v1 }
  0x3e   : > { %2296 = vmatpush3.bf16.msra.mxu1 %v2499_v5  ;;  %2257 = vmatprep.subr.bf16.mxu0 %v2502_v8 }
  0x3f   : > { %2297 = vmatprep.subr.bf16.mxu1 %v2504_v10 }
  0x40   : > { %1217 = vmatmul.mubr.bf16.gmra.mrb[12].mxu0 %v2500_v6 }
  0x41   : > { %1282 = vmatmul.mubr.bf16.gmra.mrb[12].mxu1 %v2501_v7  ;;  %2258 = vmatpush3.bf16.msra.mxu0 %v2503_v9 }
  0x42   : > { %2298 = vmatpush3.bf16.msra.mxu1 %v2505_v11  ;;  %2259 = vmatprep.subr.bf16.mxu0 %v2506_v12 }
  0x43   : > { %2299 = vmatprep.subr.bf16.mxu1 %v2508_v14  ;;  %1322 = vmatprep.mubr.bf16.mxu0 %v2511_v16 }
  0x44   : > { %1387 = vmatprep.mubr.bf16.mxu1 %v2516_v20 }
  0x45   : > { %2260 = vmatpush3.bf16.msra.mxu0 %v2507_v13 }
  0x46   : > { %2300 = vmatpush3.bf16.msra.mxu1 %v2512_v17  ;;  %2349 = vmatprep.subr.bf16.mxu0 %v2513_v18 }
  0x47   : > { %2373 = vmatprep.subr.bf16.mxu1 %v2533_v31 }
  0x48   : > { %1323 = vmatmul.mubr.bf16.vlgmr.msra.gmra.mrb[16].mxu0 %v2849_v15 }
  0x49   : > { %2350 = vmatpush3.bf16.msra.mxu0 %v2513_v18  ;;  %1388 = vmatmul.mubr.bf16.vlgmr.msra.gmra.mrb[16].mxu1 %v2514_v19 }
  0x4a   : > { %2351 = vmatprep.subr.bf16.mxu0 %v2517_v21  ;;  %1330 = vmatprep.mubr.bf16.mxu0 %v2518_v22 }
  0x4b   : > { %1395 = vmatprep.mubr.bf16.mxu1 %v2522_v25  ;;  %2374 = vmatpush3.bf16.msra.mxu1 %v2533_v31 }
  0x4c   : > { %2375 = vmatprep.subr.bf16.mxu1 %v2535_v33 }
  0x4d   : > { %2352 = vmatpush3.bf16.msra.mxu0 %v2517_v21 }
  0x4e   : > { %2353 = vmatprep.subr.bf16.mxu0 %v2521_v24 }
  0x4f   : > { %2376 = vmatpush3.bf16.msra.mxu1 %v2535_v33 }
  0x50   : > { %1331 = vmatmul.mubr.bf16.gmra.mrb[20].mxu0 %v2866_v23  ;;  %2377 = vmatprep.subr.bf16.mxu1 %v2543_v39 }
  0x51   : > { %1338 = vmatprep.mubr.bf16.mxu0 %v2526_v27  ;;  %2354 = vmatpush3.bf16.msra.mxu0 %v2521_v24 }
  0x52   : > { %2355 = vmatprep.subr.bf16.mxu0 %v2525_v26  ;;  %1396 = vmatmul.mubr.bf16.gmra.mrb[20].mxu1 %v2524_v28 }
  0x53   : > { %1403 = vmatprep.mubr.bf16.mxu1 %v2530_v30  ;;  %2378 = vmatpush3.bf16.msra.mxu1 %v2543_v39 }
  0x54   : > { %2379 = vmatprep.subr.bf16.mxu1 %v2545_v41 }
  0x55   : > { %2356 = vmatpush3.bf16.msra.mxu0 %v2525_v26 }
  0x56   : > { %2357 = vmatprep.subr.bf16.mxu0 %v2529_v29 }
  0x57   : > { %2380 = vmatpush3.bf16.msra.mxu1 %v2545_v41 }
  0x58   : > { %1339 = vmatmul.mubr.bf16.gmra.mrb[24].mxu0 %v2528_v32  ;;  %2381 = vmatprep.subr.bf16.mxu1 %v2548_v44 }
  0x59   : > { %1346 = vmatprep.mubr.bf16.mxu0 %v2536_v34  ;;  %2358 = vmatpush3.bf16.msra.mxu0 %v2529_v29 }
  0x5a   : > { %2359 = vmatprep.subr.bf16.mxu0 %v2534_v35  ;;  %1404 = vmatmul.mubr.bf16.gmra.mrb[24].mxu1 %v2532_v36 }
  0x5b   : > { %1411 = vmatprep.mubr.bf16.mxu1 %v2540_v37  ;;  %2382 = vmatpush3.bf16.msra.mxu1 %v2548_v44 }
  0x5c   : > { %2383 = vmatprep.subr.bf16.mxu1 %v2549_v46 }
  0x5d   : > { %2360 = vmatpush3.bf16.msra.mxu0 %v2534_v35 }
  0x5e   : > { %2361 = vmatprep.subr.bf16.mxu0 %v2539_v40 }
  0x5f   : > { %2384 = vmatpush3.bf16.msra.mxu1 %v2549_v46 }
  0x60   : > { %1347 = vmatmul.mubr.bf16.gmra.mrb[28].mxu0 %v2538_v38  ;;  %2385 = vmatprep.subr.bf16.mxu1 %v2552_v49 }
  0x61   : > { %2365 = vmatprep.mubr.bf16.mxu0 %v2546_v42  ;;  %2362 = vmatpush3.bf16.msra.mxu0 %v2539_v40 }
  0x62   : > { %2363 = vmatprep.subr.bf16.mxu0 %v2544_v43  ;;  %1412 = vmatmul.mubr.bf16.gmra.mrb[28].mxu1 %v2542_v45 }
  0x63   : > { %2389 = vmatprep.mubr.bf16.mxu1 %v2849_v15  ;;  %2386 = vmatpush3.bf16.msra.mxu1 %v2552_v49 }
  0x64   : > { %2387 = vmatprep.subr.bf16.mxu1 %v2553_v50 }
  0x65   : > { %2364 = vmatpush3.bf16.msra.mxu0 %v2544_v43 }
  0x67   : > { %2388 = vmatpush3.bf16.msra.mxu1 %v2553_v50 }
  0x68   : > { %2366 = vmatmul.mubr.bf16.vlgmr.msra.gmra.mrb[32].mxu0 %v2547_v47 }
  0x69   : > { %2369 = vmatprep.mubr.bf16.mxu0 %v2550_v48 }
  0x6a   : > { %2390 = vmatmul.mubr.bf16.vlgmr.msra.gmra.mrb[32].mxu1 %v2866_v23 }
  0x6b   : > { %2393 = vmatprep.mubr.bf16.mxu1 %v2528_v32 }
  0x70   : > { %2370 = vmatmul.mubr.bf16.gmra.mrb[36].mxu0 %v2551_v51 }
  0x72   : > { %2394 = vmatmul.mubr.bf16.gmra.mrb[36].mxu1 %v2538_v38 }
  0xfb   : > { %v2181_v52 = vpop.f32.mrb[0].mxu0 }
  0xfc   : > { %v2221_v53 = vpop.f32.mrb[0].mxu1  ;;  %v2182_v54 = vpop.f32.mrb[1].mxu0 }
  0xfd   : > { %v2183_v55 = vadd.f32 %v2182_v54, %v2181_v52  ;;  %v2222_v56 = vpop.f32.mrb[1].mxu1  ;;  %v2184_v57 = vpop.f32.mrb[2].mxu0 }
  0xfe   : > { %v2223_v58 = vadd.f32 %v2222_v56, %v2221_v53  ;;  %v2224_v59 = vpop.f32.mrb[2].mxu1  ;;  %v2185_v60 = vpop.f32.mrb[3].mxu0 }
  0xff   : > { %v2186_v61 = vadd.f32 %v2185_v60, %v2184_v57  ;;  %v2225_v62 = vpop.f32.mrb[3].mxu1 }
 0x100   : > { %v1260_v63 = vadd.f32 %v2223_v58, %v2183_v55  ;;  %v2226_v0 = vadd.f32 %v2225_v62, %v2224_v59 }
 0x102   : > { %v1263_v1 = vadd.f32 %v2226_v0, %v2186_v61 }
 0x103   : > { %v2187_v2 = vpop.f32.mrb[4].mxu0 }
 0x104   : > { %v2227_v3 = vpop.f32.mrb[4].mxu1  ;;  %v2188_v4 = vpop.f32.mrb[5].mxu0 }
 0x105   : > { %v2189_v5 = vadd.f32 %v2188_v4, %v2187_v2  ;;  %v2228_v6 = vpop.f32.mrb[5].mxu1  ;;  %v2190_v7 = vpop.f32.mrb[6].mxu0 }
 0x106   : > { %v2229_v8 = vadd.f32 %v2228_v6, %v2227_v3  ;;  %v2230_v9 = vpop.f32.mrb[6].mxu1  ;;  %v2191_v10 = vpop.f32.mrb[7].mxu0 }
 0x107   : > { %v2192_v11 = vadd.f32 %v2191_v10, %v2190_v7  ;;  %v2231_v12 = vpop.f32.mrb[7].mxu1 }
 0x108   : > { %v1268_v13 = vadd.f32 %v2229_v8, %v2189_v5  ;;  %v2232_v14 = vadd.f32 %v2231_v12, %v2230_v9 }
 0x10a   : > { %v1271_v15 = vadd.f32 %v2232_v14, %v2192_v11 }
 0x10b   : > { %v2193_v16 = vpop.f32.mrb[8].mxu0 }
 0x10c   : > { %v2233_v17 = vpop.f32.mrb[8].mxu1  ;;  %v2194_v18 = vpop.f32.mrb[9].mxu0 }
 0x10d   : > { %v2195_v19 = vadd.f32 %v2194_v18, %v2193_v16  ;;  %v2234_v20 = vpop.f32.mrb[9].mxu1  ;;  %v2196_v21 = vpop.f32.mrb[10].mxu0 }
 0x10e   : > { %v2235_v22 = vadd.f32 %v2234_v20, %v2233_v17  ;;  %v2236_v23 = vpop.f32.mrb[10].mxu1  ;;  %v2197_v24 = vpop.f32.mrb[11].mxu0 }
 0x10f   : > { %v2198_v25 = vadd.f32 %v2197_v24, %v2196_v21  ;;  %v2237_v26 = vpop.f32.mrb[11].mxu1 }
 0x110   : > { %v1276_v27 = vadd.f32 %v2235_v22, %v2195_v19  ;;  %v2238_v28 = vadd.f32 %v2237_v26, %v2236_v23 }
 0x112   : > { %v1279_v29 = vadd.f32 %v2238_v28, %v2198_v25 }
 0x113   : > { %v2199_v30 = vpop.f32.mrb[12].mxu0 }
 0x114   : > { %v2239_v31 = vpop.f32.mrb[12].mxu1  ;;  %v2200_v32 = vpop.f32.mrb[13].mxu0 }
 0x115   : > { %v2240_v33 = vpop.f32.mrb[13].mxu1  ;;  %v2201_v34 = vadd.f32 %v2200_v32, %v2199_v30  ;;  %v2202_v36 = vpop.f32.mrb[14].mxu0 }
 0x116   : > { %v2241_v35 = vadd.f32 %v2240_v33, %v2239_v31  ;;  %v2242_v37 = vpop.f32.mrb[14].mxu1  ;;  %v2203_v38 = vpop.f32.mrb[15].mxu0 }
 0x117   : > { %v2243_v39 = vpop.f32.mrb[15].mxu1  ;;  %v2204_v41 = vadd.f32 %v2203_v38, %v2202_v36 }
 0x118   : > { %v1284_v40 = vadd.f32 %v2241_v35, %v2201_v34  ;;  %v2244_v42 = vadd.f32 %v2243_v39, %v2242_v37 }
 0x11a   : > { %v1287_v43 = vadd.f32 %v2244_v42, %v2204_v41 }
 0x11b   : > { %v2261_v44 = vpop.f32.mrb[16].mxu0 }
 0x11c   : > { %v2262_v45 = vpop.f32.mrb[17].mxu0  ;;  %v2301_v50 = vpop.f32.mrb[16].mxu1 }
 0x11d   : > { %v2263_v46 = vadd.f32 %v2262_v45, %v2261_v44  ;;  %v2264_v47 = vpop.f32.mrb[18].mxu0  ;;  %v2302_v52 = vpop.f32.mrb[17].mxu1 }
 0x11e   : > { %v2265_v48 = vpop.f32.mrb[19].mxu0  ;;  %v2303_v54 = vadd.f32 %v2302_v52, %v2301_v50  ;;  %v2304_v55 = vpop.f32.mrb[18].mxu1 }
 0x11f   : > { %v1325_v49 = vadd.f32 %v2263_v46, %v1260_v63  ;;  %v2266_v51 = vadd.f32 %v2265_v48, %v2264_v47  ;;  %v2305_v56 = vpop.f32.mrb[19].mxu1 }
 0x120   : > { %v2306_v57 = vadd.f32 %v2305_v56, %v2304_v55 }
 0x121   : > { %v1328_v53 = vadd.f32 %v2266_v51, %v1263_v1  ;;  %v1390_v59 = vadd.f32 %v2303_v54, %v1325_v49 }
 0x123   : > { %v2267_v58 = vpop.f32.mrb[20].mxu0  ;;  %v1393_v0 = vadd.f32 %v2306_v57, %v1328_v53 }
 0x124   : > { %v2268_v60 = vpop.f32.mrb[21].mxu0 }
 0x125   : > { %v2269_v61 = vadd.f32 %v2268_v60, %v2267_v58  ;;  %v2270_v62 = vpop.f32.mrb[22].mxu0  ;;  %v2307_v4 = vpop.f32.mrb[20].mxu1 }
 0x126   : > { %v2271_v2 = vpop.f32.mrb[23].mxu0  ;;  %v2308_v6 = vpop.f32.mrb[21].mxu1 }
 0x127   : > { %v1333_v3 = vadd.f32 %v2269_v61, %v1268_v13  ;;  %v2272_v5 = vadd.f32 %v2271_v2, %v2270_v62  ;;  %v2309_v7 = vadd.f32 %v2308_v6, %v2307_v4  ;;  %v2310_v8 = vpop.f32.mrb[22].mxu1 }
 0x128   : > { %v2311_v9 = vpop.f32.mrb[23].mxu1 }
 0x129   : > { %v1336_v63 = vadd.f32 %v2272_v5, %v1271_v15  ;;  %v2312_v1 = vadd.f32 %v2311_v9, %v2310_v8  ;;  %v1398_v11 = vadd.f32 %v2309_v7, %v1333_v3 }
 0x12b   : > { %v2273_v10 = vpop.f32.mrb[24].mxu0  ;;  %v1401_v17 = vadd.f32 %v2312_v1, %v1336_v63 }
 0x12c   : > { %v2274_v12 = vpop.f32.mrb[25].mxu0 }
 0x12d   : > { %v2275_v14 = vadd.f32 %v2274_v12, %v2273_v10  ;;  %v2276_v16 = vpop.f32.mrb[26].mxu0  ;;  %v2313_v20 = vpop.f32.mrb[24].mxu1 }
 0x12e   : > { %v2277_v18 = vpop.f32.mrb[27].mxu0  ;;  %v2314_v22 = vpop.f32.mrb[25].mxu1 }
 0x12f   : > { %v1341_v19 = vadd.f32 %v2275_v14, %v1276_v27  ;;  %v2278_v21 = vadd.f32 %v2277_v18, %v2276_v16  ;;  %v2315_v23 = vadd.f32 %v2314_v22, %v2313_v20  ;;  %v2316_v24 = vpop.f32.mrb[26].mxu1 }
 0x130   : > { %v2317_v25 = vpop.f32.mrb[27].mxu1 }
 0x131   : > { %v1344_v13 = vadd.f32 %v2278_v21, %v1279_v29  ;;  %v2318_v15 = vadd.f32 %v2317_v25, %v2316_v24  ;;  %v1406_v28 = vadd.f32 %v2315_v23, %v1341_v19 }
 0x133   : > { %v2279_v26 = vpop.f32.mrb[28].mxu0  ;;  %v1409_v33 = vadd.f32 %v2318_v15, %v1344_v13 }
 0x134   : > { %v2280_v30 = vpop.f32.mrb[29].mxu0 }
 0x135   : > { %v2281_v31 = vadd.f32 %v2280_v30, %v2279_v26  ;;  %v2282_v32 = vpop.f32.mrb[30].mxu0  ;;  %v2319_v36 = vpop.f32.mrb[28].mxu1 }
 0x136   : > { %v2283_v34 = vpop.f32.mrb[31].mxu0  ;;  %v2320_v27 = vpop.f32.mrb[29].mxu1 }
 0x137   : > { %v1349_v35 = vadd.f32 %v2281_v31, %v1284_v40  ;;  %v2284_v37 = vadd.f32 %v2283_v34, %v2282_v32  ;;  %v2321_v39 = vadd.f32 %v2320_v27, %v2319_v36  ;;  %v2322_v29 = vpop.f32.mrb[30].mxu1 }
 0x138   : > { %v2323_v41 = vpop.f32.mrb[31].mxu1 }
 0x139   : > { %v1352_v38 = vadd.f32 %v2284_v37, %v1287_v43  ;;  %v2324_v42 = vadd.f32 %v2323_v41, %v2322_v29  ;;  %v1414_v44 = vadd.f32 %v2321_v39, %v1349_v35 }
 0x13b   : > { %v2367_v45 = vpop.f32.mrb[32].mxu0  ;;  %v1417_v48 = vadd.f32 %v2324_v42, %v1352_v38 }
 0x13c   : > { %v1463_v46 = vadd.f32 %v2367_v45, %v1398_v11  ;;  %v1454_v47 = vpop.f32.mrb[33].mxu0 }
 0x13d   : > { %v1455_v49 = vadd.f32 %v1454_v47, %v1390_v59  ;;  %v2368_v50 = vpop.f32.mrb[34].mxu0  ;;  %v2391_v10 = vpop.f32.mrb[32].mxu1 }
 0x13e   : > { %v1466_v51 = vadd.f32 %v2368_v50, %v1401_v17  ;;  %v1457_v52 = vpop.f32.mrb[35].mxu0  ;;  %v1541_v57 = vmul.f32 %v1463_v46, %v1463_v46  ;;  %v1659_v12 = vpop.f32.mrb[33].mxu1 }
 0x13f   : > { %v1458_v40 = vadd.f32 %v1457_v52, %v1393_v0  ;;  %v1539_v53 = vmul.f32 %v1455_v49, %v1455_v49  ;;  %v2392_v19 = vpop.f32.mrb[34].mxu1 }
 0x140   : > { %v2127_v43 = vpack.c.bf16 %v1466_v51, %v1463_v46  ;;  %v1542_v2 = vmul.f32 %v1466_v51, %v1466_v51  ;;  %v2147_v20 = vpack.c.bf16 %v2392_v19, %v2391_v10  ;;  %v1662_v21 = vpop.f32.mrb[35].mxu1 }
 0x141   : > { %v2122_v54 = vpack.c.bf16 %v1458_v40, %v1455_v49  ;;  %v1525_v55 = vadd.f32 %v1458_v40, %v1455_v49  ;;  %v1540_v56 = vmul.f32 %v1458_v40, %v1458_v40  ;;  %v2142_v24 = vpack.c.bf16 %v1662_v21, %v1659_v12 }
 0x142   : > { %2159 = vst [vmem:[%s2933_s12 + $0x8] sm:$0xff] %v2127_v43   ;;  %2162 = vst [vmem:[%s358_s15 + $0x8] sm:$0xff] %v2147_v20  }
 0x143   : > { %2123 = vst [vmem:[%s2933_s12] sm:$0xff] %v2122_v54   ;;  %v1526_v58 = vadd.f32 %v1525_v55, %v1463_v46  ;;  %v1547_v59 = vadd.f32 %v1540_v56, %v1539_v53  ;;  %v2371_v60 = vpop.f32.mrb[36].mxu0  ;;  %2143 = vst [vmem:[%s358_s15] sm:$0xff] %v2142_v24  }
 0x144   : > { %v1479_v61 = vadd.f32 %v2371_v60, %v1414_v44  ;;  %v1470_v62 = vpop.f32.mrb[37].mxu0 }
 0x145   : > { %v1548_v3 = vadd.f32 %v1547_v59, %v1541_v57  ;;  %v1471_v4 = vadd.f32 %v1470_v62, %v1406_v28  ;;  %v1527_v5 = vadd.f32 %v1526_v58, %v1466_v51  ;;  %v2372_v6 = vpop.f32.mrb[38].mxu0  ;;  %v2395_v31 = vpop.f32.mrb[36].mxu1 }
 0x146   : > { %v1482_v0 = vadd.f32 %v2372_v6, %v1417_v48  ;;  %v1473_v63 = vpop.f32.mrb[39].mxu0  ;;  %v1545_v22 = vmul.f32 %v1479_v61, %v1479_v61  ;;  %v1675_v32 = vpop.f32.mrb[37].mxu1 }
 0x147   : > { %v1528_v7 = vadd.f32 %v1527_v5, %v1471_v4  ;;  %v1543_v8 = vmul.f32 %v1471_v4, %v1471_v4  ;;  %v1549_v9 = vadd.f32 %v1548_v3, %v1542_v2  ;;  %v1474_v1 = vadd.f32 %v1473_v63, %v1409_v33  ;;  %v2396_v35 = vpop.f32.mrb[38].mxu1 }
 0x148   : > { %v2137_v11 = vpack.c.bf16 %v1482_v0, %v1479_v61  ;;  %v1546_v25 = vmul.f32 %v1482_v0, %v1482_v0  ;;  %v2157_v36 = vpack.c.bf16 %v2396_v35, %v2395_v31  ;;  %v1678_v37 = vpop.f32.mrb[39].mxu1 }
 0x149   : > { %v1550_v14 = vadd.f32 %v1549_v9, %v1543_v8  ;;  %v2132_v16 = vpack.c.bf16 %v1474_v1, %v1471_v4  ;;  %v1529_v17 = vadd.f32 %v1528_v7, %v1474_v1  ;;  %v1544_v18 = vmul.f32 %v1474_v1, %v1474_v1 }
 0x14a   : > { %2161 = vst [vmem:[%s2933_s12 + $0x18] sm:$0xff] %v2137_v11   ;;  %v2152_v39 = vpack.c.bf16 %v1678_v37, %v1675_v32  ;;  %2164 = vst [vmem:[%s358_s15 + $0x18] sm:$0xff] %v2157_v36  }
 0x14b   : > { %2160 = vst [vmem:[%s2933_s12 + $0x10] sm:$0xff] %v2132_v16   ;;  %v1530_v13 = vadd.f32 %v1529_v17, %v1479_v61  ;;  %v1551_v23 = vadd.f32 %v1550_v14, %v1544_v18 }
 0x14c   : > { %2163 = vst [vmem:[%s358_s15 + $0x10] sm:$0xff] %v2152_v39  }
 0x14d   : > { %v1531_v15 = vadd.f32 %v1530_v13, %v1482_v0  ;;  %v1552_v26 = vadd.f32 %v1551_v23, %v1545_v22 }
 0x14f   : > { %v1532_v28 = vrot.slane %v1531_v15, 4  ;;  %v1553_v30 = vadd.f32 %v1552_v26, %v1546_v25 }
 0x151   : > { %v1533_v33 = vadd.f32 %v1532_v28, %v1531_v15  ;;  %v1554_v34 = vrot.slane %v1553_v30, 4 }
 0x153   : > { %v1534_v27 = vrot.slane %v1533_v33, 2  ;;  %v1555_v38 = vadd.f32 %v1554_v34, %v1553_v30 }
 0x155   : > { %v1535_v29 = vadd.f32 %v1534_v27, %v1533_v33  ;;  %v1556_v41 = vrot.slane %v1555_v38, 2 }
 0x157   : > { %v1536_v42 = vrot.slane %v1535_v29, 1  ;;  %v1557_v44 = vadd.f32 %v1556_v41, %v1555_v38 }
 0x159   : > { %v1537_v45 = vadd.f32 %v1536_v42, %v1535_v29  ;;  %v1558_v46 = vrot.slane %v1557_v44, 1 }
 0x15b   : > { %1538 = vst [vmem:[%s344_s18] sm:$0x1] %v1537_v45  ;;  %v1559_v47 = vadd.f32 %v1558_v46, %v1557_v44 }
 0x15d   : > { %1560 = vst [vmem:[%s350_s25] sm:$0x1] %v1559_v47 }
 0x15e PF: > { %s17_s23 = sadd.s32 1, %s2576_s23   ;;  %s2968_s21 = smov %s2572_s22 }
 0x15f   : > { %p14_p5 = scmp.ge.s32.totalorder %s17_s23, 4   ;;  %s2969_s22 = smov %s2971_s24 }
 0x161   :  { %16 = sbr.rel (!%p14_p5) target bundleno = 2 (0x2), region = 104 }

// kernel: _lambda_.11
= control target key start
LH: loop header
LB: loop body
LE: loop exit
PB: predicated region body
PF: predicated region fallthrough
CT: control target
= control target key end

     0   :  { %13 = vsyncpa [#allocation4], 0  ;;  %s3573_s0 = inlined_call_operand.vmem [shape: bf16[2,8,8,128], index: 0, kind: input, shape index: {}]   ;;  %s3574_s1 = inlined_call_operand.vmem [shape: f32[1,128], index: 1, kind: input, shape index: {}]   ;;  %s3575_s2 = inlined_call_operand.vmem [shape: f32[1,128], index: 2, kind: input, shape index: {}]   ;;  %s3576_s3 = inlined_call_operand.vmem [shape: bf16[9,128,128], index: 3, kind: input, shape index: {}]   ;;  %s3577_s4 = inlined_call_operand.vmem [shape: bf16[2,8,8,128], index: 4, kind: input, shape index: {}]   ;;  %s3578_s5 = inlined_call_operand.vmem [shape: bf16[2,8,8,128], index: 5, kind: output, shape index: {0}]   ;;  %s3579_s6 = inlined_call_operand.hbm [shape: f32[2,1,128], index: 6, kind: output, shape index: {1}]   ;;  %s3580_s7 = inlined_call_operand.hbm [shape: f32[2,1,128], index: 7, kind: output, shape index: {2}]  }
   0x1   :  { %15 = vsyncpa [#allocation4 + $0x1], 0 }
   0x2   :  { %16 = vsyncpa [#allocation6], 0 }
   0x3   :  { %18 = vsyncpa [#allocation6 + $0x1], 0  ;;  %s3043_s24 = smov 0   ;;  %s3045_s25 = smov 0  }
   0x4   :  { %s3047_s26 = smov 0   ;;  %s3049_s27 = smov 0  }
   0x5   :  { %s3051_s28 = smov 0   ;;  %s3053_s29 = smov 0  }
   0x6 LB: > { %s2069_s30 = sadd.s32 4294967295, %s2998_s29   ;;  %s2070_s8 = sadd.s32 4294967294, %s2998_s29   ;;  %s2998_s29 = sphi %s3053_s29, %s24_s29   ;;  %s2994_s28 = sphi %s3051_s28, %s3589_s28   ;;  %s2990_s27 = sphi %s3049_s27, %s3588_s27   ;;  %s2986_s26 = sphi %s3047_s26, %s3587_s26   ;;  %s2982_s25 = sphi %s3045_s25, %s3586_s25   ;;  %s2978_s24 = sphi %s3043_s24, %s3585_s24  }
   0x7   : > { %s33_s9 = sadd.s32 1, %s2994_s28  ;;  %s195_s10 = sadd.s32 1, %s2986_s26 }
   0x8   : > { %p34_p0 = scmp.ge.s32.totalorder %s33_s9, 2  ;;  %p205_p1 = scmp.ne.s32.totalorder %s2986_s26, %s2982_s25 }
   0x9   : > { %p206_p2 = scmp.eq.s32.totalorder %s2069_s30, 1  ;;  %p211_p3 = scmp.ne.s32.totalorder %s2982_s25, %s2978_s24 }
   0xa   : > { %s3591_s9 = smov (%p34_p0, %s33_s9), 0  ;;  %p212_p5 = scmp.eq.s32.totalorder %s2070_s8, 1 }
   0xb   : > { %p3083_p4 = por %p206_p2, %p205_p1  ;;  %s190_s12 = ssub.s32 %s2994_s28, %s3591_s9 }
   0xc   : > { %p2074_p6 = scmp.ge.s32.totalorder %s2998_s29, 1  ;;  %p193_p7 = scmp.eq.s32.totalorder %s190_s12, 0 }
   0xd   : > { %p3090_p8 = por %p212_p5, %p211_p3  ;;  %p290_p9 = scmp.lt.s32.totalorder %s2998_s29, 3 }
   0xe   : > { %s3096_s14 = scalar_select %p193_p7, %s2986_s26, %s195_s10  }
   0xf   : > { %p291_p10 = pnand %p2074_p6, %p290_p9 }
  0x10   : > { %v2816_v0 = vld [vmem:[%s3576_s3 + $0x40] sm:$0xff] (!%p291_p10)   ;;  %v2818_v2 = vld [vmem:[%s3576_s3 + $0x48] sm:$0xff] (!%p291_p10)   ;;  %p345_p11 = scmp.lt.s32.totalorder (!%p291_p10), %s2990_s27, 1  ;;  %v3000_v3 = vmov (!%p291_p10), 0.0   ;;  %v2820_v5 = vld [vmem:[%s3576_s3 + $0x50] sm:$0xff] (!%p291_p10)   ;;  %s2283_s17 = sshll.u32 (!%p291_p10), %s2990_s27, 4 }
  0x11   : > { %294 = sbr.rel (%p291_p10) target bundleno = 460 (0x1cc), region = 40  ;;  %v2817_v1 = vld [vmem:[%s3576_s3 + $0x100] sm:$0xff] (!%p291_p10)   ;;  %2459 = vmatprep.subr.bf16.mxu1 (!%p291_p10), %v2816_v0  ;;  %425 = vst [vmem:[#allocation2] sm:$0xff] (!%p291_p10), %v3000_v3  ;;  %426 = vst [vmem:[#allocation2 + $0x8] sm:$0x3] (!%p291_p10), %v3000_v3  ;;  %v2819_v4 = vld [vmem:[%s3576_s3 + $0x108] sm:$0xff] (!%p291_p10)   ;;  %s3494_s8 = scalar_lea.hbm (!%p291_p10), %s3579_s6, %s2283_s17 }
  0x12   : > { %427 = vst [vmem:[#allocation2 + $0x10] sm:$0xff] (!%p291_p10), %v3000_v3  ;;  %428 = vst [vmem:[#allocation2 + $0x18] sm:$0x3] (!%p291_p10), %v3000_v3  ;;  %2555 = vmatprep.subr.bf16.mxu0 (!%p291_p10), %v2817_v1  ;;  %2460 = vmatpush3.bf16.msra.mxu1 (!%p291_p10), %v2816_v0  ;;  %v2821_v6 = vld [vmem:[%s3576_s3 + $0x110] sm:$0xff] (!%p291_p10)   ;;  %v2822_v7 = vld [vmem:[%s3576_s3 + $0x58] sm:$0xff] (!%p291_p10)   ;;  %s3501_s15 = scalar_lea.hbm (!%p291_p10), %s3580_s7, %s2283_s17  ;;  %s3001_s23 = smov (!%p291_p10), [#allocation3]  }
  0x13   : > { %429 = vst [vmem:[#allocation2 + $0x20] sm:$0xff] (!%p291_p10), %v3000_v3  ;;  %430 = vst [vmem:[#allocation2 + $0x28] sm:$0x3] (!%p291_p10), %v3000_v3  ;;  %2556 = vmatpush3.bf16.msra.mxu0 (!%p291_p10), %v2817_v1  ;;  %2461 = vmatprep.subr.bf16.mxu1 (!%p291_p10), %v2818_v2  ;;  %v2823_v8 = vld [vmem:[%s3576_s3 + $0x118] sm:$0xff] (!%p291_p10)   ;;  %v2824_v9 = vld [vmem:[%s3576_s3 + $0x60] sm:$0xff] (!%p291_p10)   ;;  %s2892_s30 = sshll.u32 (!%p291_p10), %s3001_s23, 4  ;;  %s2893_s30 = int_to_ptr.vmem [resolvable:$false] %s2892_s30 }
  0x14   : > { %431 = vst [vmem:[#allocation2 + $0x30] sm:$0xff] (!%p291_p10), %v3000_v3  ;;  %432 = vst [vmem:[#allocation2 + $0x38] sm:$0x3] (!%p291_p10), %v3000_v3  ;;  %2557 = vmatprep.subr.bf16.mxu0 (!%p291_p10), %v2819_v4  ;;  %v2825_v10 = vld [vmem:[%s3576_s3 + $0x120] sm:$0xff] (!%p291_p10)   ;;  %v2826_v11 = vld [vmem:[%s3576_s3 + $0x68] sm:$0xff] (!%p291_p10)  }
  0x15   : > { %433 = vst [vmem:[#allocation2 + $0x40] sm:$0xff] (!%p291_p10), %v3000_v3  ;;  %434 = vst [vmem:[#allocation2 + $0x48] sm:$0x3] (!%p291_p10), %v3000_v3  ;;  %v3167_v13 = vld [vmem:[%s3574_s1] ss:$0 sm:$0xff] (!%p291_p10)  ;;  %v2827_v14 = vld [vmem:[%s3576_s3 + $0x128] sm:$0xff] (!%p291_p10)  }
  0x16   : > { %435 = vst [vmem:[#allocation2 + $0x50] sm:$0xff] (!%p291_p10), %v3000_v3  ;;  %436 = vst [vmem:[#allocation2 + $0x58] sm:$0x3] (!%p291_p10), %v3000_v3  ;;  %2462 = vmatpush3.bf16.msra.mxu1 (!%p291_p10), %v2818_v2  ;;  %v3175_v17 = vld [vmem:[%s3575_s2] ss:$0 sm:$0xff] (!%p291_p10)  ;;  %v2828_v21 = vld [vmem:[%s3576_s3 + $0x70] sm:$0xff] (!%p291_p10)  }
  0x17   : > { %437 = vst [vmem:[#allocation2 + $0x60] sm:$0xff] (!%p291_p10), %v3000_v3  ;;  %438 = vst [vmem:[#allocation2 + $0x68] sm:$0x3] (!%p291_p10), %v3000_v3  ;;  %2558 = vmatpush3.bf16.msra.mxu0 (!%p291_p10), %v2819_v4  ;;  %2463 = vmatprep.subr.bf16.mxu1 (!%p291_p10), %v2820_v5  ;;  %v2829_v24 = vld [vmem:[%s3576_s3 + $0x130] sm:$0xff] (!%p291_p10)   ;;  %v2830_v30 = vld [vmem:[%s3576_s3 + $0x78] sm:$0xff] (!%p291_p10)  }
  0x18   : > { %439 = vst [vmem:[#allocation2 + $0x70] sm:$0xff] %v3000_v3  ;;  %440 = vst [vmem:[#allocation2 + $0x78] sm:$0x3] %v3000_v3  ;;  %s346_s12 = scalar_select %p345_p11, %s2990_s27, 1  ;;  %2559 = vmatprep.subr.bf16.mxu0 %v2821_v6  ;;  %v482_v27 = vld [vmem:[#allocation2 + $0x1] sm:$0xff]  ;;  %v2831_v35 = vld [vmem:[%s3576_s3 + $0x138] sm:$0xff]  }
  0x19   : > { %441 = vst [vmem:[#allocation2 + $0x80] sm:$0xff] %v3000_v3  ;;  %442 = vst [vmem:[#allocation2 + $0x88] sm:$0x3] %v3000_v3  ;;  %v2832_v40 = vld [vmem:[%s3576_s3] sm:$0xff]   ;;  %v2834_v47 = vld [vmem:[%s3576_s3 + $0x8] sm:$0xff]  }
  0x1a   : > { %443 = vst [vmem:[#allocation2 + $0x90] sm:$0xff] %v3000_v3  ;;  %444 = vst [vmem:[#allocation2 + $0x98] sm:$0x3] %v3000_v3  ;;  %s3146_s19 = sshll.u32 %s346_s12, 5  ;;  %2464 = vmatpush3.bf16.msra.mxu1 %v2820_v5  ;;  %v2833_v41 = vld [vmem:[%s3576_s3 + $0x140] sm:$0xff]   ;;  %v2835_v51 = vld [vmem:[%s3576_s3 + $0x148] sm:$0xff]  }
  0x1b   : > { %2560 = vmatpush3.bf16.msra.mxu0 %v2821_v6  ;;  %2465 = vmatprep.subr.bf16.mxu1 %v2822_v7  ;;  %s3158_s10 = scalar_lea.vmem %s3573_s0, %s3146_s19  ;;  %v2836_v58 = vld [vmem:[%s3576_s3 + $0x10] sm:$0xff]   ;;  %v2838_v0 = vld [vmem:[%s3576_s3 + $0x18] sm:$0xff]   ;;  %s361_s12 = scalar_lea.vmem %s3577_s4, %s3146_s19 }
  0x1c   : > { %2561 = vmatprep.subr.bf16.mxu0 %v2823_v8  ;;  %v2291_v12 = vld [vmem:[%s3158_s10] sm:$0xff]   ;;  %v2342_v20 = vld [vmem:[%s3158_s10 + $0x8] sm:$0xff]   ;;  %v2343_v42 = vld [vmem:[%s3158_s10 + $0x10] sm:$0xff]   ;;  %s369_s16 = scalar_lea.vmem %s3578_s5, %s3146_s19  ;;  %s3484_s19 = sand.u32 1, %s2982_s25  }
  0x1d   : > { %v2292_v15 = vunpack.c.l.bf16 %v2291_v12  ;;  %v2293_v16 = vunpack.c.h.bf16 %v2291_v12  ;;  %v2296_v22 = vunpack.c.l.bf16 %v2342_v20  ;;  %v2297_v23 = vunpack.c.h.bf16 %v2342_v20  ;;  %v2344_v50 = vld [vmem:[%s3158_s10 + $0x18] sm:$0xff]   ;;  %v2837_v61 = vld [vmem:[%s3576_s3 + $0x150] sm:$0xff]   ;;  %s338_s18 = scalar_lea.vmem [#allocation3], %s3484_s19  ;;  %s3581_s21 = scalar_lea.vmem [#allocation5], %s3484_s19 }
  0x1e   : > { %2466 = vmatpush3.bf16.msra.mxu1 %v2822_v7  ;;  %v2300_v44 = vunpack.c.l.bf16 %v2343_v42  ;;  %v2301_v45 = vunpack.c.h.bf16 %v2343_v42  ;;  %v2304_v52 = vunpack.c.l.bf16 %v2344_v50  ;;  %v2305_v53 = vunpack.c.h.bf16 %v2344_v50  ;;  %v2846_v20 = vld [vmem:[%s3576_s3 + $0x38] sm:$0xff]   ;;  %s1893_s20 = sshll.u32 %s338_s18, 4  ;;  %s1907_s22 = sshll.u32 %s3581_s21, 4  ;;  %s3496_s20 = int_to_ptr.vmem [resolvable:$true] %s1893_s20  ;;  %s3503_s22 = int_to_ptr.vmem [resolvable:$true] %s1907_s22 }
  0x1f   : > { %2562 = vmatpush3.bf16.msra.mxu0 %v2823_v8  ;;  %2467 = vmatprep.subr.bf16.mxu1 %v2824_v9  ;;  %v395_v18 = vmul.f32 %v2292_v15, %v3167_v13  ;;  %v396_v19 = vmul.f32 %v2293_v16, %v3167_v13  ;;  %v397_v28 = vmul.f32 %v2296_v22, %v3167_v13  ;;  %v2841_v15 = vld [vmem:[%s3576_s3 + $0x160] sm:$0xff]   ;;  %v2842_v16 = vld [vmem:[%s3576_s3 + $0x28] sm:$0xff]   ;;  %s1873_s10 = scalar_lea.sflag [#allocation4], %s3484_s19  ;;  %s2894_s21 = scalar_lea.vmem %s2893_s30, 32 }
  0x20   : > { %2563 = vmatprep.subr.bf16.mxu0 %v2825_v10  ;;  %v398_v29 = vmul.f32 %v2297_v23, %v3167_v13  ;;  %v399_v48 = vmul.f32 %v2300_v44, %v3167_v13  ;;  %v400_v49 = vmul.f32 %v2301_v45, %v3167_v13  ;;  %v401_v56 = vmul.f32 %v2304_v52, %v3167_v13  ;;  %v2853_v44 = vld [vmem:[%s3576_s3 + $0x190] sm:$0xff]   ;;  %v2857_v52 = vld [vmem:[%s3576_s3 + $0x1a0] sm:$0xff]   ;;  %p2895_p1 = scmp.lt.s32.totalorder %s3496_s20, %s2893_s30 }
  0x21   : > { %v409_v25 = vadd.f32 %v3175_v17, %v395_v18  ;;  %v410_v26 = vadd.f32 %v3175_v17, %v396_v19  ;;  %v411_v33 = vadd.f32 %v3175_v17, %v397_v28  ;;  %v402_v57 = vmul.f32 %v2305_v53, %v3167_v13  ;;  %v2844_v18 = vld [vmem:[%s3576_s3 + $0x30] sm:$0xff]   ;;  %v2858_v53 = vld [vmem:[%s3576_s3 + $0xa8] sm:$0xff]  }
  0x22   : > { %2468 = vmatpush3.bf16.msra.mxu1 %v2824_v9  ;;  %v412_v34 = vadd.f32 %v3175_v17, %v398_v29  ;;  %v413_v54 = vadd.f32 %v3175_v17, %v399_v48  ;;  %v414_v55 = vadd.f32 %v3175_v17, %v400_v49  ;;  %v415_v62 = vadd.f32 %v3175_v17, %v401_v56  ;;  %v2839_v9 = vld [vmem:[%s3576_s3 + $0x158] sm:$0xff]   ;;  %v2845_v19 = vld [vmem:[%s3576_s3 + $0x170] sm:$0xff]  }
  0x23   : > { %2564 = vmatpush3.bf16.msra.mxu0 %v2825_v10  ;;  %2469 = vmatprep.subr.bf16.mxu1 %v2826_v11  ;;  %v417_v31 = vmax.f32 %v409_v25, 0.0  ;;  %v418_v32 = vmax.f32 %v410_v26, 0.0  ;;  %v419_v38 = vmax.f32 %v411_v33, 0.0  ;;  %v416_v63 = vadd.f32 %v3175_v17, %v402_v57  ;;  %v2843_v17 = vld [vmem:[%s3576_s3 + $0x168] sm:$0xff]   ;;  %v2849_v26 = vld [vmem:[%s3576_s3 + $0x180] sm:$0xff]   ;;  %v2854_v48 = vld [vmem:[%s3576_s3 + $0x98] sm:$0xff]  }
  0x24   : > { %2565 = vmatprep.subr.bf16.mxu0 %v2827_v14  ;;  %v420_v39 = vmax.f32 %v412_v34, 0.0  ;;  %v421_v59 = vmax.f32 %v413_v54, 0.0  ;;  %v422_v60 = vmax.f32 %v414_v55, 0.0  ;;  %v423_v5 = vmax.f32 %v415_v62, 0.0  ;;  %v2850_v34 = vld [vmem:[%s3576_s3 + $0x88] sm:$0xff]   ;;  %v2855_v49 = vld [vmem:[%s3576_s3 + $0x198] sm:$0xff]  }
  0x25   : > { %446 = vst [vmem:[#allocation2 + $0x11] sm:$0xff] %v417_v31  ;;  %v490_v36 = vpack.c.bf16 %v417_v31, %v482_v27  ;;  %447 = vst [vmem:[#allocation2 + $0x21] sm:$0xff] %v418_v32  ;;  %v1045_v37 = vpack.c.bf16 %v418_v32, %v417_v31  ;;  %v3205_v43 = vpack.c.bf16 %v419_v38, %v418_v32  ;;  %v3236_v6 = vmax.f32 %v416_v63, 0.0  ;;  %v2859_v54 = vld [vmem:[%s3576_s3 + $0x1a8] sm:$0xff]   ;;  %v2860_v55 = vld [vmem:[%s3576_s3 + $0xb0] sm:$0xff]  }
  0x26   : > { %2470 = vmatpush3.bf16.msra.mxu1 %v2826_v11  ;;  %448 = vst [vmem:[#allocation2 + $0x31] sm:$0xff] %v419_v38  ;;  %449 = vst [vmem:[#allocation2 + $0x41] sm:$0xff] %v420_v39  ;;  %v1046_v46 = vpack.c.bf16 %v420_v39, %v419_v38  ;;  %v3232_v1 = vpack.c.bf16 %v421_v59, %v420_v39  ;;  %v1047_v2 = vpack.c.bf16 %v422_v60, %v421_v59  ;;  %v2861_v56 = vld [vmem:[%s3576_s3 + $0x1b0] sm:$0xff]   ;;  %v2862_v57 = vld [vmem:[%s3576_s3 + $0xb8] sm:$0xff]  }
  0x27   : > { %2566 = vmatpush3.bf16.msra.mxu0 %v2827_v14  ;;  %2471 = vmatprep.subr.bf16.mxu1 %v2828_v21  ;;  %450 = vst [vmem:[#allocation2 + $0x51] sm:$0xff] %v421_v59  ;;  %451 = vst [vmem:[#allocation2 + $0x61] sm:$0xff] %v422_v60  ;;  %v3246_v10 = vpack.c.bf16 %v423_v5, %v422_v60  ;;  %v1048_v11 = vpack.c.bf16 %v3236_v6, %v423_v5  ;;  %v2840_v14 = vld [vmem:[%s3576_s3 + $0x20] sm:$0xff]   ;;  %v2866_v62 = vld [vmem:[%s3576_s3 + $0xc8] sm:$0xff]  }
  0x28   : > { %2567 = vmatprep.subr.bf16.mxu0 %v2829_v24  ;;  %2475 = vmatprep.mubr.bf16.mxu1 %v490_v36  ;;  %452 = vst [vmem:[#allocation2 + $0x71] sm:$0xff] %v423_v5  ;;  %453 = vst [vmem:[#allocation2 + $0x81] sm:$0xff] %v3236_v6  ;;  %v2864_v59 = vld [vmem:[%s3576_s3 + $0xc0] sm:$0xff]   ;;  %v2867_v63 = vld [vmem:[%s3576_s3 + $0x1c8] sm:$0xff]  }
  0x29   : > { %2571 = vmatprep.mubr.bf16.mxu0 %v1045_v37  ;;  %v2852_v37 = vld [vmem:[%s3576_s3 + $0x90] sm:$0xff]   ;;  %v2865_v60 = vld [vmem:[%s3576_s3 + $0x1c0] sm:$0xff]  }
  0x2a   : > { %2472 = vmatpush3.bf16.msra.mxu1 %v2828_v21  ;;  %v2847_v21 = vld [vmem:[%s3576_s3 + $0x178] sm:$0xff]  }
  0x2b   : > { %2568 = vmatpush3.bf16.msra.mxu0 %v2829_v24  ;;  %2473 = vmatprep.subr.bf16.mxu1 %v2830_v30  ;;  %v2848_v24 = vld [vmem:[%s3576_s3 + $0x80] sm:$0xff]  }
  0x2c   : > { %2569 = vmatprep.subr.bf16.mxu0 %v2831_v35  ;;  %v3234_v4 = vld [vmem:[#allocation2 + $0x10] sm:$0xff]  ;;  %v3240_v8 = vld [vmem:[#allocation2 + $0x22] sm:$0xff] }
  0x2d   : > { %v3238_v7 = vld [vmem:[#allocation2 + $0x12] sm:$0xff]  ;;  %v462_v12 = vpack.c.bf16 %v3234_v4, %v3000_v3  ;;  %v3279_v22 = vld [vmem:[#allocation2 + $0x20] sm:$0xff] }
  0x2e   : > { %2474 = vmatpush3.bf16.msra.mxu1 %v2830_v30  ;;  %v1195_v13 = vpack.c.bf16 %v3240_v8, %v3238_v7  ;;  %v3281_v23 = vld [vmem:[#allocation2 + $0x30] sm:$0xff]  ;;  %v3291_v27 = vld [vmem:[#allocation2 + $0x42] sm:$0xff] }
  0x2f   : > { %2570 = vmatpush3.bf16.msra.mxu0 %v2831_v35  ;;  %2483 = vmatprep.subr.bf16.mxu1 %v2832_v40  ;;  %v3286_v25 = vld [vmem:[#allocation2 + $0x32] sm:$0xff]  ;;  %v3293_v28 = vld [vmem:[#allocation2 + $0x40] sm:$0xff]  ;;  %v463_v30 = vpack.c.bf16 %v3281_v23, %v3279_v22  ;;  %v2851_v35 = vld [vmem:[%s3576_s3 + $0x188] sm:$0xff]  }
  0x30   : > { %2579 = vmatprep.subr.bf16.mxu0 %v2833_v41  ;;  %v3295_v29 = vld [vmem:[#allocation2 + $0x50] sm:$0xff]  ;;  %v1196_v32 = vpack.c.bf16 %v3291_v27, %v3286_v25  ;;  %v3303_v33 = vld [vmem:[#allocation2 + $0x62] sm:$0xff] }
  0x31   : > { %2476 = vmatmul.mubr.bf16.vlgmr.msra.gmra.mrb[0].mxu1 %v3205_v43  ;;  %v3299_v31 = vld [vmem:[#allocation2 + $0x52] sm:$0xff]  ;;  %v3313_v36 = vpack.c.bf16 %v3295_v29, %v3293_v28  ;;  %v3320_v39 = vld [vmem:[#allocation2 + $0x60] sm:$0xff] }
  0x32   : > { %2484 = vmatpush3.bf16.msra.mxu1 %v2832_v40  ;;  %2572 = vmatmul.mubr.bf16.vlgmr.msra.gmra.mrb[0].mxu0 %v1046_v46  ;;  %v1197_v38 = vpack.c.bf16 %v3303_v33, %v3299_v31  ;;  %v3322_v40 = vld [vmem:[#allocation2 + $0x70] sm:$0xff]  ;;  %v3326_v42 = vld [vmem:[#allocation2 + $0x82] sm:$0xff] }
  0x33   : > { %2580 = vmatpush3.bf16.msra.mxu0 %v2833_v41  ;;  %2485 = vmatprep.subr.bf16.mxu1 %v2834_v47  ;;  %v3324_v41 = vld [vmem:[#allocation2 + $0x72] sm:$0xff]  ;;  %v465_v45 = vpack.c.bf16 %v3322_v40, %v3320_v39  ;;  %v737_v46 = vld [vmem:[#allocation2 + $0x2] sm:$0xff] }
  0x34   : > { %2581 = vmatprep.subr.bf16.mxu0 %v2835_v51  ;;  %2479 = vmatprep.mubr.bf16.mxu1 %v3232_v1  ;;  %v745_v50 = vpack.c.bf16 %v3238_v7, %v737_v46  ;;  %v3392_v5 = vld [vmem:[#allocation2 + $0x80] sm:$0xff]  ;;  %v2869_v7 = vld [vmem:[%s3576_s3 + $0x1d0] sm:$0xff]  }
  0x35   : > { %2575 = vmatprep.mubr.bf16.mxu0 %v1047_v2  ;;  %v2868_v2 = vld [vmem:[%s3576_s3 + $0xd0] sm:$0xff]  }
  0x36   : > { %2486 = vmatpush3.bf16.msra.mxu1 %v2834_v47  ;;  %v1198_v47 = vpack.c.bf16 %v3326_v42, %v3324_v41 }
  0x37   : > { %2582 = vmatpush3.bf16.msra.mxu0 %v2835_v51  ;;  %2487 = vmatprep.subr.bf16.mxu1 %v2836_v58  ;;  %v2856_v51 = vld [vmem:[%s3576_s3 + $0xa0] sm:$0xff]  }
  0x38   : > { %2583 = vmatprep.subr.bf16.mxu0 %v2837_v61 }
  0x39   : > { %2480 = vmatmul.mubr.bf16.gmra.mrb[4].mxu1 %v3246_v10 }
  0x3a   : > { %2488 = vmatpush3.bf16.msra.mxu1 %v2836_v58  ;;  %2576 = vmatmul.mubr.bf16.gmra.mrb[4].mxu0 %v1048_v11  ;;  %v2863_v58 = vld [vmem:[%s3576_s3 + $0x1b8] sm:$0xff]  }
  0x3b   : > { %2584 = vmatpush3.bf16.msra.mxu0 %v2837_v61  ;;  %2489 = vmatprep.subr.bf16.mxu1 %v2838_v0  ;;  %v3375_v61 = vpack.c.bf16 %v3286_v25, %v3240_v8  ;;  %v3400_v8 = vpack.c.bf16 %v3324_v41, %v3303_v33  ;;  %v2870_v11 = vld [vmem:[%s3576_s3 + $0xd8] sm:$0xff]   ;;  %v898_v25 = vpack.c.bf16 %v3392_v5, %v3322_v40 }
  0x3c   : > { %2585 = vmatprep.subr.bf16.mxu0 %v2839_v9  ;;  %2499 = vmatprep.mubr.bf16.mxu1 %v462_v12  ;;  %v2871_v12 = vld [vmem:[%s3576_s3 + $0x1d8] sm:$0xff]  }
  0x3d   : > { %2595 = vmatprep.mubr.bf16.mxu0 %v1195_v13  ;;  %v895_v13 = vpack.c.bf16 %v3279_v22, %v3234_v4  ;;  %v2874_v4 = vld [vmem:[%s3576_s3 + $0xe8] sm:$0xff]   ;;  %v897_v22 = vpack.c.bf16 %v3320_v39, %v3295_v29  ;;  %v1645_v29 = vld [vmem:[#allocation2 + $0x92] sm:$0xff] }
  0x3e   : > { %2490 = vmatpush3.bf16.msra.mxu1 %v2838_v0  ;;  %v3385_v0 = vpack.c.bf16 %v3299_v31, %v3291_v27  ;;  %v2886_v27 = vld [vmem:[%s3576_s3 + $0x230] sm:$0xff]  }
  0x3f   : > { %2586 = vmatpush3.bf16.msra.mxu0 %v2839_v9  ;;  %2491 = vmatprep.subr.bf16.mxu1 %v2840_v14  ;;  %v1349_v9 = vpack.c.bf16 %v3000_v3, %v3392_v5  ;;  %v2872_v3 = vld [vmem:[%s3576_s3 + $0xe0] sm:$0xff]  }
  0x40   : > { %2587 = vmatprep.subr.bf16.mxu0 %v2841_v15 }
  0x42   : > { %2492 = vmatpush3.bf16.msra.mxu1 %v2840_v14  ;;  %v2873_v14 = vld [vmem:[%s3576_s3 + $0x1e0] sm:$0xff]  }
  0x43   : > { %2588 = vmatpush3.bf16.msra.mxu0 %v2841_v15  ;;  %2493 = vmatprep.subr.bf16.mxu1 %v2842_v16  ;;  %v2875_v15 = vld [vmem:[%s3576_s3 + $0x1e8] sm:$0xff]  }
  0x44   : > { %2589 = vmatprep.subr.bf16.mxu0 %v2843_v17 }
  0x46   : > { %2494 = vmatpush3.bf16.msra.mxu1 %v2842_v16  ;;  %v2876_v16 = vld [vmem:[%s3576_s3 + $0xf0] sm:$0xff]  }
  0x47   : > { %2590 = vmatpush3.bf16.msra.mxu0 %v2843_v17  ;;  %2495 = vmatprep.subr.bf16.mxu1 %v2844_v18  ;;  %v2878_v17 = vld [vmem:[%s3576_s3 + $0xf8] sm:$0xff]  }
  0x48   : > { %2591 = vmatprep.subr.bf16.mxu0 %v2845_v19 }
  0x4a   : > { %2496 = vmatpush3.bf16.msra.mxu1 %v2844_v18  ;;  %v2879_v18 = vld [vmem:[%s3576_s3 + $0x1f8] sm:$0xff]  }
  0x4b   : > { %2592 = vmatpush3.bf16.msra.mxu0 %v2845_v19  ;;  %2497 = vmatprep.subr.bf16.mxu1 %v2846_v20  ;;  %v2880_v19 = vld [vmem:[%s3576_s3 + $0x200] sm:$0xff]  }
  0x4c   : > { %2593 = vmatprep.subr.bf16.mxu0 %v2847_v21 }
  0x4e   : > { %2498 = vmatpush3.bf16.msra.mxu1 %v2846_v20  ;;  %v896_v20 = vpack.c.bf16 %v3293_v28, %v3281_v23  ;;  %v2882_v23 = vld [vmem:[%s3576_s3 + $0x210] sm:$0xff]   ;;  %v2887_v28 = vld [vmem:[%s3576_s3 + $0x238] sm:$0xff]  }
  0x4f   : > { %2594 = vmatpush3.bf16.msra.mxu0 %v2847_v21  ;;  %2507 = vmatprep.subr.bf16.mxu1 %v2848_v24  ;;  %v2881_v21 = vld [vmem:[%s3576_s3 + $0x208] sm:$0xff]  }
  0x50   : > { %2603 = vmatprep.subr.bf16.mxu0 %v2849_v26 }
  0x51   : > { %2500 = vmatmul.mubr.bf16.vlgmr.msra.gmra.mrb[0].mxu1 %v463_v30 }
  0x52   : > { %2508 = vmatpush3.bf16.msra.mxu1 %v2848_v24  ;;  %2596 = vmatmul.mubr.bf16.vlgmr.msra.gmra.mrb[0].mxu0 %v1196_v32  ;;  %v1495_v24 = vld [vmem:[#allocation2 + $0x91] sm:$0xff] }
  0x53   : > { %2604 = vmatpush3.bf16.msra.mxu0 %v2849_v26  ;;  %2509 = vmatprep.subr.bf16.mxu1 %v2850_v34  ;;  %v1499_v26 = vpack.c.bf16 %v1495_v24, %v3236_v6  ;;  %v2885_v6 = vld [vmem:[%s3576_s3 + $0x228] sm:$0xff]  }
  0x54   : > { %2605 = vmatprep.subr.bf16.mxu0 %v2851_v35  ;;  %2503 = vmatprep.mubr.bf16.mxu1 %v3313_v36 }
  0x55   : > { %2599 = vmatprep.mubr.bf16.mxu0 %v1197_v38 }
  0x56   : > { %2510 = vmatpush3.bf16.msra.mxu1 %v2850_v34 }
  0x57   : > { %2606 = vmatpush3.bf16.msra.mxu0 %v2851_v35  ;;  %2511 = vmatprep.subr.bf16.mxu1 %v2852_v37 }
  0x58   : > { %2607 = vmatprep.subr.bf16.mxu0 %v2853_v44 }
  0x59   : > { %2504 = vmatmul.mubr.bf16.gmra.mrb[4].mxu1 %v465_v45 }
  0x5a   : > { %2512 = vmatpush3.bf16.msra.mxu1 %v2852_v37  ;;  %2600 = vmatmul.mubr.bf16.gmra.mrb[4].mxu0 %v1198_v47 }
  0x5b   : > { %2608 = vmatpush3.bf16.msra.mxu0 %v2853_v44  ;;  %2513 = vmatprep.subr.bf16.mxu1 %v2854_v48 }
  0x5c   : > { %2609 = vmatprep.subr.bf16.mxu0 %v2855_v49  ;;  %2523 = vmatprep.mubr.bf16.mxu1 %v745_v50  ;;  %v2307_v50 = vld [vmem:[%s361_s12] sm:$0xff]  }
  0x5d   : > { %2619 = vmatprep.mubr.bf16.mxu0 %v463_v30  ;;  %v1649_v30 = vpack.c.bf16 %v1645_v29, %v3326_v42 }
  0x5e   : > { %2514 = vmatpush3.bf16.msra.mxu1 %v2854_v48  ;;  %v2345_v48 = vld [vmem:[%s361_s12 + $0x8] sm:$0xff]  }
  0x5f   : > { %2610 = vmatpush3.bf16.msra.mxu0 %v2855_v49  ;;  %2515 = vmatprep.subr.bf16.mxu1 %v2856_v51  ;;  %v2347_v49 = vld [vmem:[%s361_s12 + $0x18] sm:$0xff]  }
  0x60   : > { %2611 = vmatprep.subr.bf16.mxu0 %v2857_v52 }
  0x62   : > { %2516 = vmatpush3.bf16.msra.mxu1 %v2856_v51  ;;  %v2346_v51 = vld [vmem:[%s361_s12 + $0x10] sm:$0xff]  }
  0x63   : > { %2612 = vmatpush3.bf16.msra.mxu0 %v2857_v52  ;;  %2517 = vmatprep.subr.bf16.mxu1 %v2858_v53  ;;  %v2312_v52 = vunpack.c.l.bf16 %v2345_v48  ;;  %v2317_v5 = vunpack.c.h.bf16 %v2346_v51 }
  0x64   : > { %2613 = vmatprep.subr.bf16.mxu0 %v2859_v54 }
  0x66   : > { %2518 = vmatpush3.bf16.msra.mxu1 %v2858_v53 }
  0x67   : > { %2614 = vmatpush3.bf16.msra.mxu0 %v2859_v54  ;;  %2519 = vmatprep.subr.bf16.mxu1 %v2860_v55  ;;  %v2320_v54 = vunpack.c.l.bf16 %v2347_v49 }
  0x68   : > { %2615 = vmatprep.subr.bf16.mxu0 %v2861_v56 }
  0x6a   : > { %2520 = vmatpush3.bf16.msra.mxu1 %v2860_v55 }
  0x6b   : > { %2616 = vmatpush3.bf16.msra.mxu0 %v2861_v56  ;;  %2521 = vmatprep.subr.bf16.mxu1 %v2862_v57 }
  0x6c   : > { %2617 = vmatprep.subr.bf16.mxu0 %v2863_v58 }
  0x6e   : > { %2522 = vmatpush3.bf16.msra.mxu1 %v2862_v57  ;;  %v2308_v57 = vunpack.c.l.bf16 %v2307_v50 }
  0x6f   : > { %2618 = vmatpush3.bf16.msra.mxu0 %v2863_v58  ;;  %2531 = vmatprep.subr.bf16.mxu1 %v2864_v59 }
  0x70   : > { %2627 = vmatprep.subr.bf16.mxu0 %v2865_v60 }
  0x71   : > { %2524 = vmatmul.mubr.bf16.vlgmr.msra.gmra.mrb[0].mxu1 %v3375_v61 }
  0x72   : > { %2532 = vmatpush3.bf16.msra.mxu1 %v2864_v59  ;;  %2620 = vmatmul.mubr.bf16.vlgmr.msra.gmra.mrb[0].mxu0 %v3313_v36  ;;  %v2316_v59 = vunpack.c.l.bf16 %v2346_v51 }
  0x73   : > { %2628 = vmatpush3.bf16.msra.mxu0 %v2865_v60  ;;  %2533 = vmatprep.subr.bf16.mxu1 %v2866_v62  ;;  %v2321_v60 = vunpack.c.h.bf16 %v2347_v49 }
  0x74   : > { %2629 = vmatprep.subr.bf16.mxu0 %v2867_v63  ;;  %2527 = vmatprep.mubr.bf16.mxu1 %v3385_v0 }
  0x75   : > { %2623 = vmatprep.mubr.bf16.mxu0 %v465_v45 }
  0x76   : > { %2534 = vmatpush3.bf16.msra.mxu1 %v2866_v62 }
  0x77   : > { %2630 = vmatpush3.bf16.msra.mxu0 %v2867_v63  ;;  %2535 = vmatprep.subr.bf16.mxu1 %v2868_v2 }
  0x78   : > { %2631 = vmatprep.subr.bf16.mxu0 %v2869_v7 }
  0x79   : > { %2528 = vmatmul.mubr.bf16.gmra.mrb[4].mxu1 %v3400_v8 }
  0x7a   : > { %2536 = vmatpush3.bf16.msra.mxu1 %v2868_v2  ;;  %2624 = vmatmul.mubr.bf16.gmra.mrb[4].mxu0 %v1349_v9 }
  0x7b   : > { %2632 = vmatpush3.bf16.msra.mxu0 %v2869_v7  ;;  %2537 = vmatprep.subr.bf16.mxu1 %v2870_v11 }
  0x7c   : > { %2633 = vmatprep.subr.bf16.mxu0 %v2871_v12  ;;  %2547 = vmatprep.mubr.bf16.mxu1 %v895_v13 }
  0x7d   : > { %2643 = vmatprep.mubr.bf16.mxu0 %v3205_v43  ;;  %v2877_v43 = vld [vmem:[%s3576_s3 + $0x1f0] sm:$0xff]  }
  0x7e   : > { %2538 = vmatpush3.bf16.msra.mxu1 %v2870_v11  ;;  %v2309_v11 = vunpack.c.h.bf16 %v2307_v50 }
  0x7f   : > { %2634 = vmatpush3.bf16.msra.mxu0 %v2871_v12  ;;  %2539 = vmatprep.subr.bf16.mxu1 %v2872_v3 }
  0x80   : > { %2635 = vmatprep.subr.bf16.mxu0 %v2873_v14 }
  0x82   : > { %2540 = vmatpush3.bf16.msra.mxu1 %v2872_v3 }
  0x83   : > { %2636 = vmatpush3.bf16.msra.mxu0 %v2873_v14  ;;  %2541 = vmatprep.subr.bf16.mxu1 %v2874_v4 }
  0x84   : > { %2637 = vmatprep.subr.bf16.mxu0 %v2875_v15 }
  0x86   : > { %2542 = vmatpush3.bf16.msra.mxu1 %v2874_v4 }
  0x87   : > { %2638 = vmatpush3.bf16.msra.mxu0 %v2875_v15  ;;  %2543 = vmatprep.subr.bf16.mxu1 %v2876_v16 }
  0x88   : > { %2639 = vmatprep.subr.bf16.mxu0 %v2877_v43 }
  0x8a   : > { %2544 = vmatpush3.bf16.msra.mxu1 %v2876_v16 }
  0x8b   : > { %2640 = vmatpush3.bf16.msra.mxu0 %v2877_v43  ;;  %2545 = vmatprep.subr.bf16.mxu1 %v2878_v17 }
  0x8c   : > { %2641 = vmatprep.subr.bf16.mxu0 %v2879_v18 }
  0x8e   : > { %2546 = vmatpush3.bf16.msra.mxu1 %v2878_v17 }
  0x8f   : > { %2642 = vmatpush3.bf16.msra.mxu0 %v2879_v18  ;;  %2675 = vmatprep.subr.bf16.mxu1 %v2880_v19 }
  0x90   : > { %2651 = vmatprep.subr.bf16.mxu0 %v2880_v19 }
  0x91   : > { %2548 = vmatmul.mubr.bf16.vlgmr.msra.gmra.mrb[0].mxu1 %v896_v20 }
  0x92   : > { %2644 = vmatmul.mubr.bf16.vlgmr.msra.gmra.mrb[0].mxu0 %v3232_v1  ;;  %2683 = vmatpush3.bf16.msra.mxu1 %v2880_v19  ;;  %v2883_v1 = vld [vmem:[%s3576_s3 + $0x218] sm:$0xff]  }
  0x93   : > { %2652 = vmatpush3.bf16.msra.mxu0 %v2880_v19  ;;  %2676 = vmatprep.subr.bf16.mxu1 %v2881_v21 }
  0x94   : > { %2653 = vmatprep.subr.bf16.mxu0 %v2881_v21  ;;  %2551 = vmatprep.mubr.bf16.mxu1 %v897_v22 }
  0x95   : > { %2647 = vmatprep.mubr.bf16.mxu0 %v3246_v10  ;;  %v2884_v10 = vld [vmem:[%s3576_s3 + $0x220] sm:$0xff]  }
  0x96   : > { %2684 = vmatpush3.bf16.msra.mxu1 %v2881_v21 }
  0x97   : > { %2654 = vmatpush3.bf16.msra.mxu0 %v2881_v21  ;;  %2677 = vmatprep.subr.bf16.mxu1 %v2882_v23 }
  0x98   : > { %2655 = vmatprep.subr.bf16.mxu0 %v2882_v23 }
  0x99   : > { %2552 = vmatmul.mubr.bf16.gmra.mrb[4].mxu1 %v898_v25 }
  0x9a   : > { %2648 = vmatmul.mubr.bf16.gmra.mrb[4].mxu0 %v1499_v26  ;;  %2685 = vmatpush3.bf16.msra.mxu1 %v2882_v23 }
  0x9b   : > { %2656 = vmatpush3.bf16.msra.mxu0 %v2882_v23  ;;  %2678 = vmatprep.subr.bf16.mxu1 %v2883_v1 }
  0x9c   : > { %2657 = vmatprep.subr.bf16.mxu0 %v2883_v1  ;;  %2667 = vmatprep.mubr.bf16.mxu0 %v3375_v61 }
  0x9d   : > { %2671 = vmatprep.mubr.bf16.mxu1 %v3400_v8 }
  0x9e   : > { %2686 = vmatpush3.bf16.msra.mxu1 %v2883_v1 }
  0x9f   : > { %2658 = vmatpush3.bf16.msra.mxu0 %v2883_v1  ;;  %2679 = vmatprep.subr.bf16.mxu1 %v2884_v10 }
  0xa0   : > { %2659 = vmatprep.subr.bf16.mxu0 %v2884_v10 }
  0xa2   : > { %2687 = vmatpush3.bf16.msra.mxu1 %v2884_v10 }
  0xa3   : > { %2660 = vmatpush3.bf16.msra.mxu0 %v2884_v10  ;;  %2680 = vmatprep.subr.bf16.mxu1 %v2885_v6 }
  0xa4   : > { %2661 = vmatprep.subr.bf16.mxu0 %v2885_v6 }
  0xa6   : > { %2688 = vmatpush3.bf16.msra.mxu1 %v2885_v6 }
  0xa7   : > { %2662 = vmatpush3.bf16.msra.mxu0 %v2885_v6  ;;  %2681 = vmatprep.subr.bf16.mxu1 %v2886_v27 }
  0xa8   : > { %2663 = vmatprep.subr.bf16.mxu0 %v2886_v27 }
  0xaa   : > { %2689 = vmatpush3.bf16.msra.mxu1 %v2886_v27 }
  0xab   : > { %2664 = vmatpush3.bf16.msra.mxu0 %v2886_v27  ;;  %2682 = vmatprep.subr.bf16.mxu1 %v2887_v28 }
  0xac   : > { %2665 = vmatprep.subr.bf16.mxu0 %v2887_v28 }
  0xae   : > { %2690 = vmatpush3.bf16.msra.mxu1 %v2887_v28 }
  0xaf   : > { %2666 = vmatpush3.bf16.msra.mxu0 %v2887_v28 }
  0xb1   : > { %2672 = vmatmul.mubr.bf16.vlgmr.msra.gmra.mrb[8].mxu1 %v1649_v30 }
  0xb2   : > { %2668 = vmatmul.mubr.bf16.vlgmr.msra.gmra.mrb[0].mxu0 %v3385_v0  ;;  %v2313_v0 = vunpack.c.h.bf16 %v2345_v48 }
 0x164   : > { %v2549_v31 = vpop.f32.mrb[0].mxu1 }
 0x165   : > { %v998_v32 = vpop.f32.mrb[1].mxu1 }
 0x166   : > { %v2550_v33 = vpop.f32.mrb[2].mxu1 }
 0x167   : > { %v1001_v34 = vpop.f32.mrb[3].mxu1 }
 0x16c   : > { %v2553_v35 = vpop.f32.mrb[4].mxu1 }
 0x16d   : > { %v2649_v36 = vpop.f32.mrb[4].mxu0  ;;  %v1014_v37 = vpop.f32.mrb[5].mxu1 }
 0x16e   : > { %v2695_v38 = vadd.f32 %v2649_v36, %v2553_v35  ;;  %v1615_v39 = vpop.f32.mrb[5].mxu0  ;;  %v2554_v40 = vpop.f32.mrb[6].mxu1 }
 0x16f   : > { %v2697_v41 = vadd.f32 %v1615_v39, %v1014_v37  ;;  %v2650_v44 = vpop.f32.mrb[6].mxu0  ;;  %v1017_v45 = vpop.f32.mrb[7].mxu1 }
 0x170   : > { %v2699_v42 = vadd.f32 %v2650_v44, %v2554_v40  ;;  %v1618_v46 = vpop.f32.mrb[7].mxu0 }
 0x171   : > { %v2701_v47 = vadd.f32 %v1618_v46, %v1017_v45 }
 0x184   : > { %v2673_v53 = vpop.f32.mrb[8].mxu1 }
 0x185   : > { %v2669_v55 = vpop.f32.mrb[0].mxu0  ;;  %v2696_v56 = vadd.f32 %v2695_v38, %v2673_v53  ;;  %v1765_v58 = vpop.f32.mrb[9].mxu1 }
 0x186   : > { %v2691_v61 = vadd.f32 %v2669_v55, %v2549_v31  ;;  %v1749_v62 = vpop.f32.mrb[1].mxu0  ;;  %v2698_v63 = vadd.f32 %v2697_v41, %v1765_v58  ;;  %v2674_v2 = vpop.f32.mrb[10].mxu1 }
 0x187   : > { %v2692_v7 = vadd.f32 %v1749_v62, %v998_v32  ;;  %v2670_v8 = vpop.f32.mrb[2].mxu0  ;;  %v2700_v9 = vadd.f32 %v2699_v42, %v2674_v2  ;;  %v1768_v12 = vpop.f32.mrb[11].mxu1  ;;  %v1810_v4 = vadd.f32 %v2696_v56, %v2320_v54 }
 0x188   : > { %v2693_v13 = vadd.f32 %v2670_v8, %v2550_v33  ;;  %v1752_v3 = vpop.f32.mrb[3].mxu0  ;;  %v2702_v14 = vadd.f32 %v2701_v47, %v1768_v12  ;;  %v1806_v17 = vadd.f32 %v2691_v61, %v2312_v52  ;;  %v1808_v18 = vadd.f32 %v2698_v63, %v2316_v59 }
 0x189   : > { %v1804_v15 = vadd.f32 %v2692_v7, %v2308_v57  ;;  %v1811_v16 = vadd.f32 %v2700_v9, %v2321_v60  ;;  %v2694_v43 = vadd.f32 %v1752_v3, %v1001_v34  ;;  %v1848_v38 = vmul.f32 %v1810_v4, %v1810_v4 }
 0x18a   : > { %v1807_v19 = vadd.f32 %v2693_v13, %v2313_v0  ;;  %v1809_v20 = vadd.f32 %v2702_v14, %v2317_v5  ;;  %v1844_v6 = vmul.f32 %v1806_v17, %v1806_v17  ;;  %v1846_v32 = vmul.f32 %v1808_v18, %v1808_v18 }
 0x18b   : > { %v2340_v21 = vpack.c.bf16 %v1811_v16, %v1810_v4  ;;  %v1805_v22 = vadd.f32 %v2694_v43, %v2309_v11  ;;  %v1842_v25 = vmul.f32 %v1804_v15, %v1804_v15  ;;  %v1849_v41 = vmul.f32 %v1811_v16, %v1811_v16 }
 0x18c   : > { %v2330_v24 = vpack.c.bf16 %v1807_v19, %v1806_v17  ;;  %v2335_v23 = vpack.c.bf16 %v1809_v20, %v1808_v18  ;;  %v1845_v29 = vmul.f32 %v1807_v19, %v1807_v19  ;;  %v1847_v36 = vmul.f32 %v1809_v20, %v1809_v20 }
 0x18d   : > { %2350 = vst [vmem:[%s369_s16 + $0x18] sm:$0xff] %v2340_v21   ;;  %v2325_v26 = vpack.c.bf16 %v1805_v22, %v1804_v15  ;;  %v1828_v1 = vadd.f32 %v1805_v22, %v1804_v15  ;;  %v1843_v10 = vmul.f32 %v1805_v22, %v1805_v22 }
 0x18e   : > { %2348 = vst [vmem:[%s369_s16 + $0x8] sm:$0xff] %v2330_v24   ;;  %2349 = vst [vmem:[%s369_s16 + $0x10] sm:$0xff] %v2335_v23  }
 0x18f   : > { %2326 = vst [vmem:[%s369_s16] sm:$0xff] %v2325_v26   ;;  %v1829_v27 = vadd.f32 %v1828_v1, %v1806_v17  ;;  %v1850_v28 = vadd.f32 %v1843_v10, %v1842_v25  ;;  %s2888_s16 = scalar_lea.vmem %s3496_s20, 16 }
 0x190   : > { %p2889_p12 = scmp.ne.s32.totalorder %s3496_s20, %s2888_s16  ;;  %p2896_p2 = scmp.lt.s32.totalorder %s2894_s21, %s2888_s16 }
 0x191   : > { %v1851_v30 = vadd.f32 %v1850_v28, %v1844_v6  ;;  %v1830_v31 = vadd.f32 %v1829_v27, %v1807_v19 }
 0x192   : > { %p2890_p13 = pnand %p2889_p12, %p3083_p4  ;;  %p2897_p3 = por %p2896_p2, %p2895_p1 }
 0x193   : > { %v1831_v33 = vadd.f32 %v1830_v31, %v1808_v18  ;;  %v1852_v34 = vadd.f32 %v1851_v30, %v1845_v29 }
 0x194   : > { %p2891_p0 = pneg %p2890_p13 }
 0x195   : > { %v1832_v35 = vadd.f32 %v1831_v33, %v1809_v20  ;;  %v1853_v37 = vadd.f32 %v1852_v34, %v1846_v32 }
 0x196   : > { %p2898_p5 = pnand %p2897_p3, %p2891_p0 }
 0x197   : > { %v1833_v39 = vadd.f32 %v1832_v35, %v1810_v4  ;;  %v1854_v40 = vadd.f32 %v1853_v37, %v1847_v36 }
 0x199   : > { %v1834_v44 = vadd.f32 %v1833_v39, %v1811_v16  ;;  %v1855_v45 = vadd.f32 %v1854_v40, %v1848_v38 }
 0x19b   : > { %v1835_v42 = vrot.slane %v1834_v44, 4  ;;  %v1856_v46 = vadd.f32 %v1855_v45, %v1849_v41 }
 0x19d   : > { %v1836_v47 = vadd.f32 %v1835_v42, %v1834_v44  ;;  %v1857_v48 = vrot.slane %v1856_v46, 4 }
 0x19f   : > { %v1837_v49 = vrot.slane %v1836_v47, 2  ;;  %v1858_v50 = vadd.f32 %v1857_v48, %v1856_v46 }
 0x1a1   : > { %v1838_v51 = vadd.f32 %v1837_v49, %v1836_v47  ;;  %v1859_v52 = vrot.slane %v1858_v50, 2 }
 0x1a3   : > { %v1839_v53 = vrot.slane %v1838_v51, 1  ;;  %v1860_v54 = vadd.f32 %v1859_v52, %v1858_v50 }
 0x1a5   : > { %v1840_v55 = vadd.f32 %v1839_v53, %v1838_v51  ;;  %v1861_v56 = vrot.slane %v1860_v54, 1 }
 0x1a7   : > { %1841 = vst [vmem:[%s338_s18] sm:$0x1] %v1840_v55  ;;  %v1862_v57 = vadd.f32 %v1861_v56, %v1860_v54 }
 0x1a8   : > { %2901 = shalt.err (!%p2898_p5)
}
 0x1a9   : > { %s2902_s17 = scalar_lea.hbm %s3494_s8, 16  ;;  %s2906_s12 = scalar_lea.hbm %s3579_s6, 32 }
 0x1aa   : > { %p2903_p6 = scmp.ne.s32.totalorder %s3494_s8, %s2902_s17  ;;  %p2907_p10 = scmp.lt.u32.totalorder %s3494_s8, %s3579_s6 }
 0x1ab   : > { %p2908_p11 = scmp.lt.u32.totalorder %s2906_s12, %s2902_s17  ;;  %p2910_p13 = scmp.lt.u32.totalorder %s2902_s17, %s3494_s8 }
 0x1ac   : > { %p2904_p7 = pnand %p2903_p6, %p3083_p4 }
 0x1ad   : > { %p2909_p12 = por %p2908_p11, %p2907_p10 }
 0x1ae   : > { %p2905_p9 = pneg %p2904_p7 }
 0x1af   : > { %p2911_p0 = por %p2910_p13, %p2909_p12 }
 0x1b1   : > { %p2912_p1 = pnand %p2911_p0, %p2905_p9 }
 0x1b3   : > { %2915 = shalt.err (!%p2912_p1)
}
 0x1b4   : > { %2755 = dma.vmem_to_hbm [thread:$0]  (%p3083_p4), %s3496_s20, 16, %s3494_s8, %s1873_s10  }
 0x1b5   : > { %s3584_s21 = scalar_lea.vmem [#allocation5], %s3484_s19  ;;  %s1877_s16 = scalar_lea.sflag [#allocation6], %s3484_s19 }
 0x1b6   : > { %1863 = vst [vmem:[%s3584_s21] sm:$0x1] %v1862_v57  ;;  %s2916_s18 = scalar_lea.vmem %s3503_s22, 16  ;;  %s3002_s17 = smov [#allocation5]  }
 0x1b7   : > { %p2917_p2 = scmp.ne.s32.totalorder %s3503_s22, %s2916_s18  ;;  %s2920_s27 = sshll.u32 %s3002_s17, 4  ;;  %s2921_s27 = int_to_ptr.vmem [resolvable:$false] %s2920_s27 }
 0x1b8   : > { %s2922_s12 = scalar_lea.vmem %s2921_s27, 32  ;;  %p2923_p6 = scmp.lt.s32.totalorder %s3503_s22, %s2921_s27 }
 0x1b9   : > { %p2918_p3 = pnand %p2917_p2, %p3083_p4  ;;  %p2924_p7 = scmp.lt.s32.totalorder %s2922_s12, %s2916_s18 }
 0x1bb   : > { %p2919_p5 = pneg %p2918_p3  ;;  %p2925_p9 = por %p2924_p7, %p2923_p6 }
 0x1bd   : > { %p2926_p10 = pnand %p2925_p9, %p2919_p5 }
 0x1bf   : > { %2929 = shalt.err (!%p2926_p10)
}
 0x1c0   : > { %s2930_s19 = scalar_lea.hbm %s3501_s15, 16  ;;  %s2934_s10 = scalar_lea.hbm %s3580_s7, 32 }
 0x1c1   : > { %p2931_p11 = scmp.ne.s32.totalorder %s3501_s15, %s2930_s19  ;;  %p2935_p0 = scmp.lt.u32.totalorder %s3501_s15, %s3580_s7 }
 0x1c2   : > { %p2936_p1 = scmp.lt.u32.totalorder %s2934_s10, %s2930_s19  ;;  %p2938_p3 = scmp.lt.u32.totalorder %s2930_s19, %s3501_s15 }
 0x1c3   : > { %p2932_p12 = pnand %p2931_p11, %p3083_p4 }
 0x1c4   : > { %p2937_p2 = por %p2936_p1, %p2935_p0 }
 0x1c5   : > { %p2933_p13 = pneg %p2932_p12 }
 0x1c6   : > { %p2939_p5 = por %p2938_p3, %p2937_p2 }
 0x1c8   : > { %p2940_p6 = pnand %p2939_p5, %p2933_p13 }
 0x1ca   : > { %2943 = shalt.err (!%p2940_p6)
}
 0x1cb   : > { %2756 = dma.vmem_to_hbm [thread:$0]  (%p3083_p4), %s3503_s22, 16, %s3501_s15, %s1877_s16  }
 0x1cc PF: > { %p2766_p7 = scmp.ge.s32.totalorder %s2998_s29, 2  ;;  %s1930_s21 = sand.u32 1, %s2978_s24  }
 0x1cd   : > { %s1931_s18 = scalar_lea.sflag [#allocation4], %s1930_s21 }
 0x1ce   : > { %p2760_p9 = pnand %p2766_p7, %p3090_p8 }
 0x1d0   : > { %2969 = dma.done.wait (!%p2760_p9), %s1931_s18, 16  }
 0x1d1   : > { %2971 = vsyncadd (!%p2760_p9), %s1931_s18, 4294967280  ;;  %s1939_s17 = scalar_lea.sflag [#allocation6], %s1930_s21 }
 0x1d2   : > { %2973 = dma.done.wait (!%p2760_p9), %s1939_s17, 16  }
 0x1d3   : > { %2975 = vsyncadd (!%p2760_p9), %s1939_s17, 4294967280  ;;  %s24_s29 = sadd.s32 1, %s2998_s29   ;;  %s3585_s24 = smov %s2982_s25 }
 0x1d4   : > { %p21_p10 = scmp.ge.s32.totalorder %s24_s29, 4   ;;  %s3586_s25 = smov %s2986_s26 }
 0x1d5   : > { %s3587_s26 = smov %s3096_s14  ;;  %s3588_s27 = smov %s2994_s28 }
 0x1d6   : > { %s3589_s28 = smov %s3591_s9  ;;  %23 = sbr.rel (!%p21_p10) target bundleno = 6 (0x6), region = 120 }
 0x1dd   :  { %1943 = vsyncpa [#allocation4], 1 }
 0x1de   :  { %1945 = vsyncpa [#allocation4 + $0x1], 1 }
 0x1df   :  { %1946 = vsyncpa [#allocation6], 1 }
 0x1e0   :  { %1948 = vsyncpa [#allocation6 + $0x1], 1 }

// kernel: _lambda_.10
= control target key start
LH: loop header
LB: loop body
LE: loop exit
PB: predicated region body
PF: predicated region fallthrough
CT: control target
= control target key end

     0   :  { %s2774_s21 = smov 0   ;;  %s2776_s22 = smov 0   ;;  %s3195_s0 = inlined_call_operand.vmem [shape: bf16[2,8,8,128], index: 0, kind: input, shape index: {}]   ;;  %s3196_s1 = inlined_call_operand.vmem [shape: f32[1,128], index: 1, kind: input, shape index: {}]   ;;  %s3197_s2 = inlined_call_operand.vmem [shape: f32[1,128], index: 2, kind: input, shape index: {}]   ;;  %s3198_s3 = inlined_call_operand.vmem [shape: bf16[9,128,128], index: 3, kind: input, shape index: {}]   ;;  %s3199_s4 = inlined_call_operand.vmem [shape: bf16[2,8,8,128], index: 4, kind: output, shape index: {0}]   ;;  %s3200_s5 = inlined_call_operand.vmem [shape: f32[2,1,128], index: 5, kind: output, shape index: {1}]   ;;  %s3201_s6 = inlined_call_operand.vmem [shape: f32[2,1,128], index: 6, kind: output, shape index: {2}]  }
   0x1   :  { %s2778_s23 = smov 0  }
   0x2 LB: > { %s26_s24 = sadd.s32 1, %s2732_s22  ;;  %p1960_p0 = scmp.ge.s32.totalorder %s2736_s23, 1  ;;  %s2736_s23 = sphi %s2778_s23, %s17_s23   ;;  %s2732_s22 = sphi %s2776_s22, %s3203_s22   ;;  %s2728_s21 = sphi %s2774_s21, %s3202_s21  }
   0x3   : > { %p27_p1 = scmp.ge.s32.totalorder %s26_s24, 2  ;;  %p244_p2 = scmp.lt.s32.totalorder %s2736_s23, 3 }
   0x5   : > { %s3205_s24 = smov (%p27_p1, %s26_s24), 0  ;;  %p245_p3 = pnand %p1960_p0, %p244_p2 }
   0x6   : > { %v2642_v0 = vld [vmem:[%s3198_s3 + $0x40] sm:$0xff] (!%p245_p3)   ;;  %v2644_v2 = vld [vmem:[%s3198_s3 + $0x48] sm:$0xff] (!%p245_p3)   ;;  %p293_p4 = scmp.lt.s32.totalorder (!%p245_p3), %s2728_s21, 1  ;;  %v2738_v3 = vmov (!%p245_p3), 0.0   ;;  %v2646_v5 = vld [vmem:[%s3198_s3 + $0x50] sm:$0xff] (!%p245_p3)  }
   0x7   : > { %248 = sbr.rel (%p245_p3) target bundleno = 414 (0x19e), region = 36  ;;  %v2643_v1 = vld [vmem:[%s3198_s3 + $0x100] sm:$0xff] (!%p245_p3)   ;;  %2321 = vmatprep.subr.bf16.mxu1 (!%p245_p3), %v2642_v0  ;;  %377 = vst [vmem:[#allocation2] sm:$0xff] (!%p245_p3), %v2738_v3  ;;  %378 = vst [vmem:[#allocation2 + $0x8] sm:$0x3] (!%p245_p3), %v2738_v3  ;;  %v2645_v4 = vld [vmem:[%s3198_s3 + $0x108] sm:$0xff] (!%p245_p3)  }
   0x8   : > { %379 = vst [vmem:[#allocation2 + $0x10] sm:$0xff] (!%p245_p3), %v2738_v3  ;;  %380 = vst [vmem:[#allocation2 + $0x18] sm:$0x3] (!%p245_p3), %v2738_v3  ;;  %2417 = vmatprep.subr.bf16.mxu0 (!%p245_p3), %v2643_v1  ;;  %2322 = vmatpush3.bf16.msra.mxu1 (!%p245_p3), %v2642_v0  ;;  %v2647_v6 = vld [vmem:[%s3198_s3 + $0x110] sm:$0xff] (!%p245_p3)   ;;  %v2648_v7 = vld [vmem:[%s3198_s3 + $0x58] sm:$0xff] (!%p245_p3)  }
   0x9   : > { %381 = vst [vmem:[#allocation2 + $0x20] sm:$0xff] (!%p245_p3), %v2738_v3  ;;  %382 = vst [vmem:[#allocation2 + $0x28] sm:$0x3] (!%p245_p3), %v2738_v3  ;;  %2418 = vmatpush3.bf16.msra.mxu0 (!%p245_p3), %v2643_v1  ;;  %2323 = vmatprep.subr.bf16.mxu1 (!%p245_p3), %v2644_v2  ;;  %v2649_v8 = vld [vmem:[%s3198_s3 + $0x118] sm:$0xff] (!%p245_p3)   ;;  %v2650_v9 = vld [vmem:[%s3198_s3 + $0x60] sm:$0xff] (!%p245_p3)  }
   0xa   : > { %383 = vst [vmem:[#allocation2 + $0x30] sm:$0xff] (!%p245_p3), %v2738_v3  ;;  %384 = vst [vmem:[#allocation2 + $0x38] sm:$0x3] (!%p245_p3), %v2738_v3  ;;  %2419 = vmatprep.subr.bf16.mxu0 (!%p245_p3), %v2645_v4  ;;  %v2651_v10 = vld [vmem:[%s3198_s3 + $0x120] sm:$0xff] (!%p245_p3)   ;;  %v2652_v11 = vld [vmem:[%s3198_s3 + $0x68] sm:$0xff] (!%p245_p3)  }
   0xb   : > { %385 = vst [vmem:[#allocation2 + $0x40] sm:$0xff] (!%p245_p3), %v2738_v3  ;;  %386 = vst [vmem:[#allocation2 + $0x48] sm:$0x3] (!%p245_p3), %v2738_v3  ;;  %v2865_v13 = vld [vmem:[%s3196_s1] ss:$0 sm:$0xff] (!%p245_p3)  ;;  %v2653_v14 = vld [vmem:[%s3198_s3 + $0x128] sm:$0xff] (!%p245_p3)  }
   0xc   : > { %387 = vst [vmem:[#allocation2 + $0x50] sm:$0xff] (!%p245_p3), %v2738_v3  ;;  %388 = vst [vmem:[#allocation2 + $0x58] sm:$0x3] (!%p245_p3), %v2738_v3  ;;  %2324 = vmatpush3.bf16.msra.mxu1 (!%p245_p3), %v2644_v2  ;;  %v2873_v17 = vld [vmem:[%s3197_s2] ss:$0 sm:$0xff] (!%p245_p3)  ;;  %v2654_v21 = vld [vmem:[%s3198_s3 + $0x70] sm:$0xff] (!%p245_p3)  }
   0xd   : > { %389 = vst [vmem:[#allocation2 + $0x60] sm:$0xff] (!%p245_p3), %v2738_v3  ;;  %390 = vst [vmem:[#allocation2 + $0x68] sm:$0x3] (!%p245_p3), %v2738_v3  ;;  %2420 = vmatpush3.bf16.msra.mxu0 (!%p245_p3), %v2645_v4  ;;  %2325 = vmatprep.subr.bf16.mxu1 (!%p245_p3), %v2646_v5  ;;  %v2655_v24 = vld [vmem:[%s3198_s3 + $0x130] sm:$0xff] (!%p245_p3)   ;;  %v2656_v30 = vld [vmem:[%s3198_s3 + $0x78] sm:$0xff] (!%p245_p3)  }
   0xe   : > { %391 = vst [vmem:[#allocation2 + $0x70] sm:$0xff] %v2738_v3  ;;  %392 = vst [vmem:[#allocation2 + $0x78] sm:$0x3] %v2738_v3  ;;  %s3207_s21 = smov (!%p293_p4, %s2728_s21), 1  ;;  %2421 = vmatprep.subr.bf16.mxu0 %v2647_v6  ;;  %v434_v27 = vld [vmem:[#allocation2 + $0x1] sm:$0xff]  ;;  %v2657_v35 = vld [vmem:[%s3198_s3 + $0x138] sm:$0xff]  }
   0xf   : > { %393 = vst [vmem:[#allocation2 + $0x80] sm:$0xff] %v2738_v3  ;;  %394 = vst [vmem:[#allocation2 + $0x88] sm:$0x3] %v2738_v3  ;;  %s2169_s17 = sshll.u32 %s3207_s21, 5  ;;  %v2658_v40 = vld [vmem:[%s3198_s3] sm:$0xff]   ;;  %v2660_v47 = vld [vmem:[%s3198_s3 + $0x8] sm:$0xff]   ;;  %s315_s29 = scalar_lea.vmem %s3200_s5, %s3207_s21 }
  0x10   : > { %395 = vst [vmem:[#allocation2 + $0x90] sm:$0xff] %v2738_v3  ;;  %396 = vst [vmem:[#allocation2 + $0x98] sm:$0x3] %v2738_v3  ;;  %2326 = vmatpush3.bf16.msra.mxu1 %v2646_v5  ;;  %s2856_s28 = scalar_lea.vmem %s3195_s0, %s2169_s17  ;;  %v2659_v41 = vld [vmem:[%s3198_s3 + $0x140] sm:$0xff]   ;;  %v2661_v51 = vld [vmem:[%s3198_s3 + $0x148] sm:$0xff]   ;;  %s309_s26 = scalar_lea.vmem %s3199_s4, %s2169_s17 }
  0x11   : > { %2422 = vmatpush3.bf16.msra.mxu0 %v2647_v6  ;;  %2327 = vmatprep.subr.bf16.mxu1 %v2648_v7  ;;  %v2172_v12 = vld [vmem:[%s2856_s28] sm:$0xff]   ;;  %v2207_v20 = vld [vmem:[%s2856_s28 + $0x8] sm:$0xff]   ;;  %v2208_v42 = vld [vmem:[%s2856_s28 + $0x10] sm:$0xff]   ;;  %s321_s8 = scalar_lea.vmem %s3201_s6, %s3207_s21 }
  0x12   : > { %2423 = vmatprep.subr.bf16.mxu0 %v2649_v8  ;;  %v2173_v15 = vunpack.c.l.bf16 %v2172_v12  ;;  %v2174_v16 = vunpack.c.h.bf16 %v2172_v12  ;;  %v2177_v22 = vunpack.c.l.bf16 %v2207_v20  ;;  %v2178_v23 = vunpack.c.h.bf16 %v2207_v20  ;;  %v2209_v50 = vld [vmem:[%s2856_s28 + $0x18] sm:$0xff]   ;;  %v2662_v58 = vld [vmem:[%s3198_s3 + $0x10] sm:$0xff]  }
  0x13   : > { %v2181_v44 = vunpack.c.l.bf16 %v2208_v42  ;;  %v2182_v45 = vunpack.c.h.bf16 %v2208_v42  ;;  %v2185_v52 = vunpack.c.l.bf16 %v2209_v50  ;;  %v2186_v53 = vunpack.c.h.bf16 %v2209_v50  ;;  %v2663_v61 = vld [vmem:[%s3198_s3 + $0x150] sm:$0xff]   ;;  %v2664_v0 = vld [vmem:[%s3198_s3 + $0x18] sm:$0xff]  }
  0x14   : > { %2328 = vmatpush3.bf16.msra.mxu1 %v2648_v7  ;;  %v347_v18 = vmul.f32 %v2173_v15, %v2865_v13  ;;  %v348_v19 = vmul.f32 %v2174_v16, %v2865_v13  ;;  %v349_v28 = vmul.f32 %v2177_v22, %v2865_v13  ;;  %v350_v29 = vmul.f32 %v2178_v23, %v2865_v13  ;;  %v2667_v15 = vld [vmem:[%s3198_s3 + $0x160] sm:$0xff]   ;;  %v2668_v16 = vld [vmem:[%s3198_s3 + $0x28] sm:$0xff]   ;;  %v2672_v20 = vld [vmem:[%s3198_s3 + $0x38] sm:$0xff]  }
  0x15   : > { %2424 = vmatpush3.bf16.msra.mxu0 %v2649_v8  ;;  %2329 = vmatprep.subr.bf16.mxu1 %v2650_v9  ;;  %v351_v48 = vmul.f32 %v2181_v44, %v2865_v13  ;;  %v352_v49 = vmul.f32 %v2182_v45, %v2865_v13  ;;  %v353_v56 = vmul.f32 %v2185_v52, %v2865_v13  ;;  %v2679_v44 = vld [vmem:[%s3198_s3 + $0x190] sm:$0xff]   ;;  %v2683_v52 = vld [vmem:[%s3198_s3 + $0x1a0] sm:$0xff]  }
  0x16   : > { %2425 = vmatprep.subr.bf16.mxu0 %v2651_v10  ;;  %v361_v25 = vadd.f32 %v2873_v17, %v347_v18  ;;  %v362_v26 = vadd.f32 %v2873_v17, %v348_v19  ;;  %v363_v33 = vadd.f32 %v2873_v17, %v349_v28  ;;  %v364_v34 = vadd.f32 %v2873_v17, %v350_v29  ;;  %v2670_v18 = vld [vmem:[%s3198_s3 + $0x30] sm:$0xff]  }
  0x17   : > { %v365_v54 = vadd.f32 %v2873_v17, %v351_v48  ;;  %v366_v55 = vadd.f32 %v2873_v17, %v352_v49  ;;  %v354_v57 = vmul.f32 %v2186_v53, %v2865_v13  ;;  %v367_v62 = vadd.f32 %v2873_v17, %v353_v56  ;;  %v2671_v19 = vld [vmem:[%s3198_s3 + $0x170] sm:$0xff]   ;;  %v2680_v48 = vld [vmem:[%s3198_s3 + $0x98] sm:$0xff]   ;;  %v2684_v53 = vld [vmem:[%s3198_s3 + $0xa8] sm:$0xff]  }
  0x18   : > { %2330 = vmatpush3.bf16.msra.mxu1 %v2650_v9  ;;  %v369_v31 = vmax.f32 %v361_v25, 0.0  ;;  %v370_v32 = vmax.f32 %v362_v26, 0.0  ;;  %v371_v38 = vmax.f32 %v363_v33, 0.0  ;;  %v372_v39 = vmax.f32 %v364_v34, 0.0  ;;  %v2665_v9 = vld [vmem:[%s3198_s3 + $0x158] sm:$0xff]   ;;  %v2675_v26 = vld [vmem:[%s3198_s3 + $0x180] sm:$0xff]  }
  0x19   : > { %2426 = vmatpush3.bf16.msra.mxu0 %v2651_v10  ;;  %2331 = vmatprep.subr.bf16.mxu1 %v2652_v11  ;;  %v373_v59 = vmax.f32 %v365_v54, 0.0  ;;  %v374_v60 = vmax.f32 %v366_v55, 0.0  ;;  %v368_v63 = vadd.f32 %v2873_v17, %v354_v57  ;;  %v375_v5 = vmax.f32 %v367_v62, 0.0  ;;  %v2669_v17 = vld [vmem:[%s3198_s3 + $0x168] sm:$0xff]   ;;  %v2681_v49 = vld [vmem:[%s3198_s3 + $0x198] sm:$0xff]   ;;  %v2686_v55 = vld [vmem:[%s3198_s3 + $0xb0] sm:$0xff]  }
  0x1a   : > { %2427 = vmatprep.subr.bf16.mxu0 %v2653_v14  ;;  %398 = vst [vmem:[#allocation2 + $0x11] sm:$0xff] %v369_v31  ;;  %v442_v36 = vpack.c.bf16 %v369_v31, %v434_v27  ;;  %399 = vst [vmem:[#allocation2 + $0x21] sm:$0xff] %v370_v32  ;;  %v997_v37 = vpack.c.bf16 %v370_v32, %v369_v31  ;;  %v2903_v43 = vpack.c.bf16 %v371_v38, %v370_v32  ;;  %v2676_v34 = vld [vmem:[%s3198_s3 + $0x88] sm:$0xff]   ;;  %v2687_v56 = vld [vmem:[%s3198_s3 + $0x1b0] sm:$0xff]  }
  0x1b   : > { %400 = vst [vmem:[#allocation2 + $0x31] sm:$0xff] %v371_v38  ;;  %401 = vst [vmem:[#allocation2 + $0x41] sm:$0xff] %v372_v39  ;;  %v998_v46 = vpack.c.bf16 %v372_v39, %v371_v38  ;;  %v2930_v1 = vpack.c.bf16 %v373_v59, %v372_v39  ;;  %v999_v2 = vpack.c.bf16 %v374_v60, %v373_v59  ;;  %v2934_v6 = vmax.f32 %v368_v63, 0.0  ;;  %v2685_v54 = vld [vmem:[%s3198_s3 + $0x1a8] sm:$0xff]   ;;  %v2688_v57 = vld [vmem:[%s3198_s3 + $0xb8] sm:$0xff]  }
  0x1c   : > { %2332 = vmatpush3.bf16.msra.mxu1 %v2652_v11  ;;  %2337 = vmatprep.mubr.bf16.mxu1 %v442_v36  ;;  %402 = vst [vmem:[#allocation2 + $0x51] sm:$0xff] %v373_v59  ;;  %403 = vst [vmem:[#allocation2 + $0x61] sm:$0xff] %v374_v60  ;;  %v2944_v10 = vpack.c.bf16 %v375_v5, %v374_v60  ;;  %v2690_v59 = vld [vmem:[%s3198_s3 + $0xc0] sm:$0xff]   ;;  %v2692_v62 = vld [vmem:[%s3198_s3 + $0xc8] sm:$0xff]  }
  0x1d   : > { %2428 = vmatpush3.bf16.msra.mxu0 %v2653_v14  ;;  %2333 = vmatprep.subr.bf16.mxu1 %v2654_v21  ;;  %404 = vst [vmem:[#allocation2 + $0x71] sm:$0xff] %v375_v5  ;;  %405 = vst [vmem:[#allocation2 + $0x81] sm:$0xff] %v2934_v6  ;;  %v1000_v11 = vpack.c.bf16 %v2934_v6, %v375_v5  ;;  %v2666_v14 = vld [vmem:[%s3198_s3 + $0x20] sm:$0xff]   ;;  %v2693_v63 = vld [vmem:[%s3198_s3 + $0x1c8] sm:$0xff]  }
  0x1e   : > { %2429 = vmatprep.subr.bf16.mxu0 %v2655_v24  ;;  %2433 = vmatprep.mubr.bf16.mxu0 %v997_v37  ;;  %v2678_v37 = vld [vmem:[%s3198_s3 + $0x90] sm:$0xff]   ;;  %v2691_v60 = vld [vmem:[%s3198_s3 + $0x1c0] sm:$0xff]  }
  0x20   : > { %2334 = vmatpush3.bf16.msra.mxu1 %v2654_v21  ;;  %v2673_v21 = vld [vmem:[%s3198_s3 + $0x178] sm:$0xff]  }
  0x21   : > { %2430 = vmatpush3.bf16.msra.mxu0 %v2655_v24  ;;  %2335 = vmatprep.subr.bf16.mxu1 %v2656_v30  ;;  %v2932_v4 = vld [vmem:[#allocation2 + $0x10] sm:$0xff]  ;;  %v2938_v8 = vld [vmem:[#allocation2 + $0x22] sm:$0xff] }
  0x22   : > { %2431 = vmatprep.subr.bf16.mxu0 %v2657_v35  ;;  %v2936_v7 = vld [vmem:[#allocation2 + $0x12] sm:$0xff]  ;;  %v414_v12 = vpack.c.bf16 %v2932_v4, %v2738_v3  ;;  %v2977_v22 = vld [vmem:[#allocation2 + $0x20] sm:$0xff] }
  0x23   : > { %v1147_v13 = vpack.c.bf16 %v2938_v8, %v2936_v7  ;;  %v2979_v23 = vld [vmem:[#allocation2 + $0x30] sm:$0xff]  ;;  %v2674_v24 = vld [vmem:[%s3198_s3 + $0x80] sm:$0xff]  }
  0x24   : > { %2336 = vmatpush3.bf16.msra.mxu1 %v2656_v30  ;;  %v2984_v25 = vld [vmem:[#allocation2 + $0x32] sm:$0xff]  ;;  %v2989_v27 = vld [vmem:[#allocation2 + $0x42] sm:$0xff]  ;;  %v415_v30 = vpack.c.bf16 %v2979_v23, %v2977_v22 }
  0x25   : > { %2432 = vmatpush3.bf16.msra.mxu0 %v2657_v35  ;;  %2345 = vmatprep.subr.bf16.mxu1 %v2658_v40  ;;  %v2991_v28 = vld [vmem:[#allocation2 + $0x40] sm:$0xff]  ;;  %v2993_v29 = vld [vmem:[#allocation2 + $0x50] sm:$0xff]  ;;  %v1148_v32 = vpack.c.bf16 %v2989_v27, %v2984_v25  ;;  %v2677_v35 = vld [vmem:[%s3198_s3 + $0x188] sm:$0xff]  }
  0x26   : > { %2441 = vmatprep.subr.bf16.mxu0 %v2659_v41  ;;  %v2997_v31 = vld [vmem:[#allocation2 + $0x52] sm:$0xff]  ;;  %v3001_v33 = vld [vmem:[#allocation2 + $0x62] sm:$0xff]  ;;  %v3011_v36 = vpack.c.bf16 %v2993_v29, %v2991_v28 }
  0x27   : > { %2338 = vmatmul.mubr.bf16.vlgmr.msra.gmra.mrb[0].mxu1 %v2903_v43  ;;  %v1149_v38 = vpack.c.bf16 %v3001_v33, %v2997_v31  ;;  %v3018_v39 = vld [vmem:[#allocation2 + $0x60] sm:$0xff] }
  0x28   : > { %2346 = vmatpush3.bf16.msra.mxu1 %v2658_v40  ;;  %2434 = vmatmul.mubr.bf16.vlgmr.msra.gmra.mrb[0].mxu0 %v998_v46  ;;  %v3020_v40 = vld [vmem:[#allocation2 + $0x70] sm:$0xff]  ;;  %v3024_v42 = vld [vmem:[#allocation2 + $0x82] sm:$0xff] }
  0x29   : > { %2442 = vmatpush3.bf16.msra.mxu0 %v2659_v41  ;;  %2347 = vmatprep.subr.bf16.mxu1 %v2660_v47  ;;  %v3022_v41 = vld [vmem:[#allocation2 + $0x72] sm:$0xff]  ;;  %v417_v45 = vpack.c.bf16 %v3020_v40, %v3018_v39  ;;  %v689_v46 = vld [vmem:[#allocation2 + $0x2] sm:$0xff] }
  0x2a   : > { %2443 = vmatprep.subr.bf16.mxu0 %v2661_v51  ;;  %2341 = vmatprep.mubr.bf16.mxu1 %v2930_v1  ;;  %v697_v50 = vpack.c.bf16 %v2936_v7, %v689_v46  ;;  %v3090_v5 = vld [vmem:[#allocation2 + $0x80] sm:$0xff]  ;;  %v2695_v7 = vld [vmem:[%s3198_s3 + $0x1d0] sm:$0xff]  }
  0x2b   : > { %2437 = vmatprep.mubr.bf16.mxu0 %v999_v2  ;;  %v2694_v2 = vld [vmem:[%s3198_s3 + $0xd0] sm:$0xff]  }
  0x2c   : > { %2348 = vmatpush3.bf16.msra.mxu1 %v2660_v47  ;;  %v1150_v47 = vpack.c.bf16 %v3024_v42, %v3022_v41 }
  0x2d   : > { %2444 = vmatpush3.bf16.msra.mxu0 %v2661_v51  ;;  %2349 = vmatprep.subr.bf16.mxu1 %v2662_v58  ;;  %v2682_v51 = vld [vmem:[%s3198_s3 + $0xa0] sm:$0xff]  }
  0x2e   : > { %2445 = vmatprep.subr.bf16.mxu0 %v2663_v61 }
  0x2f   : > { %2342 = vmatmul.mubr.bf16.gmra.mrb[4].mxu1 %v2944_v10 }
  0x30   : > { %2350 = vmatpush3.bf16.msra.mxu1 %v2662_v58  ;;  %2438 = vmatmul.mubr.bf16.gmra.mrb[4].mxu0 %v1000_v11  ;;  %v2689_v58 = vld [vmem:[%s3198_s3 + $0x1b8] sm:$0xff]  }
  0x31   : > { %2446 = vmatpush3.bf16.msra.mxu0 %v2663_v61  ;;  %2351 = vmatprep.subr.bf16.mxu1 %v2664_v0  ;;  %v3073_v61 = vpack.c.bf16 %v2984_v25, %v2938_v8  ;;  %v3098_v8 = vpack.c.bf16 %v3022_v41, %v3001_v33  ;;  %v2696_v11 = vld [vmem:[%s3198_s3 + $0xd8] sm:$0xff]   ;;  %v850_v25 = vpack.c.bf16 %v3090_v5, %v3020_v40 }
  0x32   : > { %2447 = vmatprep.subr.bf16.mxu0 %v2665_v9  ;;  %2361 = vmatprep.mubr.bf16.mxu1 %v414_v12  ;;  %v2697_v12 = vld [vmem:[%s3198_s3 + $0x1d8] sm:$0xff]  }
  0x33   : > { %2457 = vmatprep.mubr.bf16.mxu0 %v1147_v13  ;;  %v847_v13 = vpack.c.bf16 %v2977_v22, %v2932_v4  ;;  %v2700_v4 = vld [vmem:[%s3198_s3 + $0xe8] sm:$0xff]   ;;  %v849_v22 = vpack.c.bf16 %v3018_v39, %v2993_v29  ;;  %v1597_v29 = vld [vmem:[#allocation2 + $0x92] sm:$0xff] }
  0x34   : > { %2352 = vmatpush3.bf16.msra.mxu1 %v2664_v0  ;;  %v3083_v0 = vpack.c.bf16 %v2997_v31, %v2989_v27  ;;  %v2712_v27 = vld [vmem:[%s3198_s3 + $0x230] sm:$0xff]  }
  0x35   : > { %2448 = vmatpush3.bf16.msra.mxu0 %v2665_v9  ;;  %2353 = vmatprep.subr.bf16.mxu1 %v2666_v14  ;;  %v1301_v9 = vpack.c.bf16 %v2738_v3, %v3090_v5  ;;  %v2698_v3 = vld [vmem:[%s3198_s3 + $0xe0] sm:$0xff]  }
  0x36   : > { %2449 = vmatprep.subr.bf16.mxu0 %v2667_v15 }
  0x38   : > { %2354 = vmatpush3.bf16.msra.mxu1 %v2666_v14  ;;  %v2699_v14 = vld [vmem:[%s3198_s3 + $0x1e0] sm:$0xff]  }
  0x39   : > { %2450 = vmatpush3.bf16.msra.mxu0 %v2667_v15  ;;  %2355 = vmatprep.subr.bf16.mxu1 %v2668_v16  ;;  %v2701_v15 = vld [vmem:[%s3198_s3 + $0x1e8] sm:$0xff]  }
  0x3a   : > { %2451 = vmatprep.subr.bf16.mxu0 %v2669_v17 }
  0x3c   : > { %2356 = vmatpush3.bf16.msra.mxu1 %v2668_v16  ;;  %v2702_v16 = vld [vmem:[%s3198_s3 + $0xf0] sm:$0xff]  }
  0x3d   : > { %2452 = vmatpush3.bf16.msra.mxu0 %v2669_v17  ;;  %2357 = vmatprep.subr.bf16.mxu1 %v2670_v18  ;;  %v2704_v17 = vld [vmem:[%s3198_s3 + $0xf8] sm:$0xff]  }
  0x3e   : > { %2453 = vmatprep.subr.bf16.mxu0 %v2671_v19 }
  0x40   : > { %2358 = vmatpush3.bf16.msra.mxu1 %v2670_v18  ;;  %v2705_v18 = vld [vmem:[%s3198_s3 + $0x1f8] sm:$0xff]  }
  0x41   : > { %2454 = vmatpush3.bf16.msra.mxu0 %v2671_v19  ;;  %2359 = vmatprep.subr.bf16.mxu1 %v2672_v20  ;;  %v2706_v19 = vld [vmem:[%s3198_s3 + $0x200] sm:$0xff]  }
  0x42   : > { %2455 = vmatprep.subr.bf16.mxu0 %v2673_v21 }
  0x44   : > { %2360 = vmatpush3.bf16.msra.mxu1 %v2672_v20  ;;  %v848_v20 = vpack.c.bf16 %v2991_v28, %v2979_v23  ;;  %v2708_v23 = vld [vmem:[%s3198_s3 + $0x210] sm:$0xff]   ;;  %v2713_v28 = vld [vmem:[%s3198_s3 + $0x238] sm:$0xff]  }
  0x45   : > { %2456 = vmatpush3.bf16.msra.mxu0 %v2673_v21  ;;  %2369 = vmatprep.subr.bf16.mxu1 %v2674_v24  ;;  %v2707_v21 = vld [vmem:[%s3198_s3 + $0x208] sm:$0xff]  }
  0x46   : > { %2465 = vmatprep.subr.bf16.mxu0 %v2675_v26 }
  0x47   : > { %2362 = vmatmul.mubr.bf16.vlgmr.msra.gmra.mrb[0].mxu1 %v415_v30 }
  0x48   : > { %2370 = vmatpush3.bf16.msra.mxu1 %v2674_v24  ;;  %2458 = vmatmul.mubr.bf16.vlgmr.msra.gmra.mrb[0].mxu0 %v1148_v32  ;;  %v1447_v24 = vld [vmem:[#allocation2 + $0x91] sm:$0xff] }
  0x49   : > { %2466 = vmatpush3.bf16.msra.mxu0 %v2675_v26  ;;  %2371 = vmatprep.subr.bf16.mxu1 %v2676_v34  ;;  %v1451_v26 = vpack.c.bf16 %v1447_v24, %v2934_v6  ;;  %v2711_v6 = vld [vmem:[%s3198_s3 + $0x228] sm:$0xff]  }
  0x4a   : > { %2467 = vmatprep.subr.bf16.mxu0 %v2677_v35  ;;  %2365 = vmatprep.mubr.bf16.mxu1 %v3011_v36 }
  0x4b   : > { %2461 = vmatprep.mubr.bf16.mxu0 %v1149_v38 }
  0x4c   : > { %2372 = vmatpush3.bf16.msra.mxu1 %v2676_v34 }
  0x4d   : > { %2468 = vmatpush3.bf16.msra.mxu0 %v2677_v35  ;;  %2373 = vmatprep.subr.bf16.mxu1 %v2678_v37 }
  0x4e   : > { %2469 = vmatprep.subr.bf16.mxu0 %v2679_v44 }
  0x4f   : > { %2366 = vmatmul.mubr.bf16.gmra.mrb[4].mxu1 %v417_v45 }
  0x50   : > { %2374 = vmatpush3.bf16.msra.mxu1 %v2678_v37  ;;  %2462 = vmatmul.mubr.bf16.gmra.mrb[4].mxu0 %v1150_v47 }
  0x51   : > { %2470 = vmatpush3.bf16.msra.mxu0 %v2679_v44  ;;  %2375 = vmatprep.subr.bf16.mxu1 %v2680_v48 }
  0x52   : > { %2471 = vmatprep.subr.bf16.mxu0 %v2681_v49  ;;  %2385 = vmatprep.mubr.bf16.mxu1 %v697_v50 }
  0x53   : > { %2481 = vmatprep.mubr.bf16.mxu0 %v415_v30  ;;  %v1601_v30 = vpack.c.bf16 %v1597_v29, %v3024_v42 }
  0x54   : > { %2376 = vmatpush3.bf16.msra.mxu1 %v2680_v48 }
  0x55   : > { %2472 = vmatpush3.bf16.msra.mxu0 %v2681_v49  ;;  %2377 = vmatprep.subr.bf16.mxu1 %v2682_v51 }
  0x56   : > { %2473 = vmatprep.subr.bf16.mxu0 %v2683_v52 }
  0x58   : > { %2378 = vmatpush3.bf16.msra.mxu1 %v2682_v51 }
  0x59   : > { %2474 = vmatpush3.bf16.msra.mxu0 %v2683_v52  ;;  %2379 = vmatprep.subr.bf16.mxu1 %v2684_v53 }
  0x5a   : > { %2475 = vmatprep.subr.bf16.mxu0 %v2685_v54 }
  0x5c   : > { %2380 = vmatpush3.bf16.msra.mxu1 %v2684_v53 }
  0x5d   : > { %2476 = vmatpush3.bf16.msra.mxu0 %v2685_v54  ;;  %2381 = vmatprep.subr.bf16.mxu1 %v2686_v55 }
  0x5e   : > { %2477 = vmatprep.subr.bf16.mxu0 %v2687_v56 }
  0x60   : > { %2382 = vmatpush3.bf16.msra.mxu1 %v2686_v55 }
  0x61   : > { %2478 = vmatpush3.bf16.msra.mxu0 %v2687_v56  ;;  %2383 = vmatprep.subr.bf16.mxu1 %v2688_v57 }
  0x62   : > { %2479 = vmatprep.subr.bf16.mxu0 %v2689_v58 }
  0x64   : > { %2384 = vmatpush3.bf16.msra.mxu1 %v2688_v57 }
  0x65   : > { %2480 = vmatpush3.bf16.msra.mxu0 %v2689_v58  ;;  %2393 = vmatprep.subr.bf16.mxu1 %v2690_v59 }
  0x66   : > { %2489 = vmatprep.subr.bf16.mxu0 %v2691_v60 }
  0x67   : > { %2386 = vmatmul.mubr.bf16.vlgmr.msra.gmra.mrb[0].mxu1 %v3073_v61 }
  0x68   : > { %2394 = vmatpush3.bf16.msra.mxu1 %v2690_v59  ;;  %2482 = vmatmul.mubr.bf16.vlgmr.msra.gmra.mrb[0].mxu0 %v3011_v36 }
  0x69   : > { %2490 = vmatpush3.bf16.msra.mxu0 %v2691_v60  ;;  %2395 = vmatprep.subr.bf16.mxu1 %v2692_v62 }
  0x6a   : > { %2491 = vmatprep.subr.bf16.mxu0 %v2693_v63  ;;  %2389 = vmatprep.mubr.bf16.mxu1 %v3083_v0 }
  0x6b   : > { %2485 = vmatprep.mubr.bf16.mxu0 %v417_v45 }
  0x6c   : > { %2396 = vmatpush3.bf16.msra.mxu1 %v2692_v62 }
  0x6d   : > { %2492 = vmatpush3.bf16.msra.mxu0 %v2693_v63  ;;  %2397 = vmatprep.subr.bf16.mxu1 %v2694_v2 }
  0x6e   : > { %2493 = vmatprep.subr.bf16.mxu0 %v2695_v7 }
  0x6f   : > { %2390 = vmatmul.mubr.bf16.gmra.mrb[4].mxu1 %v3098_v8 }
  0x70   : > { %2398 = vmatpush3.bf16.msra.mxu1 %v2694_v2  ;;  %2486 = vmatmul.mubr.bf16.gmra.mrb[4].mxu0 %v1301_v9 }
  0x71   : > { %2494 = vmatpush3.bf16.msra.mxu0 %v2695_v7  ;;  %2399 = vmatprep.subr.bf16.mxu1 %v2696_v11 }
  0x72   : > { %2495 = vmatprep.subr.bf16.mxu0 %v2697_v12  ;;  %2409 = vmatprep.mubr.bf16.mxu1 %v847_v13 }
  0x73   : > { %2505 = vmatprep.mubr.bf16.mxu0 %v2903_v43  ;;  %v2703_v43 = vld [vmem:[%s3198_s3 + $0x1f0] sm:$0xff]  }
  0x74   : > { %2400 = vmatpush3.bf16.msra.mxu1 %v2696_v11 }
  0x75   : > { %2496 = vmatpush3.bf16.msra.mxu0 %v2697_v12  ;;  %2401 = vmatprep.subr.bf16.mxu1 %v2698_v3 }
  0x76   : > { %2497 = vmatprep.subr.bf16.mxu0 %v2699_v14 }
  0x78   : > { %2402 = vmatpush3.bf16.msra.mxu1 %v2698_v3 }
  0x79   : > { %2498 = vmatpush3.bf16.msra.mxu0 %v2699_v14  ;;  %2403 = vmatprep.subr.bf16.mxu1 %v2700_v4 }
  0x7a   : > { %2499 = vmatprep.subr.bf16.mxu0 %v2701_v15 }
  0x7c   : > { %2404 = vmatpush3.bf16.msra.mxu1 %v2700_v4 }
  0x7d   : > { %2500 = vmatpush3.bf16.msra.mxu0 %v2701_v15  ;;  %2405 = vmatprep.subr.bf16.mxu1 %v2702_v16 }
  0x7e   : > { %2501 = vmatprep.subr.bf16.mxu0 %v2703_v43 }
  0x80   : > { %2406 = vmatpush3.bf16.msra.mxu1 %v2702_v16 }
  0x81   : > { %2502 = vmatpush3.bf16.msra.mxu0 %v2703_v43  ;;  %2407 = vmatprep.subr.bf16.mxu1 %v2704_v17 }
  0x82   : > { %2503 = vmatprep.subr.bf16.mxu0 %v2705_v18 }
  0x84   : > { %2408 = vmatpush3.bf16.msra.mxu1 %v2704_v17 }
  0x85   : > { %2504 = vmatpush3.bf16.msra.mxu0 %v2705_v18  ;;  %2537 = vmatprep.subr.bf16.mxu1 %v2706_v19 }
  0x86   : > { %2513 = vmatprep.subr.bf16.mxu0 %v2706_v19 }
  0x87   : > { %2410 = vmatmul.mubr.bf16.vlgmr.msra.gmra.mrb[0].mxu1 %v848_v20 }
  0x88   : > { %2506 = vmatmul.mubr.bf16.vlgmr.msra.gmra.mrb[0].mxu0 %v2930_v1  ;;  %2545 = vmatpush3.bf16.msra.mxu1 %v2706_v19  ;;  %v2709_v1 = vld [vmem:[%s3198_s3 + $0x218] sm:$0xff]  }
  0x89   : > { %2514 = vmatpush3.bf16.msra.mxu0 %v2706_v19  ;;  %2538 = vmatprep.subr.bf16.mxu1 %v2707_v21 }
  0x8a   : > { %2515 = vmatprep.subr.bf16.mxu0 %v2707_v21  ;;  %2413 = vmatprep.mubr.bf16.mxu1 %v849_v22 }
  0x8b   : > { %2509 = vmatprep.mubr.bf16.mxu0 %v2944_v10  ;;  %v2710_v10 = vld [vmem:[%s3198_s3 + $0x220] sm:$0xff]  }
  0x8c   : > { %2546 = vmatpush3.bf16.msra.mxu1 %v2707_v21 }
  0x8d   : > { %2516 = vmatpush3.bf16.msra.mxu0 %v2707_v21  ;;  %2539 = vmatprep.subr.bf16.mxu1 %v2708_v23 }
  0x8e   : > { %2517 = vmatprep.subr.bf16.mxu0 %v2708_v23 }
  0x8f   : > { %2414 = vmatmul.mubr.bf16.gmra.mrb[4].mxu1 %v850_v25 }
  0x90   : > { %2510 = vmatmul.mubr.bf16.gmra.mrb[4].mxu0 %v1451_v26  ;;  %2547 = vmatpush3.bf16.msra.mxu1 %v2708_v23 }
  0x91   : > { %2518 = vmatpush3.bf16.msra.mxu0 %v2708_v23  ;;  %2540 = vmatprep.subr.bf16.mxu1 %v2709_v1 }
  0x92   : > { %2519 = vmatprep.subr.bf16.mxu0 %v2709_v1  ;;  %2529 = vmatprep.mubr.bf16.mxu0 %v3073_v61 }
  0x93   : > { %2533 = vmatprep.mubr.bf16.mxu1 %v3098_v8 }
  0x94   : > { %2548 = vmatpush3.bf16.msra.mxu1 %v2709_v1 }
  0x95   : > { %2520 = vmatpush3.bf16.msra.mxu0 %v2709_v1  ;;  %2541 = vmatprep.subr.bf16.mxu1 %v2710_v10 }
  0x96   : > { %2521 = vmatprep.subr.bf16.mxu0 %v2710_v10 }
  0x98   : > { %2549 = vmatpush3.bf16.msra.mxu1 %v2710_v10 }
  0x99   : > { %2522 = vmatpush3.bf16.msra.mxu0 %v2710_v10  ;;  %2542 = vmatprep.subr.bf16.mxu1 %v2711_v6 }
  0x9a   : > { %2523 = vmatprep.subr.bf16.mxu0 %v2711_v6 }
  0x9c   : > { %2550 = vmatpush3.bf16.msra.mxu1 %v2711_v6 }
  0x9d   : > { %2524 = vmatpush3.bf16.msra.mxu0 %v2711_v6  ;;  %2543 = vmatprep.subr.bf16.mxu1 %v2712_v27 }
  0x9e   : > { %2525 = vmatprep.subr.bf16.mxu0 %v2712_v27 }
  0xa0   : > { %2551 = vmatpush3.bf16.msra.mxu1 %v2712_v27 }
  0xa1   : > { %2526 = vmatpush3.bf16.msra.mxu0 %v2712_v27  ;;  %2544 = vmatprep.subr.bf16.mxu1 %v2713_v28 }
  0xa2   : > { %2527 = vmatprep.subr.bf16.mxu0 %v2713_v28 }
  0xa4   : > { %2552 = vmatpush3.bf16.msra.mxu1 %v2713_v28 }
  0xa5   : > { %2528 = vmatpush3.bf16.msra.mxu0 %v2713_v28 }
  0xa7   : > { %2534 = vmatmul.mubr.bf16.vlgmr.msra.gmra.mrb[8].mxu1 %v1601_v30 }
  0xa8   : > { %2530 = vmatmul.mubr.bf16.vlgmr.msra.gmra.mrb[0].mxu0 %v3083_v0 }
 0x15a   : > { %v2411_v31 = vpop.f32.mrb[0].mxu1 }
 0x15b   : > { %v950_v32 = vpop.f32.mrb[1].mxu1 }
 0x15c   : > { %v2412_v33 = vpop.f32.mrb[2].mxu1 }
 0x15d   : > { %v953_v34 = vpop.f32.mrb[3].mxu1 }
 0x162   : > { %v2415_v35 = vpop.f32.mrb[4].mxu1 }
 0x163   : > { %v2511_v36 = vpop.f32.mrb[4].mxu0  ;;  %v966_v37 = vpop.f32.mrb[5].mxu1 }
 0x164   : > { %v2557_v38 = vadd.f32 %v2511_v36, %v2415_v35  ;;  %v1567_v39 = vpop.f32.mrb[5].mxu0  ;;  %v2416_v40 = vpop.f32.mrb[6].mxu1 }
 0x165   : > { %v2559_v41 = vadd.f32 %v1567_v39, %v966_v37  ;;  %v2512_v44 = vpop.f32.mrb[6].mxu0  ;;  %v969_v45 = vpop.f32.mrb[7].mxu1 }
 0x166   : > { %v2561_v42 = vadd.f32 %v2512_v44, %v2416_v40  ;;  %v1570_v46 = vpop.f32.mrb[7].mxu0 }
 0x167   : > { %v2563_v47 = vadd.f32 %v1570_v46, %v969_v45 }
 0x17a   : > { %v2535_v48 = vpop.f32.mrb[8].mxu1 }
 0x17b   : > { %v2531_v49 = vpop.f32.mrb[0].mxu0  ;;  %v2558_v50 = vadd.f32 %v2557_v38, %v2535_v48  ;;  %v1717_v51 = vpop.f32.mrb[9].mxu1 }
 0x17c   : > { %v2553_v52 = vadd.f32 %v2531_v49, %v2411_v31  ;;  %v1701_v53 = vpop.f32.mrb[1].mxu0  ;;  %v2560_v54 = vadd.f32 %v2559_v41, %v1717_v51  ;;  %v2536_v55 = vpop.f32.mrb[10].mxu1 }
 0x17d   : > { %v2554_v56 = vadd.f32 %v1701_v53, %v950_v32  ;;  %v2532_v57 = vpop.f32.mrb[2].mxu0  ;;  %v2562_v58 = vadd.f32 %v2561_v42, %v2536_v55  ;;  %v1720_v59 = vpop.f32.mrb[11].mxu1  ;;  %v1776_v21 = vmul.f32 %v2558_v50, %v2558_v50 }
 0x17e   : > { %v2555_v60 = vadd.f32 %v2532_v57, %v2412_v33  ;;  %v1704_v61 = vpop.f32.mrb[3].mxu0  ;;  %v2564_v62 = vadd.f32 %v2563_v47, %v1720_v59  ;;  %v1772_v12 = vmul.f32 %v2553_v52, %v2553_v52  ;;  %v1774_v16 = vmul.f32 %v2560_v54, %v2560_v54 }
 0x17f   : > { %v2205_v63 = vpack.c.bf16 %v2562_v58, %v2558_v50  ;;  %v2556_v0 = vadd.f32 %v1704_v61, %v953_v34  ;;  %v1770_v7 = vmul.f32 %v2554_v56, %v2554_v56  ;;  %v1777_v23 = vmul.f32 %v2562_v58, %v2562_v58 }
 0x180   : > { %v2195_v2 = vpack.c.bf16 %v2555_v60, %v2553_v52  ;;  %v2200_v5 = vpack.c.bf16 %v2564_v62, %v2560_v54  ;;  %v1773_v14 = vmul.f32 %v2555_v60, %v2555_v60  ;;  %v1775_v19 = vmul.f32 %v2564_v62, %v2564_v62 }
 0x181   : > { %2212 = vst [vmem:[%s309_s26 + $0x18] sm:$0xff] %v2205_v63   ;;  %v2190_v8 = vpack.c.bf16 %v2556_v0, %v2554_v56  ;;  %v1756_v9 = vadd.f32 %v2556_v0, %v2554_v56  ;;  %v1771_v11 = vmul.f32 %v2556_v0, %v2556_v0 }
 0x182   : > { %2210 = vst [vmem:[%s309_s26 + $0x8] sm:$0xff] %v2195_v2   ;;  %2211 = vst [vmem:[%s309_s26 + $0x10] sm:$0xff] %v2200_v5  }
 0x183   : > { %2191 = vst [vmem:[%s309_s26] sm:$0xff] %v2190_v8   ;;  %v1757_v13 = vadd.f32 %v2553_v52, %v1756_v9  ;;  %v1778_v3 = vadd.f32 %v1771_v11, %v1770_v7 }
 0x185   : > { %v1779_v4 = vadd.f32 %v1778_v3, %v1772_v12  ;;  %v1758_v15 = vadd.f32 %v2555_v60, %v1757_v13 }
 0x187   : > { %v1759_v43 = vadd.f32 %v2560_v54, %v1758_v15  ;;  %v1780_v17 = vadd.f32 %v1779_v4, %v1773_v14 }
 0x189   : > { %v1760_v18 = vadd.f32 %v2564_v62, %v1759_v43  ;;  %v1781_v20 = vadd.f32 %v1780_v17, %v1774_v16 }
 0x18b   : > { %v1761_v22 = vadd.f32 %v2558_v50, %v1760_v18  ;;  %v1782_v24 = vadd.f32 %v1781_v20, %v1775_v19 }
 0x18d   : > { %v1762_v25 = vadd.f32 %v2562_v58, %v1761_v22  ;;  %v1783_v26 = vadd.f32 %v1782_v24, %v1776_v21 }
 0x18f   : > { %v1763_v1 = vrot.slane %v1762_v25, 4  ;;  %v1784_v10 = vadd.f32 %v1783_v26, %v1777_v23 }
 0x191   : > { %v1764_v6 = vadd.f32 %v1763_v1, %v1762_v25  ;;  %v1785_v27 = vrot.slane %v1784_v10, 4 }
 0x193   : > { %v1765_v28 = vrot.slane %v1764_v6, 2  ;;  %v1786_v29 = vadd.f32 %v1785_v27, %v1784_v10 }
 0x195   : > { %v1766_v30 = vadd.f32 %v1765_v28, %v1764_v6  ;;  %v1787_v31 = vrot.slane %v1786_v29, 2 }
 0x197   : > { %v1767_v32 = vrot.slane %v1766_v30, 1  ;;  %v1788_v33 = vadd.f32 %v1787_v31, %v1786_v29 }
 0x199   : > { %v1768_v34 = vadd.f32 %v1767_v32, %v1766_v30  ;;  %v1789_v35 = vrot.slane %v1788_v33, 1 }
 0x19b   : > { %1769 = vst [vmem:[%s315_s29] sm:$0x1] %v1768_v34  ;;  %v1790_v36 = vadd.f32 %v1789_v35, %v1788_v33 }
 0x19d   : > { %1791 = vst [vmem:[%s321_s8] sm:$0x1] %v1790_v36 }
 0x19e PF: > { %s17_s23 = sadd.s32 1, %s2736_s23   ;;  %s3202_s21 = smov %s2732_s22 }
 0x19f   : > { %p14_p5 = scmp.ge.s32.totalorder %s17_s23, 4   ;;  %s3203_s22 = smov %s3205_s24 }
 0x1a1   :  { %16 = sbr.rel (!%p14_p5) target bundleno = 2 (0x2), region = 103 }

// kernel: _lambda_.9
= control target key start
LH: loop header
LB: loop body
LE: loop exit
PB: predicated region body
PF: predicated region fallthrough
CT: control target
= control target key end

     0   :  { %s2901_s24 = smov 0   ;;  %s2903_s25 = smov 0   ;;  %s3326_s0 = inlined_call_operand.vmem [shape: bf16[2,8,8,128], index: 0, kind: input, shape index: {}]   ;;  %s3327_s1 = inlined_call_operand.vmem [shape: f32[1,128], index: 1, kind: input, shape index: {}]   ;;  %s3328_s2 = inlined_call_operand.vmem [shape: f32[1,128], index: 2, kind: input, shape index: {}]   ;;  %s3329_s3 = inlined_call_operand.vmem [shape: bf16[9,128,128], index: 3, kind: input, shape index: {}]   ;;  %s3330_s4 = inlined_call_operand.vmem [shape: bf16[2,8,8,128], index: 4, kind: input, shape index: {}]   ;;  %s3331_s5 = inlined_call_operand.vmem [shape: bf16[2,8,8,128], index: 5, kind: output, shape index: {0}]   ;;  %s3332_s6 = inlined_call_operand.vmem [shape: f32[2,1,128], index: 6, kind: output, shape index: {1}]   ;;  %s3333_s7 = inlined_call_operand.vmem [shape: f32[2,1,128], index: 7, kind: output, shape index: {2}]  }
   0x1   :  { %s2905_s26 = smov 0  }
   0x2 LB: > { %s27_s27 = sadd.s32 1, %s2854_s25  ;;  %p2060_p0 = scmp.ge.s32.totalorder %s2858_s26, 1  ;;  %s2858_s26 = sphi %s2905_s26, %s18_s26   ;;  %s2854_s25 = sphi %s2903_s25, %s3335_s25   ;;  %s2850_s24 = sphi %s2901_s24, %s3334_s24  }
   0x3   : > { %p28_p1 = scmp.ge.s32.totalorder %s27_s27, 2  ;;  %p284_p2 = scmp.lt.s32.totalorder %s2858_s26, 3 }
   0x5   : > { %s3337_s27 = smov (%p28_p1, %s27_s27), 0  ;;  %p285_p3 = pnand %p2060_p0, %p284_p2 }
   0x6   : > { %v2764_v0 = vld [vmem:[%s3329_s3 + $0x40] sm:$0xff] (!%p285_p3)   ;;  %v2766_v2 = vld [vmem:[%s3329_s3 + $0x48] sm:$0xff] (!%p285_p3)   ;;  %p343_p4 = scmp.lt.s32.totalorder (!%p285_p3), %s2850_s24, 1  ;;  %v2860_v3 = vmov (!%p285_p3), 0.0   ;;  %v2768_v5 = vld [vmem:[%s3329_s3 + $0x50] sm:$0xff] (!%p285_p3)  }
   0x7   : > { %288 = sbr.rel (%p285_p3) target bundleno = 416 (0x1a0), region = 40  ;;  %v2765_v1 = vld [vmem:[%s3329_s3 + $0x100] sm:$0xff] (!%p285_p3)   ;;  %2443 = vmatprep.subr.bf16.mxu1 (!%p285_p3), %v2764_v0  ;;  %435 = vst [vmem:[#allocation2] sm:$0xff] (!%p285_p3), %v2860_v3  ;;  %436 = vst [vmem:[#allocation2 + $0x8] sm:$0x3] (!%p285_p3), %v2860_v3  ;;  %v2767_v4 = vld [vmem:[%s3329_s3 + $0x108] sm:$0xff] (!%p285_p3)  }
   0x8   : > { %437 = vst [vmem:[#allocation2 + $0x10] sm:$0xff] (!%p285_p3), %v2860_v3  ;;  %438 = vst [vmem:[#allocation2 + $0x18] sm:$0x3] (!%p285_p3), %v2860_v3  ;;  %2539 = vmatprep.subr.bf16.mxu0 (!%p285_p3), %v2765_v1  ;;  %2444 = vmatpush3.bf16.msra.mxu1 (!%p285_p3), %v2764_v0  ;;  %v2769_v6 = vld [vmem:[%s3329_s3 + $0x110] sm:$0xff] (!%p285_p3)   ;;  %v2770_v7 = vld [vmem:[%s3329_s3 + $0x58] sm:$0xff] (!%p285_p3)  }
   0x9   : > { %439 = vst [vmem:[#allocation2 + $0x20] sm:$0xff] (!%p285_p3), %v2860_v3  ;;  %440 = vst [vmem:[#allocation2 + $0x28] sm:$0x3] (!%p285_p3), %v2860_v3  ;;  %2540 = vmatpush3.bf16.msra.mxu0 (!%p285_p3), %v2765_v1  ;;  %2445 = vmatprep.subr.bf16.mxu1 (!%p285_p3), %v2766_v2  ;;  %v2771_v8 = vld [vmem:[%s3329_s3 + $0x118] sm:$0xff] (!%p285_p3)   ;;  %v2772_v9 = vld [vmem:[%s3329_s3 + $0x60] sm:$0xff] (!%p285_p3)  }
   0xa   : > { %441 = vst [vmem:[#allocation2 + $0x30] sm:$0xff] (!%p285_p3), %v2860_v3  ;;  %442 = vst [vmem:[#allocation2 + $0x38] sm:$0x3] (!%p285_p3), %v2860_v3  ;;  %2541 = vmatprep.subr.bf16.mxu0 (!%p285_p3), %v2767_v4  ;;  %v2773_v10 = vld [vmem:[%s3329_s3 + $0x120] sm:$0xff] (!%p285_p3)   ;;  %v2774_v11 = vld [vmem:[%s3329_s3 + $0x68] sm:$0xff] (!%p285_p3)  }
   0xb   : > { %443 = vst [vmem:[#allocation2 + $0x40] sm:$0xff] (!%p285_p3), %v2860_v3  ;;  %444 = vst [vmem:[#allocation2 + $0x48] sm:$0x3] (!%p285_p3), %v2860_v3  ;;  %v2993_v13 = vld [vmem:[%s3327_s1] ss:$0 sm:$0xff] (!%p285_p3)  ;;  %v2775_v14 = vld [vmem:[%s3329_s3 + $0x128] sm:$0xff] (!%p285_p3)  }
   0xc   : > { %445 = vst [vmem:[#allocation2 + $0x50] sm:$0xff] (!%p285_p3), %v2860_v3  ;;  %446 = vst [vmem:[#allocation2 + $0x58] sm:$0x3] (!%p285_p3), %v2860_v3  ;;  %2446 = vmatpush3.bf16.msra.mxu1 (!%p285_p3), %v2766_v2  ;;  %v3001_v17 = vld [vmem:[%s3328_s2] ss:$0 sm:$0xff] (!%p285_p3)  ;;  %v2776_v21 = vld [vmem:[%s3329_s3 + $0x70] sm:$0xff] (!%p285_p3)  }
   0xd   : > { %447 = vst [vmem:[#allocation2 + $0x60] sm:$0xff] (!%p285_p3), %v2860_v3  ;;  %448 = vst [vmem:[#allocation2 + $0x68] sm:$0x3] (!%p285_p3), %v2860_v3  ;;  %2542 = vmatpush3.bf16.msra.mxu0 (!%p285_p3), %v2767_v4  ;;  %2447 = vmatprep.subr.bf16.mxu1 (!%p285_p3), %v2768_v5  ;;  %v2777_v24 = vld [vmem:[%s3329_s3 + $0x130] sm:$0xff] (!%p285_p3)   ;;  %v2778_v30 = vld [vmem:[%s3329_s3 + $0x78] sm:$0xff] (!%p285_p3)  }
   0xe   : > { %449 = vst [vmem:[#allocation2 + $0x70] sm:$0xff] %v2860_v3  ;;  %450 = vst [vmem:[#allocation2 + $0x78] sm:$0x3] %v2860_v3  ;;  %s3339_s24 = smov (!%p343_p4, %s2850_s24), 1  ;;  %2543 = vmatprep.subr.bf16.mxu0 %v2769_v6  ;;  %v492_v27 = vld [vmem:[#allocation2 + $0x1] sm:$0xff]  ;;  %v2779_v35 = vld [vmem:[%s3329_s3 + $0x138] sm:$0xff]  }
   0xf   : > { %451 = vst [vmem:[#allocation2 + $0x80] sm:$0xff] %v2860_v3  ;;  %452 = vst [vmem:[#allocation2 + $0x88] sm:$0x3] %v2860_v3  ;;  %s2972_s21 = sshll.u32 %s3339_s24, 5  ;;  %v2780_v40 = vld [vmem:[%s3329_s3] sm:$0xff]   ;;  %v2782_v47 = vld [vmem:[%s3329_s3 + $0x8] sm:$0xff]   ;;  %s373_s19 = scalar_lea.vmem %s3332_s6, %s3339_s24 }
  0x10   : > { %453 = vst [vmem:[#allocation2 + $0x90] sm:$0xff] %v2860_v3  ;;  %454 = vst [vmem:[#allocation2 + $0x98] sm:$0x3] %v2860_v3  ;;  %2448 = vmatpush3.bf16.msra.mxu1 %v2768_v5  ;;  %s2984_s9 = scalar_lea.vmem %s3326_s0, %s2972_s21  ;;  %v2781_v41 = vld [vmem:[%s3329_s3 + $0x140] sm:$0xff]   ;;  %v2783_v51 = vld [vmem:[%s3329_s3 + $0x148] sm:$0xff]   ;;  %s359_s15 = scalar_lea.vmem %s3330_s4, %s2972_s21 }
  0x11   : > { %2544 = vmatpush3.bf16.msra.mxu0 %v2769_v6  ;;  %2449 = vmatprep.subr.bf16.mxu1 %v2770_v7  ;;  %v2275_v12 = vld [vmem:[%s2984_s9] sm:$0xff]   ;;  %v2326_v20 = vld [vmem:[%s2984_s9 + $0x8] sm:$0xff]   ;;  %v2327_v42 = vld [vmem:[%s2984_s9 + $0x10] sm:$0xff]   ;;  %s367_s17 = scalar_lea.vmem %s3331_s5, %s2972_s21  ;;  %s379_s23 = scalar_lea.vmem %s3333_s7, %s3339_s24 }
  0x12   : > { %2545 = vmatprep.subr.bf16.mxu0 %v2771_v8  ;;  %v2276_v15 = vunpack.c.l.bf16 %v2275_v12  ;;  %v2277_v16 = vunpack.c.h.bf16 %v2275_v12  ;;  %v2280_v22 = vunpack.c.l.bf16 %v2326_v20  ;;  %v2281_v23 = vunpack.c.h.bf16 %v2326_v20  ;;  %v2328_v50 = vld [vmem:[%s2984_s9 + $0x18] sm:$0xff]   ;;  %v2784_v58 = vld [vmem:[%s3329_s3 + $0x10] sm:$0xff]  }
  0x13   : > { %v2284_v44 = vunpack.c.l.bf16 %v2327_v42  ;;  %v2285_v45 = vunpack.c.h.bf16 %v2327_v42  ;;  %v2288_v52 = vunpack.c.l.bf16 %v2328_v50  ;;  %v2289_v53 = vunpack.c.h.bf16 %v2328_v50  ;;  %v2785_v61 = vld [vmem:[%s3329_s3 + $0x150] sm:$0xff]   ;;  %v2786_v0 = vld [vmem:[%s3329_s3 + $0x18] sm:$0xff]  }
  0x14   : > { %2450 = vmatpush3.bf16.msra.mxu1 %v2770_v7  ;;  %v405_v18 = vmul.f32 %v2276_v15, %v2993_v13  ;;  %v406_v19 = vmul.f32 %v2277_v16, %v2993_v13  ;;  %v407_v28 = vmul.f32 %v2280_v22, %v2993_v13  ;;  %v408_v29 = vmul.f32 %v2281_v23, %v2993_v13  ;;  %v2789_v15 = vld [vmem:[%s3329_s3 + $0x160] sm:$0xff]   ;;  %v2790_v16 = vld [vmem:[%s3329_s3 + $0x28] sm:$0xff]   ;;  %v2794_v20 = vld [vmem:[%s3329_s3 + $0x38] sm:$0xff]  }
  0x15   : > { %2546 = vmatpush3.bf16.msra.mxu0 %v2771_v8  ;;  %2451 = vmatprep.subr.bf16.mxu1 %v2772_v9  ;;  %v409_v48 = vmul.f32 %v2284_v44, %v2993_v13  ;;  %v410_v49 = vmul.f32 %v2285_v45, %v2993_v13  ;;  %v411_v56 = vmul.f32 %v2288_v52, %v2993_v13  ;;  %v2801_v44 = vld [vmem:[%s3329_s3 + $0x190] sm:$0xff]   ;;  %v2805_v52 = vld [vmem:[%s3329_s3 + $0x1a0] sm:$0xff]  }
  0x16   : > { %2547 = vmatprep.subr.bf16.mxu0 %v2773_v10  ;;  %v419_v25 = vadd.f32 %v3001_v17, %v405_v18  ;;  %v420_v26 = vadd.f32 %v3001_v17, %v406_v19  ;;  %v421_v33 = vadd.f32 %v3001_v17, %v407_v28  ;;  %v422_v34 = vadd.f32 %v3001_v17, %v408_v29  ;;  %v2792_v18 = vld [vmem:[%s3329_s3 + $0x30] sm:$0xff]  }
  0x17   : > { %v423_v54 = vadd.f32 %v3001_v17, %v409_v48  ;;  %v424_v55 = vadd.f32 %v3001_v17, %v410_v49  ;;  %v412_v57 = vmul.f32 %v2289_v53, %v2993_v13  ;;  %v425_v62 = vadd.f32 %v3001_v17, %v411_v56  ;;  %v2793_v19 = vld [vmem:[%s3329_s3 + $0x170] sm:$0xff]   ;;  %v2802_v48 = vld [vmem:[%s3329_s3 + $0x98] sm:$0xff]   ;;  %v2806_v53 = vld [vmem:[%s3329_s3 + $0xa8] sm:$0xff]  }
  0x18   : > { %2452 = vmatpush3.bf16.msra.mxu1 %v2772_v9  ;;  %v427_v31 = vmax.f32 %v419_v25, 0.0  ;;  %v428_v32 = vmax.f32 %v420_v26, 0.0  ;;  %v429_v38 = vmax.f32 %v421_v33, 0.0  ;;  %v430_v39 = vmax.f32 %v422_v34, 0.0  ;;  %v2787_v9 = vld [vmem:[%s3329_s3 + $0x158] sm:$0xff]   ;;  %v2797_v26 = vld [vmem:[%s3329_s3 + $0x180] sm:$0xff]  }
  0x19   : > { %2548 = vmatpush3.bf16.msra.mxu0 %v2773_v10  ;;  %2453 = vmatprep.subr.bf16.mxu1 %v2774_v11  ;;  %v431_v59 = vmax.f32 %v423_v54, 0.0  ;;  %v432_v60 = vmax.f32 %v424_v55, 0.0  ;;  %v426_v63 = vadd.f32 %v3001_v17, %v412_v57  ;;  %v433_v5 = vmax.f32 %v425_v62, 0.0  ;;  %v2791_v17 = vld [vmem:[%s3329_s3 + $0x168] sm:$0xff]   ;;  %v2803_v49 = vld [vmem:[%s3329_s3 + $0x198] sm:$0xff]   ;;  %v2808_v55 = vld [vmem:[%s3329_s3 + $0xb0] sm:$0xff]  }
  0x1a   : > { %2549 = vmatprep.subr.bf16.mxu0 %v2775_v14  ;;  %456 = vst [vmem:[#allocation2 + $0x11] sm:$0xff] %v427_v31  ;;  %v500_v36 = vpack.c.bf16 %v427_v31, %v492_v27  ;;  %457 = vst [vmem:[#allocation2 + $0x21] sm:$0xff] %v428_v32  ;;  %v1055_v37 = vpack.c.bf16 %v428_v32, %v427_v31  ;;  %v3031_v43 = vpack.c.bf16 %v429_v38, %v428_v32  ;;  %v2798_v34 = vld [vmem:[%s3329_s3 + $0x88] sm:$0xff]   ;;  %v2809_v56 = vld [vmem:[%s3329_s3 + $0x1b0] sm:$0xff]  }
  0x1b   : > { %458 = vst [vmem:[#allocation2 + $0x31] sm:$0xff] %v429_v38  ;;  %459 = vst [vmem:[#allocation2 + $0x41] sm:$0xff] %v430_v39  ;;  %v1056_v46 = vpack.c.bf16 %v430_v39, %v429_v38  ;;  %v3058_v1 = vpack.c.bf16 %v431_v59, %v430_v39  ;;  %v1057_v2 = vpack.c.bf16 %v432_v60, %v431_v59  ;;  %v3062_v6 = vmax.f32 %v426_v63, 0.0  ;;  %v2807_v54 = vld [vmem:[%s3329_s3 + $0x1a8] sm:$0xff]   ;;  %v2810_v57 = vld [vmem:[%s3329_s3 + $0xb8] sm:$0xff]  }
  0x1c   : > { %2454 = vmatpush3.bf16.msra.mxu1 %v2774_v11  ;;  %2459 = vmatprep.mubr.bf16.mxu1 %v500_v36  ;;  %460 = vst [vmem:[#allocation2 + $0x51] sm:$0xff] %v431_v59  ;;  %461 = vst [vmem:[#allocation2 + $0x61] sm:$0xff] %v432_v60  ;;  %v3072_v10 = vpack.c.bf16 %v433_v5, %v432_v60  ;;  %v2812_v59 = vld [vmem:[%s3329_s3 + $0xc0] sm:$0xff]   ;;  %v2814_v62 = vld [vmem:[%s3329_s3 + $0xc8] sm:$0xff]  }
  0x1d   : > { %2550 = vmatpush3.bf16.msra.mxu0 %v2775_v14  ;;  %2455 = vmatprep.subr.bf16.mxu1 %v2776_v21  ;;  %462 = vst [vmem:[#allocation2 + $0x71] sm:$0xff] %v433_v5  ;;  %463 = vst [vmem:[#allocation2 + $0x81] sm:$0xff] %v3062_v6  ;;  %v1058_v11 = vpack.c.bf16 %v3062_v6, %v433_v5  ;;  %v2788_v14 = vld [vmem:[%s3329_s3 + $0x20] sm:$0xff]   ;;  %v2815_v63 = vld [vmem:[%s3329_s3 + $0x1c8] sm:$0xff]  }
  0x1e   : > { %2551 = vmatprep.subr.bf16.mxu0 %v2777_v24  ;;  %2555 = vmatprep.mubr.bf16.mxu0 %v1055_v37  ;;  %v2800_v37 = vld [vmem:[%s3329_s3 + $0x90] sm:$0xff]   ;;  %v2813_v60 = vld [vmem:[%s3329_s3 + $0x1c0] sm:$0xff]  }
  0x20   : > { %2456 = vmatpush3.bf16.msra.mxu1 %v2776_v21  ;;  %v2795_v21 = vld [vmem:[%s3329_s3 + $0x178] sm:$0xff]  }
  0x21   : > { %2552 = vmatpush3.bf16.msra.mxu0 %v2777_v24  ;;  %2457 = vmatprep.subr.bf16.mxu1 %v2778_v30  ;;  %v3060_v4 = vld [vmem:[#allocation2 + $0x10] sm:$0xff]  ;;  %v3066_v8 = vld [vmem:[#allocation2 + $0x22] sm:$0xff] }
  0x22   : > { %2553 = vmatprep.subr.bf16.mxu0 %v2779_v35  ;;  %v3064_v7 = vld [vmem:[#allocation2 + $0x12] sm:$0xff]  ;;  %v472_v12 = vpack.c.bf16 %v3060_v4, %v2860_v3  ;;  %v3105_v22 = vld [vmem:[#allocation2 + $0x20] sm:$0xff] }
  0x23   : > { %v1205_v13 = vpack.c.bf16 %v3066_v8, %v3064_v7  ;;  %v3107_v23 = vld [vmem:[#allocation2 + $0x30] sm:$0xff]  ;;  %v2796_v24 = vld [vmem:[%s3329_s3 + $0x80] sm:$0xff]  }
  0x24   : > { %2458 = vmatpush3.bf16.msra.mxu1 %v2778_v30  ;;  %v3112_v25 = vld [vmem:[#allocation2 + $0x32] sm:$0xff]  ;;  %v3117_v27 = vld [vmem:[#allocation2 + $0x42] sm:$0xff]  ;;  %v473_v30 = vpack.c.bf16 %v3107_v23, %v3105_v22 }
  0x25   : > { %2554 = vmatpush3.bf16.msra.mxu0 %v2779_v35  ;;  %2467 = vmatprep.subr.bf16.mxu1 %v2780_v40  ;;  %v3119_v28 = vld [vmem:[#allocation2 + $0x40] sm:$0xff]  ;;  %v3121_v29 = vld [vmem:[#allocation2 + $0x50] sm:$0xff]  ;;  %v1206_v32 = vpack.c.bf16 %v3117_v27, %v3112_v25  ;;  %v2799_v35 = vld [vmem:[%s3329_s3 + $0x188] sm:$0xff]  }
  0x26   : > { %2563 = vmatprep.subr.bf16.mxu0 %v2781_v41  ;;  %v3125_v31 = vld [vmem:[#allocation2 + $0x52] sm:$0xff]  ;;  %v3129_v33 = vld [vmem:[#allocation2 + $0x62] sm:$0xff]  ;;  %v3139_v36 = vpack.c.bf16 %v3121_v29, %v3119_v28 }
  0x27   : > { %2460 = vmatmul.mubr.bf16.vlgmr.msra.gmra.mrb[0].mxu1 %v3031_v43  ;;  %v1207_v38 = vpack.c.bf16 %v3129_v33, %v3125_v31  ;;  %v3146_v39 = vld [vmem:[#allocation2 + $0x60] sm:$0xff] }
  0x28   : > { %2468 = vmatpush3.bf16.msra.mxu1 %v2780_v40  ;;  %2556 = vmatmul.mubr.bf16.vlgmr.msra.gmra.mrb[0].mxu0 %v1056_v46  ;;  %v3148_v40 = vld [vmem:[#allocation2 + $0x70] sm:$0xff]  ;;  %v3152_v42 = vld [vmem:[#allocation2 + $0x82] sm:$0xff] }
  0x29   : > { %2564 = vmatpush3.bf16.msra.mxu0 %v2781_v41  ;;  %2469 = vmatprep.subr.bf16.mxu1 %v2782_v47  ;;  %v3150_v41 = vld [vmem:[#allocation2 + $0x72] sm:$0xff]  ;;  %v475_v45 = vpack.c.bf16 %v3148_v40, %v3146_v39  ;;  %v747_v46 = vld [vmem:[#allocation2 + $0x2] sm:$0xff] }
  0x2a   : > { %2565 = vmatprep.subr.bf16.mxu0 %v2783_v51  ;;  %2463 = vmatprep.mubr.bf16.mxu1 %v3058_v1  ;;  %v755_v50 = vpack.c.bf16 %v3064_v7, %v747_v46  ;;  %v3218_v5 = vld [vmem:[#allocation2 + $0x80] sm:$0xff]  ;;  %v2817_v7 = vld [vmem:[%s3329_s3 + $0x1d0] sm:$0xff]  }
  0x2b   : > { %2559 = vmatprep.mubr.bf16.mxu0 %v1057_v2  ;;  %v2816_v2 = vld [vmem:[%s3329_s3 + $0xd0] sm:$0xff]  }
  0x2c   : > { %2470 = vmatpush3.bf16.msra.mxu1 %v2782_v47  ;;  %v1208_v47 = vpack.c.bf16 %v3152_v42, %v3150_v41 }
  0x2d   : > { %2566 = vmatpush3.bf16.msra.mxu0 %v2783_v51  ;;  %2471 = vmatprep.subr.bf16.mxu1 %v2784_v58  ;;  %v2804_v51 = vld [vmem:[%s3329_s3 + $0xa0] sm:$0xff]  }
  0x2e   : > { %2567 = vmatprep.subr.bf16.mxu0 %v2785_v61 }
  0x2f   : > { %2464 = vmatmul.mubr.bf16.gmra.mrb[4].mxu1 %v3072_v10 }
  0x30   : > { %2472 = vmatpush3.bf16.msra.mxu1 %v2784_v58  ;;  %2560 = vmatmul.mubr.bf16.gmra.mrb[4].mxu0 %v1058_v11  ;;  %v2811_v58 = vld [vmem:[%s3329_s3 + $0x1b8] sm:$0xff]  }
  0x31   : > { %2568 = vmatpush3.bf16.msra.mxu0 %v2785_v61  ;;  %2473 = vmatprep.subr.bf16.mxu1 %v2786_v0  ;;  %v3201_v61 = vpack.c.bf16 %v3112_v25, %v3066_v8  ;;  %v3226_v8 = vpack.c.bf16 %v3150_v41, %v3129_v33  ;;  %v2818_v11 = vld [vmem:[%s3329_s3 + $0xd8] sm:$0xff]   ;;  %v908_v25 = vpack.c.bf16 %v3218_v5, %v3148_v40 }
  0x32   : > { %2569 = vmatprep.subr.bf16.mxu0 %v2787_v9  ;;  %2483 = vmatprep.mubr.bf16.mxu1 %v472_v12  ;;  %v2819_v12 = vld [vmem:[%s3329_s3 + $0x1d8] sm:$0xff]  }
  0x33   : > { %2579 = vmatprep.mubr.bf16.mxu0 %v1205_v13  ;;  %v905_v13 = vpack.c.bf16 %v3105_v22, %v3060_v4  ;;  %v2822_v4 = vld [vmem:[%s3329_s3 + $0xe8] sm:$0xff]   ;;  %v907_v22 = vpack.c.bf16 %v3146_v39, %v3121_v29  ;;  %v1655_v29 = vld [vmem:[#allocation2 + $0x92] sm:$0xff] }
  0x34   : > { %2474 = vmatpush3.bf16.msra.mxu1 %v2786_v0  ;;  %v3211_v0 = vpack.c.bf16 %v3125_v31, %v3117_v27  ;;  %v2834_v27 = vld [vmem:[%s3329_s3 + $0x230] sm:$0xff]  }
  0x35   : > { %2570 = vmatpush3.bf16.msra.mxu0 %v2787_v9  ;;  %2475 = vmatprep.subr.bf16.mxu1 %v2788_v14  ;;  %v1359_v9 = vpack.c.bf16 %v2860_v3, %v3218_v5  ;;  %v2820_v3 = vld [vmem:[%s3329_s3 + $0xe0] sm:$0xff]  }
  0x36   : > { %2571 = vmatprep.subr.bf16.mxu0 %v2789_v15 }
  0x38   : > { %2476 = vmatpush3.bf16.msra.mxu1 %v2788_v14  ;;  %v2821_v14 = vld [vmem:[%s3329_s3 + $0x1e0] sm:$0xff]  }
  0x39   : > { %2572 = vmatpush3.bf16.msra.mxu0 %v2789_v15  ;;  %2477 = vmatprep.subr.bf16.mxu1 %v2790_v16  ;;  %v2823_v15 = vld [vmem:[%s3329_s3 + $0x1e8] sm:$0xff]  }
  0x3a   : > { %2573 = vmatprep.subr.bf16.mxu0 %v2791_v17 }
  0x3c   : > { %2478 = vmatpush3.bf16.msra.mxu1 %v2790_v16  ;;  %v2824_v16 = vld [vmem:[%s3329_s3 + $0xf0] sm:$0xff]  }
  0x3d   : > { %2574 = vmatpush3.bf16.msra.mxu0 %v2791_v17  ;;  %2479 = vmatprep.subr.bf16.mxu1 %v2792_v18  ;;  %v2826_v17 = vld [vmem:[%s3329_s3 + $0xf8] sm:$0xff]  }
  0x3e   : > { %2575 = vmatprep.subr.bf16.mxu0 %v2793_v19 }
  0x40   : > { %2480 = vmatpush3.bf16.msra.mxu1 %v2792_v18  ;;  %v2827_v18 = vld [vmem:[%s3329_s3 + $0x1f8] sm:$0xff]  }
  0x41   : > { %2576 = vmatpush3.bf16.msra.mxu0 %v2793_v19  ;;  %2481 = vmatprep.subr.bf16.mxu1 %v2794_v20  ;;  %v2828_v19 = vld [vmem:[%s3329_s3 + $0x200] sm:$0xff]  }
  0x42   : > { %2577 = vmatprep.subr.bf16.mxu0 %v2795_v21 }
  0x44   : > { %2482 = vmatpush3.bf16.msra.mxu1 %v2794_v20  ;;  %v906_v20 = vpack.c.bf16 %v3119_v28, %v3107_v23  ;;  %v2830_v23 = vld [vmem:[%s3329_s3 + $0x210] sm:$0xff]   ;;  %v2835_v28 = vld [vmem:[%s3329_s3 + $0x238] sm:$0xff]  }
  0x45   : > { %2578 = vmatpush3.bf16.msra.mxu0 %v2795_v21  ;;  %2491 = vmatprep.subr.bf16.mxu1 %v2796_v24  ;;  %v2829_v21 = vld [vmem:[%s3329_s3 + $0x208] sm:$0xff]  }
  0x46   : > { %2587 = vmatprep.subr.bf16.mxu0 %v2797_v26 }
  0x47   : > { %2484 = vmatmul.mubr.bf16.vlgmr.msra.gmra.mrb[0].mxu1 %v473_v30 }
  0x48   : > { %2492 = vmatpush3.bf16.msra.mxu1 %v2796_v24  ;;  %2580 = vmatmul.mubr.bf16.vlgmr.msra.gmra.mrb[0].mxu0 %v1206_v32  ;;  %v1505_v24 = vld [vmem:[#allocation2 + $0x91] sm:$0xff] }
  0x49   : > { %2588 = vmatpush3.bf16.msra.mxu0 %v2797_v26  ;;  %2493 = vmatprep.subr.bf16.mxu1 %v2798_v34  ;;  %v1509_v26 = vpack.c.bf16 %v1505_v24, %v3062_v6  ;;  %v2833_v6 = vld [vmem:[%s3329_s3 + $0x228] sm:$0xff]  }
  0x4a   : > { %2589 = vmatprep.subr.bf16.mxu0 %v2799_v35  ;;  %2487 = vmatprep.mubr.bf16.mxu1 %v3139_v36 }
  0x4b   : > { %2583 = vmatprep.mubr.bf16.mxu0 %v1207_v38 }
  0x4c   : > { %2494 = vmatpush3.bf16.msra.mxu1 %v2798_v34 }
  0x4d   : > { %2590 = vmatpush3.bf16.msra.mxu0 %v2799_v35  ;;  %2495 = vmatprep.subr.bf16.mxu1 %v2800_v37 }
  0x4e   : > { %2591 = vmatprep.subr.bf16.mxu0 %v2801_v44 }
  0x4f   : > { %2488 = vmatmul.mubr.bf16.gmra.mrb[4].mxu1 %v475_v45 }
  0x50   : > { %2496 = vmatpush3.bf16.msra.mxu1 %v2800_v37  ;;  %2584 = vmatmul.mubr.bf16.gmra.mrb[4].mxu0 %v1208_v47 }
  0x51   : > { %2592 = vmatpush3.bf16.msra.mxu0 %v2801_v44  ;;  %2497 = vmatprep.subr.bf16.mxu1 %v2802_v48 }
  0x52   : > { %2593 = vmatprep.subr.bf16.mxu0 %v2803_v49  ;;  %2507 = vmatprep.mubr.bf16.mxu1 %v755_v50  ;;  %v2291_v50 = vld [vmem:[%s359_s15] sm:$0xff]  }
  0x53   : > { %2603 = vmatprep.mubr.bf16.mxu0 %v473_v30  ;;  %v1659_v30 = vpack.c.bf16 %v1655_v29, %v3152_v42 }
  0x54   : > { %2498 = vmatpush3.bf16.msra.mxu1 %v2802_v48  ;;  %v2329_v48 = vld [vmem:[%s359_s15 + $0x8] sm:$0xff]  }
  0x55   : > { %2594 = vmatpush3.bf16.msra.mxu0 %v2803_v49  ;;  %2499 = vmatprep.subr.bf16.mxu1 %v2804_v51  ;;  %v2331_v49 = vld [vmem:[%s359_s15 + $0x18] sm:$0xff]  }
  0x56   : > { %2595 = vmatprep.subr.bf16.mxu0 %v2805_v52 }
  0x58   : > { %2500 = vmatpush3.bf16.msra.mxu1 %v2804_v51  ;;  %v2330_v51 = vld [vmem:[%s359_s15 + $0x10] sm:$0xff]  }
  0x59   : > { %2596 = vmatpush3.bf16.msra.mxu0 %v2805_v52  ;;  %2501 = vmatprep.subr.bf16.mxu1 %v2806_v53  ;;  %v2296_v52 = vunpack.c.l.bf16 %v2329_v48  ;;  %v2301_v5 = vunpack.c.h.bf16 %v2330_v51 }
  0x5a   : > { %2597 = vmatprep.subr.bf16.mxu0 %v2807_v54 }
  0x5c   : > { %2502 = vmatpush3.bf16.msra.mxu1 %v2806_v53 }
  0x5d   : > { %2598 = vmatpush3.bf16.msra.mxu0 %v2807_v54  ;;  %2503 = vmatprep.subr.bf16.mxu1 %v2808_v55  ;;  %v2304_v54 = vunpack.c.l.bf16 %v2331_v49 }
  0x5e   : > { %2599 = vmatprep.subr.bf16.mxu0 %v2809_v56 }
  0x60   : > { %2504 = vmatpush3.bf16.msra.mxu1 %v2808_v55 }
  0x61   : > { %2600 = vmatpush3.bf16.msra.mxu0 %v2809_v56  ;;  %2505 = vmatprep.subr.bf16.mxu1 %v2810_v57 }
  0x62   : > { %2601 = vmatprep.subr.bf16.mxu0 %v2811_v58 }
  0x64   : > { %2506 = vmatpush3.bf16.msra.mxu1 %v2810_v57  ;;  %v2292_v57 = vunpack.c.l.bf16 %v2291_v50 }
  0x65   : > { %2602 = vmatpush3.bf16.msra.mxu0 %v2811_v58  ;;  %2515 = vmatprep.subr.bf16.mxu1 %v2812_v59 }
  0x66   : > { %2611 = vmatprep.subr.bf16.mxu0 %v2813_v60 }
  0x67   : > { %2508 = vmatmul.mubr.bf16.vlgmr.msra.gmra.mrb[0].mxu1 %v3201_v61 }
  0x68   : > { %2516 = vmatpush3.bf16.msra.mxu1 %v2812_v59  ;;  %2604 = vmatmul.mubr.bf16.vlgmr.msra.gmra.mrb[0].mxu0 %v3139_v36  ;;  %v2300_v59 = vunpack.c.l.bf16 %v2330_v51 }
  0x69   : > { %2612 = vmatpush3.bf16.msra.mxu0 %v2813_v60  ;;  %2517 = vmatprep.subr.bf16.mxu1 %v2814_v62  ;;  %v2305_v60 = vunpack.c.h.bf16 %v2331_v49 }
  0x6a   : > { %2613 = vmatprep.subr.bf16.mxu0 %v2815_v63  ;;  %2511 = vmatprep.mubr.bf16.mxu1 %v3211_v0 }
  0x6b   : > { %2607 = vmatprep.mubr.bf16.mxu0 %v475_v45 }
  0x6c   : > { %2518 = vmatpush3.bf16.msra.mxu1 %v2814_v62 }
  0x6d   : > { %2614 = vmatpush3.bf16.msra.mxu0 %v2815_v63  ;;  %2519 = vmatprep.subr.bf16.mxu1 %v2816_v2 }
  0x6e   : > { %2615 = vmatprep.subr.bf16.mxu0 %v2817_v7 }
  0x6f   : > { %2512 = vmatmul.mubr.bf16.gmra.mrb[4].mxu1 %v3226_v8 }
  0x70   : > { %2520 = vmatpush3.bf16.msra.mxu1 %v2816_v2  ;;  %2608 = vmatmul.mubr.bf16.gmra.mrb[4].mxu0 %v1359_v9 }
  0x71   : > { %2616 = vmatpush3.bf16.msra.mxu0 %v2817_v7  ;;  %2521 = vmatprep.subr.bf16.mxu1 %v2818_v11 }
  0x72   : > { %2617 = vmatprep.subr.bf16.mxu0 %v2819_v12  ;;  %2531 = vmatprep.mubr.bf16.mxu1 %v905_v13 }
  0x73   : > { %2627 = vmatprep.mubr.bf16.mxu0 %v3031_v43  ;;  %v2825_v43 = vld [vmem:[%s3329_s3 + $0x1f0] sm:$0xff]  }
  0x74   : > { %2522 = vmatpush3.bf16.msra.mxu1 %v2818_v11  ;;  %v2293_v11 = vunpack.c.h.bf16 %v2291_v50 }
  0x75   : > { %2618 = vmatpush3.bf16.msra.mxu0 %v2819_v12  ;;  %2523 = vmatprep.subr.bf16.mxu1 %v2820_v3 }
  0x76   : > { %2619 = vmatprep.subr.bf16.mxu0 %v2821_v14 }
  0x78   : > { %2524 = vmatpush3.bf16.msra.mxu1 %v2820_v3 }
  0x79   : > { %2620 = vmatpush3.bf16.msra.mxu0 %v2821_v14  ;;  %2525 = vmatprep.subr.bf16.mxu1 %v2822_v4 }
  0x7a   : > { %2621 = vmatprep.subr.bf16.mxu0 %v2823_v15 }
  0x7c   : > { %2526 = vmatpush3.bf16.msra.mxu1 %v2822_v4 }
  0x7d   : > { %2622 = vmatpush3.bf16.msra.mxu0 %v2823_v15  ;;  %2527 = vmatprep.subr.bf16.mxu1 %v2824_v16 }
  0x7e   : > { %2623 = vmatprep.subr.bf16.mxu0 %v2825_v43 }
  0x80   : > { %2528 = vmatpush3.bf16.msra.mxu1 %v2824_v16 }
  0x81   : > { %2624 = vmatpush3.bf16.msra.mxu0 %v2825_v43  ;;  %2529 = vmatprep.subr.bf16.mxu1 %v2826_v17 }
  0x82   : > { %2625 = vmatprep.subr.bf16.mxu0 %v2827_v18 }
  0x84   : > { %2530 = vmatpush3.bf16.msra.mxu1 %v2826_v17 }
  0x85   : > { %2626 = vmatpush3.bf16.msra.mxu0 %v2827_v18  ;;  %2659 = vmatprep.subr.bf16.mxu1 %v2828_v19 }
  0x86   : > { %2635 = vmatprep.subr.bf16.mxu0 %v2828_v19 }
  0x87   : > { %2532 = vmatmul.mubr.bf16.vlgmr.msra.gmra.mrb[0].mxu1 %v906_v20 }
  0x88   : > { %2628 = vmatmul.mubr.bf16.vlgmr.msra.gmra.mrb[0].mxu0 %v3058_v1  ;;  %2667 = vmatpush3.bf16.msra.mxu1 %v2828_v19  ;;  %v2831_v1 = vld [vmem:[%s3329_s3 + $0x218] sm:$0xff]  }
  0x89   : > { %2636 = vmatpush3.bf16.msra.mxu0 %v2828_v19  ;;  %2660 = vmatprep.subr.bf16.mxu1 %v2829_v21 }
  0x8a   : > { %2637 = vmatprep.subr.bf16.mxu0 %v2829_v21  ;;  %2535 = vmatprep.mubr.bf16.mxu1 %v907_v22 }
  0x8b   : > { %2631 = vmatprep.mubr.bf16.mxu0 %v3072_v10  ;;  %v2832_v10 = vld [vmem:[%s3329_s3 + $0x220] sm:$0xff]  }
  0x8c   : > { %2668 = vmatpush3.bf16.msra.mxu1 %v2829_v21 }
  0x8d   : > { %2638 = vmatpush3.bf16.msra.mxu0 %v2829_v21  ;;  %2661 = vmatprep.subr.bf16.mxu1 %v2830_v23 }
  0x8e   : > { %2639 = vmatprep.subr.bf16.mxu0 %v2830_v23 }
  0x8f   : > { %2536 = vmatmul.mubr.bf16.gmra.mrb[4].mxu1 %v908_v25 }
  0x90   : > { %2632 = vmatmul.mubr.bf16.gmra.mrb[4].mxu0 %v1509_v26  ;;  %2669 = vmatpush3.bf16.msra.mxu1 %v2830_v23 }
  0x91   : > { %2640 = vmatpush3.bf16.msra.mxu0 %v2830_v23  ;;  %2662 = vmatprep.subr.bf16.mxu1 %v2831_v1 }
  0x92   : > { %2641 = vmatprep.subr.bf16.mxu0 %v2831_v1  ;;  %2651 = vmatprep.mubr.bf16.mxu0 %v3201_v61 }
  0x93   : > { %2655 = vmatprep.mubr.bf16.mxu1 %v3226_v8 }
  0x94   : > { %2670 = vmatpush3.bf16.msra.mxu1 %v2831_v1 }
  0x95   : > { %2642 = vmatpush3.bf16.msra.mxu0 %v2831_v1  ;;  %2663 = vmatprep.subr.bf16.mxu1 %v2832_v10 }
  0x96   : > { %2643 = vmatprep.subr.bf16.mxu0 %v2832_v10 }
  0x98   : > { %2671 = vmatpush3.bf16.msra.mxu1 %v2832_v10 }
  0x99   : > { %2644 = vmatpush3.bf16.msra.mxu0 %v2832_v10  ;;  %2664 = vmatprep.subr.bf16.mxu1 %v2833_v6 }
  0x9a   : > { %2645 = vmatprep.subr.bf16.mxu0 %v2833_v6 }
  0x9c   : > { %2672 = vmatpush3.bf16.msra.mxu1 %v2833_v6 }
  0x9d   : > { %2646 = vmatpush3.bf16.msra.mxu0 %v2833_v6  ;;  %2665 = vmatprep.subr.bf16.mxu1 %v2834_v27 }
  0x9e   : > { %2647 = vmatprep.subr.bf16.mxu0 %v2834_v27 }
  0xa0   : > { %2673 = vmatpush3.bf16.msra.mxu1 %v2834_v27 }
  0xa1   : > { %2648 = vmatpush3.bf16.msra.mxu0 %v2834_v27  ;;  %2666 = vmatprep.subr.bf16.mxu1 %v2835_v28 }
  0xa2   : > { %2649 = vmatprep.subr.bf16.mxu0 %v2835_v28 }
  0xa4   : > { %2674 = vmatpush3.bf16.msra.mxu1 %v2835_v28 }
  0xa5   : > { %2650 = vmatpush3.bf16.msra.mxu0 %v2835_v28 }
  0xa7   : > { %2656 = vmatmul.mubr.bf16.vlgmr.msra.gmra.mrb[8].mxu1 %v1659_v30 }
  0xa8   : > { %2652 = vmatmul.mubr.bf16.vlgmr.msra.gmra.mrb[0].mxu0 %v3211_v0  ;;  %v2297_v0 = vunpack.c.h.bf16 %v2329_v48 }
 0x15a   : > { %v2533_v31 = vpop.f32.mrb[0].mxu1 }
 0x15b   : > { %v1008_v32 = vpop.f32.mrb[1].mxu1 }
 0x15c   : > { %v2534_v33 = vpop.f32.mrb[2].mxu1 }
 0x15d   : > { %v1011_v34 = vpop.f32.mrb[3].mxu1 }
 0x162   : > { %v2537_v35 = vpop.f32.mrb[4].mxu1 }
 0x163   : > { %v2633_v36 = vpop.f32.mrb[4].mxu0  ;;  %v1024_v37 = vpop.f32.mrb[5].mxu1 }
 0x164   : > { %v2679_v38 = vadd.f32 %v2633_v36, %v2537_v35  ;;  %v1625_v39 = vpop.f32.mrb[5].mxu0  ;;  %v2538_v40 = vpop.f32.mrb[6].mxu1 }
 0x165   : > { %v2681_v41 = vadd.f32 %v1625_v39, %v1024_v37  ;;  %v2634_v44 = vpop.f32.mrb[6].mxu0  ;;  %v1027_v45 = vpop.f32.mrb[7].mxu1 }
 0x166   : > { %v2683_v42 = vadd.f32 %v2634_v44, %v2538_v40  ;;  %v1628_v46 = vpop.f32.mrb[7].mxu0 }
 0x167   : > { %v2685_v47 = vadd.f32 %v1628_v46, %v1027_v45 }
 0x17a   : > { %v2657_v53 = vpop.f32.mrb[8].mxu1 }
 0x17b   : > { %v2653_v55 = vpop.f32.mrb[0].mxu0  ;;  %v2680_v56 = vadd.f32 %v2679_v38, %v2657_v53  ;;  %v1775_v58 = vpop.f32.mrb[9].mxu1 }
 0x17c   : > { %v2675_v61 = vadd.f32 %v2653_v55, %v2533_v31  ;;  %v1759_v62 = vpop.f32.mrb[1].mxu0  ;;  %v2682_v63 = vadd.f32 %v2681_v41, %v1775_v58  ;;  %v2658_v2 = vpop.f32.mrb[10].mxu1 }
 0x17d   : > { %v2676_v7 = vadd.f32 %v1759_v62, %v1008_v32  ;;  %v2654_v8 = vpop.f32.mrb[2].mxu0  ;;  %v2684_v9 = vadd.f32 %v2683_v42, %v2658_v2  ;;  %v1778_v12 = vpop.f32.mrb[11].mxu1  ;;  %v1820_v4 = vadd.f32 %v2680_v56, %v2304_v54 }
 0x17e   : > { %v2677_v13 = vadd.f32 %v2654_v8, %v2534_v33  ;;  %v1762_v3 = vpop.f32.mrb[3].mxu0  ;;  %v2686_v14 = vadd.f32 %v2685_v47, %v1778_v12  ;;  %v1816_v17 = vadd.f32 %v2675_v61, %v2296_v52  ;;  %v1818_v18 = vadd.f32 %v2682_v63, %v2300_v59 }
 0x17f   : > { %v1814_v15 = vadd.f32 %v2676_v7, %v2292_v57  ;;  %v1821_v16 = vadd.f32 %v2684_v9, %v2305_v60  ;;  %v2678_v43 = vadd.f32 %v1762_v3, %v1011_v34  ;;  %v1858_v38 = vmul.f32 %v1820_v4, %v1820_v4 }
 0x180   : > { %v1817_v19 = vadd.f32 %v2677_v13, %v2297_v0  ;;  %v1819_v20 = vadd.f32 %v2686_v14, %v2301_v5  ;;  %v1854_v6 = vmul.f32 %v1816_v17, %v1816_v17  ;;  %v1856_v32 = vmul.f32 %v1818_v18, %v1818_v18 }
 0x181   : > { %v2324_v21 = vpack.c.bf16 %v1821_v16, %v1820_v4  ;;  %v1815_v22 = vadd.f32 %v2678_v43, %v2293_v11  ;;  %v1852_v25 = vmul.f32 %v1814_v15, %v1814_v15  ;;  %v1859_v41 = vmul.f32 %v1821_v16, %v1821_v16 }
 0x182   : > { %v2314_v24 = vpack.c.bf16 %v1817_v19, %v1816_v17  ;;  %v2319_v23 = vpack.c.bf16 %v1819_v20, %v1818_v18  ;;  %v1855_v29 = vmul.f32 %v1817_v19, %v1817_v19  ;;  %v1857_v36 = vmul.f32 %v1819_v20, %v1819_v20 }
 0x183   : > { %2334 = vst [vmem:[%s367_s17 + $0x18] sm:$0xff] %v2324_v21   ;;  %v2309_v26 = vpack.c.bf16 %v1815_v22, %v1814_v15  ;;  %v1838_v1 = vadd.f32 %v1815_v22, %v1814_v15  ;;  %v1853_v10 = vmul.f32 %v1815_v22, %v1815_v22 }
 0x184   : > { %2332 = vst [vmem:[%s367_s17 + $0x8] sm:$0xff] %v2314_v24   ;;  %2333 = vst [vmem:[%s367_s17 + $0x10] sm:$0xff] %v2319_v23  }
 0x185   : > { %2310 = vst [vmem:[%s367_s17] sm:$0xff] %v2309_v26   ;;  %v1839_v27 = vadd.f32 %v1838_v1, %v1816_v17  ;;  %v1860_v28 = vadd.f32 %v1853_v10, %v1852_v25 }
 0x187   : > { %v1861_v30 = vadd.f32 %v1860_v28, %v1854_v6  ;;  %v1840_v31 = vadd.f32 %v1839_v27, %v1817_v19 }
 0x189   : > { %v1841_v33 = vadd.f32 %v1840_v31, %v1818_v18  ;;  %v1862_v34 = vadd.f32 %v1861_v30, %v1855_v29 }
 0x18b   : > { %v1842_v35 = vadd.f32 %v1841_v33, %v1819_v20  ;;  %v1863_v37 = vadd.f32 %v1862_v34, %v1856_v32 }
 0x18d   : > { %v1843_v39 = vadd.f32 %v1842_v35, %v1820_v4  ;;  %v1864_v40 = vadd.f32 %v1863_v37, %v1857_v36 }
 0x18f   : > { %v1844_v44 = vadd.f32 %v1843_v39, %v1821_v16  ;;  %v1865_v45 = vadd.f32 %v1864_v40, %v1858_v38 }
 0x191   : > { %v1845_v42 = vrot.slane %v1844_v44, 4  ;;  %v1866_v46 = vadd.f32 %v1865_v45, %v1859_v41 }
 0x193   : > { %v1846_v47 = vadd.f32 %v1845_v42, %v1844_v44  ;;  %v1867_v48 = vrot.slane %v1866_v46, 4 }
 0x195   : > { %v1847_v49 = vrot.slane %v1846_v47, 2  ;;  %v1868_v50 = vadd.f32 %v1867_v48, %v1866_v46 }
 0x197   : > { %v1848_v51 = vadd.f32 %v1847_v49, %v1846_v47  ;;  %v1869_v52 = vrot.slane %v1868_v50, 2 }
 0x199   : > { %v1849_v53 = vrot.slane %v1848_v51, 1  ;;  %v1870_v54 = vadd.f32 %v1869_v52, %v1868_v50 }
 0x19b   : > { %v1850_v55 = vadd.f32 %v1849_v53, %v1848_v51  ;;  %v1871_v56 = vrot.slane %v1870_v54, 1 }
 0x19d   : > { %1851 = vst [vmem:[%s373_s19] sm:$0x1] %v1850_v55  ;;  %v1872_v57 = vadd.f32 %v1871_v56, %v1870_v54 }
 0x19f   : > { %1873 = vst [vmem:[%s379_s23] sm:$0x1] %v1872_v57 }
 0x1a0 PF: > { %s18_s26 = sadd.s32 1, %s2858_s26   ;;  %s3334_s24 = smov %s2854_s25 }
 0x1a1   : > { %p15_p5 = scmp.ge.s32.totalorder %s18_s26, 4   ;;  %s3335_s25 = smov %s3337_s27 }
 0x1a3   :  { %17 = sbr.rel (!%p15_p5) target bundleno = 2 (0x2), region = 110 }

</bundles_post_ra>
